<compile_context>
chip_gen: v7x
topology: tpu7x:2x2x1
jax: 0.10.0
libtpu: 0.0.40
codegen_flags: <defaults>
</compile_context>

<pallas_src>
import math
import functools

import jax
import jax.numpy as jnp
from jax.experimental import pallas as pl
from jax.experimental.pallas import tpu as pltpu

_EPS_EVO = 1e-5   # EvoNorm2D eps
_EPS_BN = 1e-5    # BatchNorm2d eps

_TILE_VMEM_BUDGET_BYTES = 20 * 1024 * 1024   # target per-tile working set
_VMEM_LIMIT_BYTES = 48 * 1024 * 1024         # safe on v5e/v6e (128 MiB) and v7x (64 MiB)


def _pick_batch_tile(N, H, W, C, budget_bytes):
    """Largest divisor of N whose estimated per-tile working set fits the VMEM budget."""
    lane = 128
    c_pad = -(-C // lane) * lane            # channel-minor buffers pad lanes to 128
    k_pad = -(-(9 * C) // lane) * lane
    act = H * W * c_pad * 4                 # one lane-padded f32 activation per image
    pad = (H + 2) * (W + 2) * c_pad * 4
    im2col = H * W * k_pad * 4
    # double-buffered padded input + padded scratch + double-buffered out2 block
    # + im2col patches + 9 tap slices + a few f32 temps (out1 / evo / centered diff ...)
    per_image = 3 * pad + 2 * act + im2col + 13 * act
    nb = max(1, budget_bytes // per_image)
    for cand in range(min(int(nb), N), 0, -1):
        if N % cand == 0:
            return cand
    return 1


def _conv3x3_im2col(src_ref, w9_ref, NB, H, W, cin, conv_dtype):
    """3x3 / stride-1 conv on a zero-padded (NB, H+2, W+2, cin) ref as ONE MXU matmul.

    im2col patch order is (ky, kx, cin), matching w.reshape(9*cin, cout) of an HWIO weight.
    """
    taps = [src_ref[:, ky:ky + H, kx:kx + W, :]
            for ky in range(3) for kx in range(3)]
    patches = jnp.concatenate(taps, axis=-1).reshape(NB * H * W, 9 * cin)
    return jnp.dot(patches.astype(conv_dtype), w9_ref[...].astype(conv_dtype),
                   preferred_element_type=jnp.float32)


# --------------------------------------------------------------------------------------
# Kernel 1: per batch-tile  conv1 -> EvoNorm-S0 -> conv2, plus per-tile BN partial moments
# --------------------------------------------------------------------------------------
def _stage1_kernel(xpad_ref, w1_ref, w2_ref, gamma_ref, beta_ref, m_ref, mt_ref,
                   out2_ref, stats_ref, pad_ref, *, groups, conv_dtype):
    NB, Hp, Wp, C = xpad_ref.shape
    H, W = Hp - 2, Wp - 2
    nhw = NB * H * W
    cg = C // groups
    n_g = float(cg * H * W)

    # ---- conv1: 3x3, stride 1, pad 1, no bias (input already zero-padded in wrapper) ----
    out1 = _conv3x3_im2col(xpad_ref, w1_ref, NB, H, W, C, conv_dtype)      # (nhw, C) f32

    # ---- EvoNorm2D 'S0' (efficient): swish(x) / group_std(x) * gamma + beta ----
    # Centered, two-pass group variance (unbiased, ddof=1) -> no cancellation issues.
    o3 = out1.reshape(NB, H * W, C)
    s1 = jnp.sum(o3, axis=1)                                               # (NB, C)
    mu_g = jnp.dot(s1, m_ref[...], preferred_element_type=jnp.float32) / n_g      # (NB, G)
    mu_c = jnp.dot(mu_g, mt_ref[...], preferred_element_type=jnp.float32)         # (NB, C)
    d = o3 - mu_c[:, None, :]
    m2_g = jnp.dot(jnp.sum(d * d, axis=1), m_ref[...],
                   preferred_element_type=jnp.float32)                            # (NB, G)
    inv_std_g = jax.lax.rsqrt(m2_g / (n_g - 1.0) + _EPS_EVO)               # EUP rsqrt
    inv_std_c = jnp.dot(inv_std_g, mt_ref[...], preferred_element_type=jnp.float32)
    evo = (o3 * jax.nn.sigmoid(o3)) * inv_std_c[:, None, :] * gamma_ref[...] + beta_ref[...]

    # ---- conv2: reuse ONE padded scratch; clear only the halo (not the whole buffer) ----
    zrow = jnp.zeros((NB, 1, Wp, C), jnp.float32)
    zcol = jnp.zeros((NB, Hp, 1, C), jnp.float32)
    pad_ref[:, 0:1, :, :] = zrow
    pad_ref[:, Hp - 1:Hp, :, :] = zrow
    pad_ref[:, :, 0:1, :] = zcol
    pad_ref[:, :, Wp - 1:Wp, :] = zcol
    pad_ref[:, 1:H + 1, 1:W + 1, :] = evo.reshape(NB, H, W, C)
    out2 = _conv3x3_im2col(pad_ref, w2_ref, NB, H, W, C, conv_dtype)       # (nhw, C) f32

    # ---- per-tile BatchNorm partial statistics (centered: tile mean + tile M2) ----
    mu_t = jnp.sum(out2, axis=0, keepdims=True) * (1.0 / nhw)              # (1, C)
    dt = out2 - mu_t
    m2_t = jnp.sum(dt * dt, axis=0, keepdims=True)                         # (1, C)
    stats_ref[:, 0:1, :] = mu_t.reshape(1, 1, C)
    stats_ref[:, 1:2, :] = m2_t.reshape(1, 1, C)

    # NOTE: out2 is written channel-minor here (masked stores when C < 128); kernel 2 and
    # the final output run lane-dense on the (N, H, W*C) view of this buffer.
    out2_ref[...] = out2.reshape(NB, H, W, C)


# --------------------------------------------------------------------------------------
# Kernel 2: lane-dense BN apply + residual add + ReLU  (works on (NB, H, W*C) slabs)
# --------------------------------------------------------------------------------------
def _stage2_kernel(out2_ref, x_ref, scale_ref, shift_ref, o_ref):
    o_ref[...] = jnp.maximum(
        out2_ref[...] * scale_ref[...] + shift_ref[...] + x_ref[...], 0.0)


def basic_block_forward(x, w1, w2, gamma, beta, bn_gamma, bn_beta,
                        *, batch_tile=None, conv_dtype=jnp.float32):
    N, H, W, Cin = x.shape
    C = w1.shape[-1]
    assert Cin == C, "identity shortcut requires in_planes == planes (downsample=None)"
    assert w1.shape == (3, 3, C, C) and w2.shape == (3, 3, C, C)

    groups = C if 32 > C else 32            # EvoNorm2D: groups = min(32, C)
    assert C % groups == 0, "EvoNorm groups must divide C"
    cg = C // groups

    if batch_tile is None:
        NB = _pick_batch_tile(N, H, W, C, _TILE_VMEM_BUDGET_BYTES)
    else:
        NB = int(batch_tile)
    assert N % NB == 0, "batch tile must divide N"
    NT = N // NB

    # one-hot channel->group membership (C, G) and its transpose (tiny, reused every tile)
    M = (jnp.arange(C)[:, None] // cg == jnp.arange(groups)[None, :]).astype(jnp.float32)
    MT = jnp.transpose(M)

    x_pad = jnp.pad(x, ((0, 0), (1, 1), (1, 1), (0, 0)))        # zero-pad once, in HBM
    w1_9 = w1.reshape(9 * C, C)                                  # im2col weight layout
    w2_9 = w2.reshape(9 * C, C)

    cp = pltpu.CompilerParams(dimension_semantics=("parallel",),
                              vmem_limit_bytes=_VMEM_LIMIT_BYTES)

    kernel1 = functools.partial(_stage1_kernel, groups=groups, conv_dtype=conv_dtype)
    out2, stats = pl.pallas_call(
        kernel1,
        grid=(NT,),
        in_specs=[
            pl.BlockSpec((NB, H + 2, W + 2, C), lambda i: (i, 0, 0, 0)),
            pl.BlockSpec((9 * C, C), lambda i: (0, 0)),
            pl.BlockSpec((9 * C, C), lambda i: (0, 0)),
            pl.BlockSpec((1, 1, C), lambda i: (0, 0, 0)),
            pl.BlockSpec((1, 1, C), lambda i: (0, 0, 0)),
            pl.BlockSpec((C, groups), lambda i: (0, 0)),
            pl.BlockSpec((groups, C), lambda i: (0, 0)),
        ],
        out_specs=[
            pl.BlockSpec((NB, H, W, C), lambda i: (i, 0, 0, 0)),
            pl.BlockSpec((1, 2, C), lambda i: (i, 0, 0)),
        ],
        out_shape=[
            jax.ShapeDtypeStruct((N, H, W, C), jnp.float32),
            jax.ShapeDtypeStruct((NT, 2, C), jnp.float32),
        ],
        scratch_shapes=[pltpu.VMEM((NB, H + 2, W + 2, C), jnp.float32)],
        compiler_params=cp,
    )(x_pad, w1_9, w2_9, gamma.reshape(1, 1, C), beta.reshape(1, 1, C), M, MT)

    # ---- combine per-tile BN moments (Chan's parallel variance) on tiny (NT, C) arrays ----
    mu_t = stats[:, 0, :]                                        # (NT, C)
    m2_t = stats[:, 1, :]                                        # (NT, C)
    n_t = float(NB * H * W)
    mean = jnp.mean(mu_t, axis=0)                                # equal tile counts
    m2 = jnp.sum(m2_t, axis=0) + n_t * jnp.sum((mu_t - mean[None, :]) ** 2, axis=0)
    var = m2 / float(N * H * W)                                  # biased, as BN training stats
    inv_std = jax.lax.rsqrt(var + _EPS_BN)
    scale = bn_gamma * inv_std                                   # fold BN into scale/shift
    shift = bn_beta - mean * scale

    # ---- lane-dense BN apply + residual + ReLU (last dim W*C, free reshapes in HBM) ----
    WC = W * C
    scale_wc = jnp.tile(scale, W).reshape(1, 1, WC)
    shift_wc = jnp.tile(shift, W).reshape(1, 1, WC)

    y_wc = pl.pallas_call(
        _stage2_kernel,
        grid=(NT,),
        in_specs=[
            pl.BlockSpec((NB, H, WC), lambda i: (i, 0, 0)),
            pl.BlockSpec((NB, H, WC), lambda i: (i, 0, 0)),
            pl.BlockSpec((1, 1, WC), lambda i: (0, 0, 0)),
            pl.BlockSpec((1, 1, WC), lambda i: (0, 0, 0)),
        ],
        out_specs=pl.BlockSpec((NB, H, WC), lambda i: (i, 0, 0)),
        out_shape=jax.ShapeDtypeStruct((N, H, WC), jnp.float32),
        compiler_params=cp,
    )(out2.reshape(N, H, WC), x.reshape(N, H, WC), scale_wc, shift_wc)

    return y_wc.reshape(N, H, W, C)


def _reference(x, w1, w2, gamma, beta, bn_gamma, bn_beta):
    """Pure-JAX reference of the PyTorch BasicBlock forward (NHWC)."""
    dn = jax.lax.conv_dimension_numbers(x.shape, w1.shape, ("NHWC", "HWIO", "NHWC"))
    out1 = jax.lax.conv_general_dilated(x, w1, (1, 1), "SAME", dimension_numbers=dn)
    N, H, W, C = out1.shape
    groups = min(32, C)
    cg = C // groups
    xg = out1.reshape(N, H, W, groups, cg)
    var = jnp.var(xg, axis=(1, 2, 4), keepdims=True, ddof=1)
    std = jnp.broadcast_to(jnp.sqrt(var + _EPS_EVO), xg.shape).reshape(N, H, W, C)
    evo = (out1 * jax.nn.sigmoid(out1)) / std * gamma.reshape(1, 1, 1, C) + beta.reshape(1, 1, 1, C)
    out2 = jax.lax.conv_general_dilated(evo, w2, (1, 1), "SAME", dimension_numbers=dn)
    mean = jnp.mean(out2, axis=(0, 1, 2), keepdims=True)
    var2 = jnp.var(out2, axis=(0, 1, 2), keepdims=True)   # biased
    bn = (out2 - mean) / jnp.sqrt(var2 + _EPS_BN) * bn_gamma.reshape(1, 1, 1, C) \
        + bn_beta.reshape(1, 1, 1, C)
    return jnp.maximum(bn + x, 0.0)


if __name__ == "__main__":
    key = jax.random.PRNGKey(0)
    ks = jax.random.split(key, 7)
    N, H, W, C = 2, 16, 16, 8          # in_planes = planes = 8, stride = 1, downsample = None
    x = jax.random.normal(ks[0], (N, H, W, C), jnp.float32)
    w_scale = 1.0 / (3.0 * math.sqrt(C))
    w1 = jax.random.normal(ks[1], (3, 3, C, C), jnp.float32) * w_scale
    w2 = jax.random.normal(ks[2], (3, 3, C, C), jnp.float32) * w_scale
    gamma = 1.0 + 0.1 * jax.random.normal(ks[3], (C,), jnp.float32)     # EvoNorm gamma
    beta = 0.1 * jax.random.normal(ks[4], (C,), jnp.float32)            # EvoNorm beta
    bn_gamma = 1.0 + 0.1 * jax.random.normal(ks[5], (C,), jnp.float32)  # bn2 weight
    bn_beta = 0.1 * jax.random.normal(ks[6], (C,), jnp.float32)         # bn2 bias

    # batch_tile=1 -> grid of 2 steps: exercises the grid, the per-tile scratch reuse and
    # the cross-tile (Chan) BN-statistics combination.
    fwd = jax.jit(functools.partial(basic_block_forward, batch_tile=1))
    out = jax.block_until_ready(fwd(x, w1, w2, gamma, beta, bn_gamma, bn_beta))

    ref = _reference(x, w1, w2, gamma, beta, bn_gamma, bn_beta)
    err = float(jnp.max(jnp.abs(out - ref)))
    assert err < 1e-3, f"mismatch vs reference: max abs err = {err}"
    print("KERNEL_OK")
</pallas_src>

<mosaic_0001>
module attributes {stable_mosaic.version = 11 : i64} {
  func.func @_stage1_kernel(%arg0: i32, %arg1: memref<1x18x18x8xf32, #tpu.memory_space<vmem>>, %arg2: memref<72x8xf32, #tpu.memory_space<vmem>>, %arg3: memref<72x8xf32, #tpu.memory_space<vmem>>, %arg4: memref<1x1x8xf32, #tpu.memory_space<vmem>>, %arg5: memref<1x1x8xf32, #tpu.memory_space<vmem>>, %arg6: memref<8x8xf32, #tpu.memory_space<vmem>>, %arg7: memref<8x8xf32, #tpu.memory_space<vmem>>, %arg8: memref<1x16x16x8xf32, #tpu.memory_space<vmem>>, %arg9: memref<1x2x8xf32, #tpu.memory_space<vmem>>, %arg10: memref<1x18x18x8xf32, #tpu.memory_space<vmem>>) attributes {dimension_semantics = [#tpu.dimension_semantics<parallel>], iteration_bounds = array<i64: 2>, scalar_prefetch = 0 : i64, scratch_operands = 1 : i64, tpu.core_type = #tpu.core_type<tc>, window_params = [{transform_indices = @transform_0, window_bounds = array<i64: 1, 18, 18, 8>}, {pipeline_mode = #tpu.pipeline_mode<synchronous>, transform_indices = @transform_1, window_bounds = array<i64: 72, 8>}, {pipeline_mode = #tpu.pipeline_mode<synchronous>, transform_indices = @transform_2, window_bounds = array<i64: 72, 8>}, {pipeline_mode = #tpu.pipeline_mode<synchronous>, transform_indices = @transform_3, window_bounds = array<i64: 1, 1, 8>}, {pipeline_mode = #tpu.pipeline_mode<synchronous>, transform_indices = @transform_4, window_bounds = array<i64: 1, 1, 8>}, {pipeline_mode = #tpu.pipeline_mode<synchronous>, transform_indices = @transform_5, window_bounds = array<i64: 8, 8>}, {pipeline_mode = #tpu.pipeline_mode<synchronous>, transform_indices = @transform_6, window_bounds = array<i64: 8, 8>}, {transform_indices = @transform_7, window_bounds = array<i64: 1, 16, 16, 8>}, {transform_indices = @transform_8, window_bounds = array<i64: 1, 2, 8>}]} {
    %c0 = arith.constant 0 : index
    %c0_0 = arith.constant 0 : index
    %c0_1 = arith.constant 0 : index
    %c0_2 = arith.constant 0 : index
    %0 = vector.load %arg1[%c0, %c0_0, %c0_1, %c0_2] : memref<1x18x18x8xf32, #tpu.memory_space<vmem>>, vector<1x16x16x8xf32>
    %c0_3 = arith.constant 0 : index
    %c0_4 = arith.constant 0 : index
    %c1 = arith.constant 1 : index
    %c0_5 = arith.constant 0 : index
    %1 = vector.load %arg1[%c0_3, %c0_4, %c1, %c0_5] : memref<1x18x18x8xf32, #tpu.memory_space<vmem>>, vector<1x16x16x8xf32>
    %c0_6 = arith.constant 0 : index
    %c0_7 = arith.constant 0 : index
    %c2 = arith.constant 2 : index
    %c0_8 = arith.constant 0 : index
    %2 = vector.load %arg1[%c0_6, %c0_7, %c2, %c0_8] : memref<1x18x18x8xf32, #tpu.memory_space<vmem>>, vector<1x16x16x8xf32>
    %c0_9 = arith.constant 0 : index
    %c1_10 = arith.constant 1 : index
    %c0_11 = arith.constant 0 : index
    %c0_12 = arith.constant 0 : index
    %3 = vector.load %arg1[%c0_9, %c1_10, %c0_11, %c0_12] : memref<1x18x18x8xf32, #tpu.memory_space<vmem>>, vector<1x16x16x8xf32>
    %c0_13 = arith.constant 0 : index
    %c1_14 = arith.constant 1 : index
    %c1_15 = arith.constant 1 : index
    %c0_16 = arith.constant 0 : index
    %4 = vector.load %arg1[%c0_13, %c1_14, %c1_15, %c0_16] : memref<1x18x18x8xf32, #tpu.memory_space<vmem>>, vector<1x16x16x8xf32>
    %c0_17 = arith.constant 0 : index
    %c1_18 = arith.constant 1 : index
    %c2_19 = arith.constant 2 : index
    %c0_20 = arith.constant 0 : index
    %5 = vector.load %arg1[%c0_17, %c1_18, %c2_19, %c0_20] : memref<1x18x18x8xf32, #tpu.memory_space<vmem>>, vector<1x16x16x8xf32>
    %c0_21 = arith.constant 0 : index
    %c2_22 = arith.constant 2 : index
    %c0_23 = arith.constant 0 : index
    %c0_24 = arith.constant 0 : index
    %6 = vector.load %arg1[%c0_21, %c2_22, %c0_23, %c0_24] : memref<1x18x18x8xf32, #tpu.memory_space<vmem>>, vector<1x16x16x8xf32>
    %c0_25 = arith.constant 0 : index
    %c2_26 = arith.constant 2 : index
    %c1_27 = arith.constant 1 : index
    %c0_28 = arith.constant 0 : index
    %7 = vector.load %arg1[%c0_25, %c2_26, %c1_27, %c0_28] : memref<1x18x18x8xf32, #tpu.memory_space<vmem>>, vector<1x16x16x8xf32>
    %c0_29 = arith.constant 0 : index
    %c2_30 = arith.constant 2 : index
    %c2_31 = arith.constant 2 : index
    %c0_32 = arith.constant 0 : index
    %8 = vector.load %arg1[%c0_29, %c2_30, %c2_31, %c0_32] : memref<1x18x18x8xf32, #tpu.memory_space<vmem>>, vector<1x16x16x8xf32>
    %9 = tpu.concatenate %0, %1, %2, %3, %4, %5, %6, %7, %8 in 3 : vector<1x16x16x8xf32>, vector<1x16x16x8xf32>, vector<1x16x16x8xf32>, vector<1x16x16x8xf32>, vector<1x16x16x8xf32>, vector<1x16x16x8xf32>, vector<1x16x16x8xf32>, vector<1x16x16x8xf32>, vector<1x16x16x8xf32> -> vector<1x16x16x72xf32>
    %10 = vector.shape_cast %9 : vector<1x16x16x72xf32> to vector<256x72xf32>
    %c0_33 = arith.constant 0 : index
    %c0_34 = arith.constant 0 : index
    %11 = vector.load %arg2[%c0_33, %c0_34] : memref<72x8xf32, #tpu.memory_space<vmem>>, vector<72x8xf32>
    %cst = arith.constant dense<0.000000e+00> : vector<256x8xf32>
    %12 = tpu.matmul %10, %11, %cst {dimension_numbers = #tpu.dot_dimension_numbers<[1], [0], [0], [1], [0, 0, 1, 1], [], []>} : vector<256x72xf32>, vector<72x8xf32>, vector<256x8xf32> -> vector<256x8xf32>
    %13 = vector.shape_cast %12 : vector<256x8xf32> to vector<1x256x8xf32>
    %cst_35 = arith.constant dense<0.000000e+00> : vector<1x8xf32>
    %14 = vector.multi_reduction <add>, %13, %cst_35 [1] : vector<1x256x8xf32> to vector<1x8xf32>
    %c0_36 = arith.constant 0 : index
    %c0_37 = arith.constant 0 : index
    %15 = vector.load %arg6[%c0_36, %c0_37] : memref<8x8xf32, #tpu.memory_space<vmem>>, vector<8x8xf32>
    %cst_38 = arith.constant dense<0.000000e+00> : vector<1x8xf32>
    %16 = tpu.matmul %14, %15, %cst_38 {dimension_numbers = #tpu.dot_dimension_numbers<[1], [0], [0], [1], [0, 0, 1, 1], [], []>} : vector<1x8xf32>, vector<8x8xf32>, vector<1x8xf32> -> vector<1x8xf32>
    %cst_39 = arith.constant 2.560000e+02 : f32
    %17 = vector.broadcast %cst_39 : f32 to vector<1x8xf32>
    %18 = arith.divf %16, %17 : vector<1x8xf32>
    %c0_40 = arith.constant 0 : index
    %c0_41 = arith.constant 0 : index
    %19 = vector.load %arg7[%c0_40, %c0_41] : memref<8x8xf32, #tpu.memory_space<vmem>>, vector<8x8xf32>
    %cst_42 = arith.constant dense<0.000000e+00> : vector<1x8xf32>
    %20 = tpu.matmul %18, %19, %cst_42 {dimension_numbers = #tpu.dot_dimension_numbers<[1], [0], [0], [1], [0, 0, 1, 1], [], []>} : vector<1x8xf32>, vector<8x8xf32>, vector<1x8xf32> -> vector<1x8xf32>
    %21 = vector.shape_cast %20 : vector<1x8xf32> to vector<1x1x8xf32>
    %22 = vector.broadcast %21 : vector<1x1x8xf32> to vector<1x256x8xf32>
    %23 = arith.subf %13, %22 : vector<1x256x8xf32>
    %24 = arith.mulf %23, %23 : vector<1x256x8xf32>
    %cst_43 = arith.constant dense<0.000000e+00> : vector<1x8xf32>
    %25 = vector.multi_reduction <add>, %24, %cst_43 [1] : vector<1x256x8xf32> to vector<1x8xf32>
    %c0_44 = arith.constant 0 : index
    %c0_45 = arith.constant 0 : index
    %26 = vector.load %arg6[%c0_44, %c0_45] : memref<8x8xf32, #tpu.memory_space<vmem>>, vector<8x8xf32>
    %cst_46 = arith.constant dense<0.000000e+00> : vector<1x8xf32>
    %27 = tpu.matmul %25, %26, %cst_46 {dimension_numbers = #tpu.dot_dimension_numbers<[1], [0], [0], [1], [0, 0, 1, 1], [], []>} : vector<1x8xf32>, vector<8x8xf32>, vector<1x8xf32> -> vector<1x8xf32>
    %cst_47 = arith.constant 2.550000e+02 : f32
    %28 = vector.broadcast %cst_47 : f32 to vector<1x8xf32>
    %29 = arith.divf %27, %28 : vector<1x8xf32>
    %cst_48 = arith.constant 9.99999974E-6 : f32
    %30 = vector.broadcast %cst_48 : f32 to vector<1x8xf32>
    %31 = arith.addf %29, %30 : vector<1x8xf32>
    %32 = math.rsqrt %31 : vector<1x8xf32>
    %c0_49 = arith.constant 0 : index
    %c0_50 = arith.constant 0 : index
    %33 = vector.load %arg7[%c0_49, %c0_50] : memref<8x8xf32, #tpu.memory_space<vmem>>, vector<8x8xf32>
    %cst_51 = arith.constant dense<0.000000e+00> : vector<1x8xf32>
    %34 = tpu.matmul %32, %33, %cst_51 {dimension_numbers = #tpu.dot_dimension_numbers<[1], [0], [0], [1], [0, 0, 1, 1], [], []>} : vector<1x8xf32>, vector<8x8xf32>, vector<1x8xf32> -> vector<1x8xf32>
    %35 = arith.negf %13 : vector<1x256x8xf32>
    %36 = math.exp %35 : vector<1x256x8xf32>
    %cst_52 = arith.constant 1.000000e+00 : f32
    %37 = vector.broadcast %cst_52 : f32 to vector<1x256x8xf32>
    %38 = arith.addf %37, %36 : vector<1x256x8xf32>
    %39 = arith.divf %37, %38 : vector<1x256x8xf32>
    %40 = arith.mulf %13, %39 : vector<1x256x8xf32>
    %41 = vector.shape_cast %34 : vector<1x8xf32> to vector<1x1x8xf32>
    %42 = vector.broadcast %41 : vector<1x1x8xf32> to vector<1x256x8xf32>
    %43 = arith.mulf %40, %42 : vector<1x256x8xf32>
    %c0_53 = arith.constant 0 : index
    %c0_54 = arith.constant 0 : index
    %c0_55 = arith.constant 0 : index
    %44 = vector.load %arg4[%c0_53, %c0_54, %c0_55] : memref<1x1x8xf32, #tpu.memory_space<vmem>>, vector<1x1x8xf32>
    %45 = vector.broadcast %44 : vector<1x1x8xf32> to vector<1x256x8xf32>
    %46 = arith.mulf %43, %45 : vector<1x256x8xf32>
    %c0_56 = arith.constant 0 : index
    %c0_57 = arith.constant 0 : index
    %c0_58 = arith.constant 0 : index
    %47 = vector.load %arg5[%c0_56, %c0_57, %c0_58] : memref<1x1x8xf32, #tpu.memory_space<vmem>>, vector<1x1x8xf32>
    %48 = vector.broadcast %47 : vector<1x1x8xf32> to vector<1x256x8xf32>
    %49 = arith.addf %46, %48 : vector<1x256x8xf32>
    %cst_59 = arith.constant 0.000000e+00 : f32
    %50 = vector.broadcast %cst_59 : f32 to vector<1x1x18x8xf32>
    %cst_60 = arith.constant 0.000000e+00 : f32
    %51 = vector.broadcast %cst_60 : f32 to vector<1x18x1x8xf32>
    %c0_61 = arith.constant 0 : index
    %c0_62 = arith.constant 0 : index
    %c0_63 = arith.constant 0 : index
    %c0_64 = arith.constant 0 : index
    %52 = vector.load %arg10[%c0_61, %c0_62, %c0_63, %c0_64] : memref<1x18x18x8xf32, #tpu.memory_space<vmem>>, vector<1x1x18x8xf32>
    tpu.vector_store %arg10[%c0_61, %c0_62, %c0_63, %c0_64], %50 {strides = array<i32>} : memref<1x18x18x8xf32, #tpu.memory_space<vmem>>, vector<1x1x18x8xf32>,
    %c0_65 = arith.constant 0 : index
    %c17 = arith.constant 17 : index
    %c0_66 = arith.constant 0 : index
    %c0_67 = arith.constant 0 : index
    %53 = vector.load %arg10[%c0_65, %c17, %c0_66, %c0_67] : memref<1x18x18x8xf32, #tpu.memory_space<vmem>>, vector<1x1x18x8xf32>
    tpu.vector_store %arg10[%c0_65, %c17, %c0_66, %c0_67], %50 {strides = array<i32>} : memref<1x18x18x8xf32, #tpu.memory_space<vmem>>, vector<1x1x18x8xf32>,
    %c0_68 = arith.constant 0 : index
    %c0_69 = arith.constant 0 : index
    %c0_70 = arith.constant 0 : index
    %c0_71 = arith.constant 0 : index
    %54 = vector.load %arg10[%c0_68, %c0_69, %c0_70, %c0_71] : memref<1x18x18x8xf32, #tpu.memory_space<vmem>>, vector<1x18x1x8xf32>
    tpu.vector_store %arg10[%c0_68, %c0_69, %c0_70, %c0_71], %51 {strides = array<i32>} : memref<1x18x18x8xf32, #tpu.memory_space<vmem>>, vector<1x18x1x8xf32>,
    %c0_72 = arith.constant 0 : index
    %c0_73 = arith.constant 0 : index
    %c17_74 = arith.constant 17 : index
    %c0_75 = arith.constant 0 : index
    %55 = vector.load %arg10[%c0_72, %c0_73, %c17_74, %c0_75] : memref<1x18x18x8xf32, #tpu.memory_space<vmem>>, vector<1x18x1x8xf32>
    tpu.vector_store %arg10[%c0_72, %c0_73, %c17_74, %c0_75], %51 {strides = array<i32>} : memref<1x18x18x8xf32, #tpu.memory_space<vmem>>, vector<1x18x1x8xf32>,
    %56 = vector.shape_cast %49 : vector<1x256x8xf32> to vector<1x16x16x8xf32>
    %c0_76 = arith.constant 0 : index
    %c1_77 = arith.constant 1 : index
    %c1_78 = arith.constant 1 : index
    %c0_79 = arith.constant 0 : index
    %57 = vector.load %arg10[%c0_76, %c1_77, %c1_78, %c0_79] : memref<1x18x18x8xf32, #tpu.memory_space<vmem>>, vector<1x16x16x8xf32>
    tpu.vector_store %arg10[%c0_76, %c1_77, %c1_78, %c0_79], %56 {strides = array<i32>} : memref<1x18x18x8xf32, #tpu.memory_space<vmem>>, vector<1x16x16x8xf32>,
    %c0_80 = arith.constant 0 : index
    %c0_81 = arith.constant 0 : index
    %c0_82 = arith.constant 0 : index
    %c0_83 = arith.constant 0 : index
    %58 = vector.load %arg10[%c0_80, %c0_81, %c0_82, %c0_83] : memref<1x18x18x8xf32, #tpu.memory_space<vmem>>, vector<1x16x16x8xf32>
    %c0_84 = arith.constant 0 : index
    %c0_85 = arith.constant 0 : index
    %c1_86 = arith.constant 1 : index
    %c0_87 = arith.constant 0 : index
    %59 = vector.load %arg10[%c0_84, %c0_85, %c1_86, %c0_87] : memref<1x18x18x8xf32, #tpu.memory_space<vmem>>, vector<1x16x16x8xf32>
    %c0_88 = arith.constant 0 : index
    %c0_89 = arith.constant 0 : index
    %c2_90 = arith.constant 2 : index
    %c0_91 = arith.constant 0 : index
    %60 = vector.load %arg10[%c0_88, %c0_89, %c2_90, %c0_91] : memref<1x18x18x8xf32, #tpu.memory_space<vmem>>, vector<1x16x16x8xf32>
    %c0_92 = arith.constant 0 : index
    %c1_93 = arith.constant 1 : index
    %c0_94 = arith.constant 0 : index
    %c0_95 = arith.constant 0 : index
    %61 = vector.load %arg10[%c0_92, %c1_93, %c0_94, %c0_95] : memref<1x18x18x8xf32, #tpu.memory_space<vmem>>, vector<1x16x16x8xf32>
    %c0_96 = arith.constant 0 : index
    %c1_97 = arith.constant 1 : index
    %c1_98 = arith.constant 1 : index
    %c0_99 = arith.constant 0 : index
    %62 = vector.load %arg10[%c0_96, %c1_97, %c1_98, %c0_99] : memref<1x18x18x8xf32, #tpu.memory_space<vmem>>, vector<1x16x16x8xf32>
    %c0_100 = arith.constant 0 : index
    %c1_101 = arith.constant 1 : index
    %c2_102 = arith.constant 2 : index
    %c0_103 = arith.constant 0 : index
    %63 = vector.load %arg10[%c0_100, %c1_101, %c2_102, %c0_103] : memref<1x18x18x8xf32, #tpu.memory_space<vmem>>, vector<1x16x16x8xf32>
    %c0_104 = arith.constant 0 : index
    %c2_105 = arith.constant 2 : index
    %c0_106 = arith.constant 0 : index
    %c0_107 = arith.constant 0 : index
    %64 = vector.load %arg10[%c0_104, %c2_105, %c0_106, %c0_107] : memref<1x18x18x8xf32, #tpu.memory_space<vmem>>, vector<1x16x16x8xf32>
    %c0_108 = arith.constant 0 : index
    %c2_109 = arith.constant 2 : index
    %c1_110 = arith.constant 1 : index
    %c0_111 = arith.constant 0 : index
    %65 = vector.load %arg10[%c0_108, %c2_109, %c1_110, %c0_111] : memref<1x18x18x8xf32, #tpu.memory_space<vmem>>, vector<1x16x16x8xf32>
    %c0_112 = arith.constant 0 : index
    %c2_113 = arith.constant 2 : index
    %c2_114 = arith.constant 2 : index
    %c0_115 = arith.constant 0 : index
    %66 = vector.load %arg10[%c0_112, %c2_113, %c2_114, %c0_115] : memref<1x18x18x8xf32, #tpu.memory_space<vmem>>, vector<1x16x16x8xf32>
    %67 = tpu.concatenate %58, %59, %60, %61, %62, %63, %64, %65, %66 in 3 : vector<1x16x16x8xf32>, vector<1x16x16x8xf32>, vector<1x16x16x8xf32>, vector<1x16x16x8xf32>, vector<1x16x16x8xf32>, vector<1x16x16x8xf32>, vector<1x16x16x8xf32>, vector<1x16x16x8xf32>, vector<1x16x16x8xf32> -> vector<1x16x16x72xf32>
    %68 = vector.shape_cast %67 : vector<1x16x16x72xf32> to vector<256x72xf32>
    %c0_116 = arith.constant 0 : index
    %c0_117 = arith.constant 0 : index
    %69 = vector.load %arg3[%c0_116, %c0_117] : memref<72x8xf32, #tpu.memory_space<vmem>>, vector<72x8xf32>
    %cst_118 = arith.constant dense<0.000000e+00> : vector<256x8xf32>
    %70 = tpu.matmul %68, %69, %cst_118 {dimension_numbers = #tpu.dot_dimension_numbers<[1], [0], [0], [1], [0, 0, 1, 1], [], []>} : vector<256x72xf32>, vector<72x8xf32>, vector<256x8xf32> -> vector<256x8xf32>
    %cst_119 = arith.constant dense<0.000000e+00> : vector<8xf32>
    %71 = vector.multi_reduction <add>, %70, %cst_119 [0] : vector<256x8xf32> to vector<8xf32>
    %72 = vector.shape_cast %71 : vector<8xf32> to vector<1x8xf32>
    %cst_120 = arith.constant 3.906250e-03 : f32
    %73 = vector.broadcast %cst_120 : f32 to vector<1x8xf32>
    %74 = arith.mulf %72, %73 : vector<1x8xf32>
    %75 = vector.broadcast %74 : vector<1x8xf32> to vector<256x8xf32>
    %76 = arith.subf %70, %75 : vector<256x8xf32>
    %77 = arith.mulf %76, %76 : vector<256x8xf32>
    %cst_121 = arith.constant dense<0.000000e+00> : vector<8xf32>
    %78 = vector.multi_reduction <add>, %77, %cst_121 [0] : vector<256x8xf32> to vector<8xf32>
    %79 = vector.shape_cast %78 : vector<8xf32> to vector<1x8xf32>
    %80 = vector.shape_cast %74 : vector<1x8xf32> to vector<1x1x8xf32>
    %c0_122 = arith.constant 0 : index
    %c0_123 = arith.constant 0 : index
    %c0_124 = arith.constant 0 : index
    %81 = vector.load %arg9[%c0_122, %c0_123, %c0_124] : memref<1x2x8xf32, #tpu.memory_space<vmem>>, vector<1x1x8xf32>
    tpu.vector_store %arg9[%c0_122, %c0_123, %c0_124], %80 {strides = array<i32>} : memref<1x2x8xf32, #tpu.memory_space<vmem>>, vector<1x1x8xf32>,
    %82 = vector.shape_cast %79 : vector<1x8xf32> to vector<1x1x8xf32>
    %c0_125 = arith.constant 0 : index
    %c1_126 = arith.constant 1 : index
    %c0_127 = arith.constant 0 : index
    %83 = vector.load %arg9[%c0_125, %c1_126, %c0_127] : memref<1x2x8xf32, #tpu.memory_space<vmem>>, vector<1x1x8xf32>
    tpu.vector_store %arg9[%c0_125, %c1_126, %c0_127], %82 {strides = array<i32>} : memref<1x2x8xf32, #tpu.memory_space<vmem>>, vector<1x1x8xf32>,
    %84 = vector.shape_cast %70 : vector<256x8xf32> to vector<1x16x16x8xf32>
    %c0_128 = arith.constant 0 : index
    %c0_129 = arith.constant 0 : index
    %c0_130 = arith.constant 0 : index
    %c0_131 = arith.constant 0 : index
    %85 = vector.load %arg8[%c0_128, %c0_129, %c0_130, %c0_131] : memref<1x16x16x8xf32, #tpu.memory_space<vmem>>, vector<1x16x16x8xf32>
    tpu.vector_store %arg8[%c0_128, %c0_129, %c0_130, %c0_131], %84 {strides = array<i32>} : memref<1x16x16x8xf32, #tpu.memory_space<vmem>>, vector<1x16x16x8xf32>,
    return
  }
  func.func @transform_0(%arg0: i32) -> (i32, i32, i32, i32) {
    %c0_i32 = arith.constant 0 : i32
    %c0_i32_0 = arith.constant 0 : i32
    %c0_i32_1 = arith.constant 0 : i32
    %c0_i32_2 = arith.constant 0 : i32
    return %arg0, %c0_i32, %c0_i32_0, %c0_i32_1 : i32, i32, i32, i32
  }
  func.func @transform_1(%arg0: i32) -> (i32, i32) {
    %c0_i32 = arith.constant 0 : i32
    %c0_i32_0 = arith.constant 0 : i32
    %c0_i32_1 = arith.constant 0 : i32
    return %c0_i32, %c0_i32_0 : i32, i32
  }
  func.func @transform_2(%arg0: i32) -> (i32, i32) {
    %c0_i32 = arith.constant 0 : i32
    %c0_i32_0 = arith.constant 0 : i32
    %c0_i32_1 = arith.constant 0 : i32
    return %c0_i32, %c0_i32_0 : i32, i32
  }
  func.func @transform_3(%arg0: i32) -> (i32, i32, i32) {
    %c0_i32 = arith.constant 0 : i32
    %c0_i32_0 = arith.constant 0 : i32
    %c0_i32_1 = arith.constant 0 : i32
    %c0_i32_2 = arith.constant 0 : i32
    return %c0_i32, %c0_i32_0, %c0_i32_1 : i32, i32, i32
  }
  func.func @transform_4(%arg0: i32) -> (i32, i32, i32) {
    %c0_i32 = arith.constant 0 : i32
    %c0_i32_0 = arith.constant 0 : i32
    %c0_i32_1 = arith.constant 0 : i32
    %c0_i32_2 = arith.constant 0 : i32
    return %c0_i32, %c0_i32_0, %c0_i32_1 : i32, i32, i32
  }
  func.func @transform_5(%arg0: i32) -> (i32, i32) {
    %c0_i32 = arith.constant 0 : i32
    %c0_i32_0 = arith.constant 0 : i32
    %c0_i32_1 = arith.constant 0 : i32
    return %c0_i32, %c0_i32_0 : i32, i32
  }
  func.func @transform_6(%arg0: i32) -> (i32, i32) {
    %c0_i32 = arith.constant 0 : i32
    %c0_i32_0 = arith.constant 0 : i32
    %c0_i32_1 = arith.constant 0 : i32
    return %c0_i32, %c0_i32_0 : i32, i32
  }
  func.func @transform_7(%arg0: i32) -> (i32, i32, i32, i32) {
    %c0_i32 = arith.constant 0 : i32
    %c0_i32_0 = arith.constant 0 : i32
    %c0_i32_1 = arith.constant 0 : i32
    %c0_i32_2 = arith.constant 0 : i32
    return %arg0, %c0_i32, %c0_i32_0, %c0_i32_1 : i32, i32, i32, i32
  }
  func.func @transform_8(%arg0: i32) -> (i32, i32, i32) {
    %c0_i32 = arith.constant 0 : i32
    %c0_i32_0 = arith.constant 0 : i32
    %c0_i32_1 = arith.constant 0 : i32
    return %arg0, %c0_i32, %c0_i32_0 : i32, i32, i32
  }
}

module attributes {stable_mosaic.version = 11 : i64} {
  func.func @_stage2_kernel(%arg0: i32, %arg1: memref<1x16x128xf32, #tpu.memory_space<vmem>>, %arg2: memref<1x16x128xf32, #tpu.memory_space<vmem>>, %arg3: memref<1x1x128xf32, #tpu.memory_space<vmem>>, %arg4: memref<1x1x128xf32, #tpu.memory_space<vmem>>, %arg5: memref<1x16x128xf32, #tpu.memory_space<vmem>>) attributes {dimension_semantics = [#tpu.dimension_semantics<parallel>], iteration_bounds = array<i64: 2>, scalar_prefetch = 0 : i64, scratch_operands = 0 : i64, tpu.core_type = #tpu.core_type<tc>, window_params = [{transform_indices = @transform_0, window_bounds = array<i64: 1, 16, 128>}, {transform_indices = @transform_1, window_bounds = array<i64: 1, 16, 128>}, {pipeline_mode = #tpu.pipeline_mode<synchronous>, transform_indices = @transform_2, window_bounds = array<i64: 1, 1, 128>}, {pipeline_mode = #tpu.pipeline_mode<synchronous>, transform_indices = @transform_3, window_bounds = array<i64: 1, 1, 128>}, {transform_indices = @transform_4, window_bounds = array<i64: 1, 16, 128>}]} {
    %c0 = arith.constant 0 : index
    %c0_0 = arith.constant 0 : index
    %c0_1 = arith.constant 0 : index
    %0 = vector.load %arg1[%c0, %c0_0, %c0_1] : memref<1x16x128xf32, #tpu.memory_space<vmem>>, vector<1x16x128xf32>
    %c0_2 = arith.constant 0 : index
    %c0_3 = arith.constant 0 : index
    %c0_4 = arith.constant 0 : index
    %1 = vector.load %arg3[%c0_2, %c0_3, %c0_4] : memref<1x1x128xf32, #tpu.memory_space<vmem>>, vector<1x1x128xf32>
    %2 = vector.broadcast %1 : vector<1x1x128xf32> to vector<1x16x128xf32>
    %3 = arith.mulf %0, %2 : vector<1x16x128xf32>
    %c0_5 = arith.constant 0 : index
    %c0_6 = arith.constant 0 : index
    %c0_7 = arith.constant 0 : index
    %4 = vector.load %arg4[%c0_5, %c0_6, %c0_7] : memref<1x1x128xf32, #tpu.memory_space<vmem>>, vector<1x1x128xf32>
    %5 = vector.broadcast %4 : vector<1x1x128xf32> to vector<1x16x128xf32>
    %6 = arith.addf %3, %5 : vector<1x16x128xf32>
    %c0_8 = arith.constant 0 : index
    %c0_9 = arith.constant 0 : index
    %c0_10 = arith.constant 0 : index
    %7 = vector.load %arg2[%c0_8, %c0_9, %c0_10] : memref<1x16x128xf32, #tpu.memory_space<vmem>>, vector<1x16x128xf32>
    %8 = arith.addf %6, %7 : vector<1x16x128xf32>
    %cst = arith.constant 0.000000e+00 : f32
    %9 = vector.broadcast %cst : f32 to vector<1x16x128xf32>
    %10 = arith.maximumf %8, %9 : vector<1x16x128xf32>
    %c0_11 = arith.constant 0 : index
    %c0_12 = arith.constant 0 : index
    %c0_13 = arith.constant 0 : index
    %11 = vector.load %arg5[%c0_11, %c0_12, %c0_13] : memref<1x16x128xf32, #tpu.memory_space<vmem>>, vector<1x16x128xf32>
    tpu.vector_store %arg5[%c0_11, %c0_12, %c0_13], %10 {strides = array<i32>} : memref<1x16x128xf32, #tpu.memory_space<vmem>>, vector<1x16x128xf32>,
    return
  }
  func.func @transform_0(%arg0: i32) -> (i32, i32, i32) {
    %c0_i32 = arith.constant 0 : i32
    %c0_i32_0 = arith.constant 0 : i32
    %c0_i32_1 = arith.constant 0 : i32
    return %arg0, %c0_i32, %c0_i32_0 : i32, i32, i32
  }
  func.func @transform_1(%arg0: i32) -> (i32, i32, i32) {
    %c0_i32 = arith.constant 0 : i32
    %c0_i32_0 = arith.constant 0 : i32
    %c0_i32_1 = arith.constant 0 : i32
    return %arg0, %c0_i32, %c0_i32_0 : i32, i32, i32
  }
  func.func @transform_2(%arg0: i32) -> (i32, i32, i32) {
    %c0_i32 = arith.constant 0 : i32
    %c0_i32_0 = arith.constant 0 : i32
    %c0_i32_1 = arith.constant 0 : i32
    %c0_i32_2 = arith.constant 0 : i32
    return %c0_i32, %c0_i32_0, %c0_i32_1 : i32, i32, i32
  }
  func.func @transform_3(%arg0: i32) -> (i32, i32, i32) {
    %c0_i32 = arith.constant 0 : i32
    %c0_i32_0 = arith.constant 0 : i32
    %c0_i32_1 = arith.constant 0 : i32
    %c0_i32_2 = arith.constant 0 : i32
    return %c0_i32, %c0_i32_0, %c0_i32_1 : i32, i32, i32
  }
  func.func @transform_4(%arg0: i32) -> (i32, i32, i32) {
    %c0_i32 = arith.constant 0 : i32
    %c0_i32_0 = arith.constant 0 : i32
    %c0_i32_1 = arith.constant 0 : i32
    return %arg0, %c0_i32, %c0_i32_0 : i32, i32, i32
  }
}

</mosaic_0001>

<bundles_post_ra>
// kernel: tile.13
= control target key start
LH: loop header
LB: loop body
LE: loop exit
PB: predicated region body
PF: predicated region fallthrough
CT: control target
= control target key end

     0   :  { %s28_s0 = inlined_call_operand.vmem [shape: f32[8], index: 0, kind: input, shape index: {}]   ;;  %s29_s1 = inlined_call_operand.vmem [shape: f32[16,8], index: 1, kind: output, shape index: {}]  }
   0x1   :  { %v4_v0 = vld [vmem:[%s28_s0] ss:$0 sm:$0xff] }
   0x2   :  { %5 = vst [vmem:[%s29_s1] sm:$0xff] %v4_v0  ;;  %8 = vst [vmem:[%s29_s1 + $0x8] sm:$0xff] %v4_v0 }

// kernel: tile.14
= control target key start
LH: loop header
LB: loop body
LE: loop exit
PB: predicated region body
PF: predicated region fallthrough
CT: control target
= control target key end

     0   :  { %s131_s10 = smov 120   ;;  %s132_s11 = smov 104   ;;  %vm3_vm0 = vcmask 64512   ;;  %vm9_vm1 = vcmask 1048512   ;;  %vm15_vm2 = vcmask 982912   ;;  %vm21_vm3 = vcmask 917312   ;;  %s207_s0 = inlined_call_operand.vmem [shape: f32[16,8], index: 0, kind: input, shape index: {}]   ;;  %s208_s1 = inlined_call_operand.vmem [shape: f32[1,1,128], index: 1, kind: output, shape index: {}]  }
   0x1   :  { %v101_v0 = vld [vmem:[%s207_s0 + $0xf] sm:$0x1]   ;;  %v103_v1 = vld [vmem:[%s207_s0 + $0xd] sm:$0x1]   ;;  %v102_v2 = vld [vmem:[%s207_s0 + $0xe] sm:$0x1]  }
   0x2   :  { %7 = vrot.lane.b32.xlu0 %v101_v0, %s131_s10  ;;  %19 = vrot.lane.b32.xlu1 %v103_v1, %s132_s11  ;;  %v104_v3 = vld [vmem:[%s207_s0 + $0xc] sm:$0x1]   ;;  %s133_s16 = smov 112   ;;  %s134_s17 = smov 96   ;;  %v105_v4 = vld [vmem:[%s207_s0 + $0xb] sm:$0x1]  }
   0x3   :  { %v106_v5 = vld [vmem:[%s207_s0 + $0xa] sm:$0x1]   ;;  %v2_v6 = vld [vmem:[%s207_s0] sm:$0x1]   ;;  %s135_s24 = smov 88   ;;  %s136_s25 = smov 80  }
   0x4   :  { %4 = vst.msk [vmem:[#allocation0] sm:$0x1] %vm3_vm0, %v2_v6   ;;  %v107_v7 = vld [vmem:[%s207_s0 + $0x9] sm:$0x1]   ;;  %v108_v8 = vld [vmem:[%s207_s0 + $0x8] sm:$0x1]  }
   0x5   :  { %s137_s30 = smov 72   ;;  %s138_s2 = smov 64   ;;  %v109_v9 = vld [vmem:[%s207_s0 + $0x7] sm:$0x1]   ;;  %v110_v10 = vld [vmem:[%s207_s0 + $0x6] sm:$0x1]  }
   0x6   :  { %13 = vrot.lane.b32.xlu0 %v102_v2, %s133_s16  ;;  %25 = vrot.lane.b32.xlu1 %v104_v3, %s134_s17  ;;  %s139_s7 = smov 56   ;;  %s140_s8 = smov 48   ;;  %v111_v11 = vld [vmem:[%s207_s0 + $0x5] sm:$0x1]   ;;  %v112_v12 = vld [vmem:[%s207_s0 + $0x4] sm:$0x1]  }
   0x7   :  { %s141_s13 = smov 40   ;;  %s142_s14 = smov 32   ;;  %v113_v13 = vld [vmem:[%s207_s0 + $0x3] sm:$0x1]   ;;  %v114_v14 = vld [vmem:[%s207_s0 + $0x2] sm:$0x1]  }
   0x8   :  { %s143_s19 = smov 24   ;;  %s144_s20 = smov 16   ;;  %v115_v15 = vld [vmem:[%s207_s0 + $0x1] sm:$0x1]   ;;  %vm27_vm4 = vcmask 851712   ;;  %vm33_vm5 = vcmask 786112  }
   0x9   :  { %s145_s0 = smov 8   ;;  %vm39_vm6 = vcmask 720512   ;;  %vm45_vm7 = vcmask 654912   ;;  %vm51_vm8 = vcmask 589312   ;;  %vm57_vm9 = vcmask 523712  }
   0xa   :  { %31 = vrot.lane.b32.xlu0 %v105_v4, %s135_s24  ;;  %37 = vrot.lane.b32.xlu1 %v106_v5, %s136_s25  ;;  %vm63_vm10 = vcmask 458112   ;;  %vm69_vm11 = vcmask 392512   ;;  %vm75_vm12 = vcmask 326912   ;;  %vm81_vm13 = vcmask 261312  }
   0xb   :  { %vm87_vm14 = vcmask 195712   ;;  %vm93_vm15 = vcmask 130112  }
   0xe   :  { %43 = vrot.lane.b32.xlu0 %v107_v7, %s137_s30  ;;  %49 = vrot.lane.b32.xlu1 %v108_v8, %s138_s2 }
  0x12   :  { %55 = vrot.lane.b32.xlu0 %v109_v9, %s139_s7  ;;  %61 = vrot.lane.b32.xlu1 %v110_v10, %s140_s8 }
  0x16   :  { %67 = vrot.lane.b32.xlu0 %v111_v11, %s141_s13  ;;  %73 = vrot.lane.b32.xlu1 %v112_v12, %s142_s14 }
  0x1a   :  { %79 = vrot.lane.b32.xlu0 %v113_v13, %s143_s19  ;;  %85 = vrot.lane.b32.xlu1 %v114_v14, %s144_s20 }
  0x1e   :  { %91 = vrot.lane.b32.xlu0 %v115_v15, %s145_s0 }
  0x74   :  { %v8_v16 = vpop.permute.xlu0 %7   ;;  %v20_v17 = vpop.permute.xlu1 %19  }
  0x75   :  { %10 = vst.msk [vmem:[#allocation0] sm:$0x1] %vm9_vm1, %v8_v16  }
  0x78   :  { %v14_v18 = vpop.permute.xlu0 %13   ;;  %v26_v19 = vpop.permute.xlu1 %25  }
  0x79   :  { %16 = vst.msk [vmem:[#allocation0] sm:$0x1] %vm15_vm2, %v14_v18  }
  0x7a   :  { %22 = vst.msk [vmem:[#allocation0] sm:$0x1] %vm21_vm3, %v20_v17  }
  0x7b   :  { %28 = vst.msk [vmem:[#allocation0] sm:$0x1] %vm27_vm4, %v26_v19  }
  0x7c   :  { %v32_v20 = vpop.permute.xlu0 %31   ;;  %v38_v21 = vpop.permute.xlu1 %37  }
  0x7d   :  { %34 = vst.msk [vmem:[#allocation0] sm:$0x1] %vm33_vm5, %v32_v20  }
  0x7e   :  { %40 = vst.msk [vmem:[#allocation0] sm:$0x1] %vm39_vm6, %v38_v21  }
  0x80   :  { %v44_v22 = vpop.permute.xlu0 %43   ;;  %v50_v23 = vpop.permute.xlu1 %49  }
  0x81   :  { %46 = vst.msk [vmem:[#allocation0] sm:$0x1] %vm45_vm7, %v44_v22  }
  0x82   :  { %52 = vst.msk [vmem:[#allocation0] sm:$0x1] %vm51_vm8, %v50_v23  }
  0x84   :  { %v56_v24 = vpop.permute.xlu0 %55   ;;  %v62_v25 = vpop.permute.xlu1 %61  }
  0x85   :  { %58 = vst.msk [vmem:[#allocation0] sm:$0x1] %vm57_vm9, %v56_v24  }
  0x86   :  { %64 = vst.msk [vmem:[#allocation0] sm:$0x1] %vm63_vm10, %v62_v25  }
  0x88   :  { %v68_v26 = vpop.permute.xlu0 %67   ;;  %v74_v27 = vpop.permute.xlu1 %73  }
  0x89   :  { %70 = vst.msk [vmem:[#allocation0] sm:$0x1] %vm69_vm11, %v68_v26  }
  0x8a   :  { %76 = vst.msk [vmem:[#allocation0] sm:$0x1] %vm75_vm12, %v74_v27  }
  0x8c   :  { %v80_v28 = vpop.permute.xlu0 %79   ;;  %v86_v29 = vpop.permute.xlu1 %85  }
  0x8d   :  { %82 = vst.msk [vmem:[#allocation0] sm:$0x1] %vm81_vm13, %v80_v28  }
  0x8e   :  { %88 = vst.msk [vmem:[#allocation0] sm:$0x1] %vm87_vm14, %v86_v29  }
  0x90   :  { %v92_v30 = vpop.permute.xlu0 %91  }
  0x91   :  { %94 = vst.msk [vmem:[#allocation0] sm:$0x1] %vm93_vm15, %v92_v30  }
  0x98   :  { %v98_v31 = vld [vmem:[#allocation0] sm:$0x1] }
  0x99   :  { %100 = vst [vmem:[%s208_s1] sm:$0x1] %v98_v31 }

// kernel: basic_block_forward.3
= control target key start
LH: loop header
LB: loop body
LE: loop exit
PB: predicated region body
PF: predicated region fallthrough
CT: control target
= control target key end

     0   :  { %s372_s15 = smov 0   ;;  %s398_s0 = inlined_call_operand.vmem [shape: f32[2,16,128], index: 0, kind: input, shape index: {}]   ;;  %s399_s1 = inlined_call_operand.vmem [shape: f32[2,16,128], index: 1, kind: input, shape index: {}]   ;;  %s400_s2 = inlined_call_operand.vmem [shape: f32[1,1,128], index: 2, kind: input, shape index: {}]   ;;  %s401_s3 = inlined_call_operand.vmem [shape: f32[1,1,128], index: 3, kind: input, shape index: {}]   ;;  %s402_s4 = inlined_call_operand.vmem [shape: f32[2,16,128], index: 4, kind: output, shape index: {}]  }
   0x1 LB: > { %s313_s16 = sadd.s32 4294967295, %s345_s15   ;;  %p317_p0 = scmp.ge.s32.totalorder %s345_s15, 1  ;;  %s345_s15 = sphi %s372_s15, %s14_s15  }
   0x2   : > { %p172_p1 = scmp.lt.s32.totalorder %s345_s15, 3 }
   0x4   : > { %p173_p2 = pnand %p317_p0, %p172_p1 }
   0x5   : > { %p203_p3 = scmp.lt.s32.totalorder (!%p173_p2), %s313_s16, 1  ;;  %v324_v0 = vld [vmem:[%s400_s2] ss:$0 sm:$0xff] (!%p173_p2) }
   0x6   : > { %176 = sbr.rel (%p173_p2) target bundleno = 26 (0x1a), region = 36  ;;  %v325_v3 = vld [vmem:[%s401_s3] ss:$0 sm:$0xff] (!%p173_p2) }
   0xd   : > { %s404_s16 = smov (!%p203_p3, %s313_s16), 1 }
   0xe   : > { %s328_s17 = sshll.u32 %s404_s16, 4 }
   0xf   : > { %s207_s22 = scalar_lea.vmem %s398_s0, %s328_s17  ;;  %s212_s25 = scalar_lea.vmem %s399_s1, %s328_s17 }
  0x10   : > { %v218_v1 = vld [vmem:[%s207_s22] sm:$0xff]  ;;  %v219_v2 = vld [vmem:[%s207_s22 + $0x8] sm:$0xff]  ;;  %s217_s30 = scalar_lea.vmem %s402_s4, %s328_s17 }
  0x11   : > { %v227_v4 = vmul.f32 %v324_v0, %v218_v1  ;;  %v228_v5 = vmul.f32 %v324_v0, %v219_v2  ;;  %v238_v6 = vld [vmem:[%s212_s25] sm:$0xff]  ;;  %v239_v7 = vld [vmem:[%s212_s25 + $0x8] sm:$0xff] }
  0x13   : > { %v236_v8 = vadd.f32 %v325_v3, %v227_v4  ;;  %v237_v9 = vadd.f32 %v325_v3, %v228_v5 }
  0x15   : > { %v240_v10 = vadd.f32 %v238_v6, %v236_v8  ;;  %v241_v11 = vadd.f32 %v239_v7, %v237_v9 }
  0x17   : > { %v242_v12 = vmax.f32 %v240_v10, 0.0  ;;  %v243_v13 = vmax.f32 %v241_v11, 0.0 }
  0x19   : > { %244 = vst [vmem:[%s217_s30] sm:$0xff] %v242_v12  ;;  %245 = vst [vmem:[%s217_s30 + $0x8] sm:$0xff] %v243_v13 }
  0x1a PF: > { %s14_s15 = sadd.s32 1, %s345_s15  }
  0x1b   : > { %p11_p4 = scmp.ge.s32.totalorder %s14_s15, 4  }
  0x1d   :  { %13 = sbr.rel (!%p11_p4) target bundleno = 1 (0x1), region = 69 }

// kernel: basic_block_forward.2
= control target key start
LH: loop header
LB: loop body
LE: loop exit
PB: predicated region body
PF: predicated region fallthrough
CT: control target
= control target key end

     0   :  { %s6162_s27 = smov 0   ;;  %s9188_s0 = inlined_call_operand.vmem [shape: f32[2,18,18,8], index: 0, kind: input, shape index: {}]   ;;  %s9189_s1 = inlined_call_operand.vmem [shape: f32[72,8], index: 1, kind: input, shape index: {}]   ;;  %s9190_s2 = inlined_call_operand.vmem [shape: f32[72,8], index: 2, kind: input, shape index: {}]   ;;  %s9191_s3 = inlined_call_operand.vmem [shape: f32[1,1,8], index: 3, kind: input, shape index: {}]   ;;  %s9192_s4 = inlined_call_operand.vmem [shape: f32[1,1,8], index: 4, kind: input, shape index: {}]   ;;  %s9193_s5 = inlined_call_operand.vmem [shape: f32[8,8], index: 5, kind: input, shape index: {}]   ;;  %s9194_s6 = inlined_call_operand.vmem [shape: f32[8,8], index: 6, kind: input, shape index: {}]   ;;  %s9195_s7 = inlined_call_operand.vmem [shape: f32[2,16,16,8], index: 7, kind: output, shape index: {0}]   ;;  %s9196_s8 = inlined_call_operand.vmem [shape: f32[2,2,8], index: 8, kind: output, shape index: {1}]  }
   0x1 LB: > { %s5370_s28 = sadd.s32 4294967295, %s6105_s27   ;;  %p5374_p0 = scmp.ge.s32.totalorder %s6105_s27, 1  ;;  %s6105_s27 = sphi %s6162_s27, %s19_s27  }
   0x2   : > { %p265_p1 = scmp.lt.s32.totalorder %s6105_s27, 3 }
   0x4   : > { %p266_p2 = pnand %p5374_p0, %p265_p1 }
   0x6   : > { %269 = sbr.rel (%p266_p2) target bundleno = 2783 (0xadf), region = 48 }
   0xd   : > { %p303_p3 = scmp.lt.s32.totalorder %s5370_s28, 1  ;;  %s6107_s11 = smov 16   ;;  %v1895_v9 = vld [vmem:[%s9189_s1] sm:$0xff]  ;;  %v1896_v10 = vld [vmem:[%s9189_s1 + $0x8] sm:$0xff]  ;;  %v1897_v12 = vld [vmem:[%s9189_s1 + $0x10] sm:$0xff]  ;;  %vm1631_vm0 = vcmask 64512  }
   0xe   : > { %s6108_s12 = smov 8   ;;  %s6109_s13 = smov 24   ;;  %v5918_v11 = vpack.c.bf16 %v1896_v10, %v1895_v9  ;;  %v1898_v13 = vld [vmem:[%s9189_s1 + $0x18] sm:$0xff]  ;;  %v1899_v17 = vld [vmem:[%s9189_s1 + $0x20] sm:$0xff]  ;;  %v1900_v18 = vld [vmem:[%s9189_s1 + $0x28] sm:$0xff]  ;;  %vm1664_vm1 = vcmask 130048  }
   0xf   : > { %s9312_s28 = smov (!%p303_p3, %s5370_s28), 1  ;;  %s6110_s14 = smov 32   ;;  %v5922_v14 = vpack.c.bf16 %v1898_v13, %v1897_v12  ;;  %v5926_v19 = vpack.c.bf16 %v1900_v18, %v1899_v17  ;;  %v1901_v20 = vld [vmem:[%s9189_s1 + $0x30] sm:$0xff]  ;;  %v1902_v21 = vld [vmem:[%s9189_s1 + $0x38] sm:$0xff]  ;;  %v1903_v25 = vld [vmem:[%s9189_s1 + $0x40] sm:$0xff]  ;;  %vm1697_vm2 = vcmask 195584  }
  0x10   : > { %s5950_s29 = smul.u32 432, %s9312_s28  ;;  %s6111_s19 = smov 40   ;;  %5919 = vmatprep.subr.bf16.mxu0 %v5918_v11  ;;  %v5930_v24 = vpack.c.bf16 %v1902_v21, %v1901_v20  ;;  %vm1730_vm3 = vcmask 261120   ;;  %vm1763_vm4 = vcmask 326656   ;;  %vm1796_vm5 = vcmask 392192  }
  0x11   : > { %5921 = vmatpush3.bf16.msra.mxu0 %v5918_v11  ;;  %s6112_s30 = smov 48   ;;  %s6113_s18 = smov 56   ;;  %vm1829_vm6 = vcmask 457728   ;;  %vm1862_vm7 = vcmask 523264   ;;  %vm1904_vm8 = vcmask 588800   ;;  %vm6116_vm9 = vmmov 0  }
  0x12   : > { %s6176_s10 = scalar_lea.vmem %s9188_s0, %s5950_s29  ;;  %5923 = vmatprep.subr.bf16.mxu0 %v5922_v14  ;;  %s6114_s22 = smov 64   ;;  %vm3072_vm10 = vcmask 58368   ;;  %vm3078_vm11 = vcmask 57344  }
  0x13   : > { %v381_v0 = vld [vmem:[%s6176_s10 + $0x2] sm:$0xff]  ;;  %v382_v2 = vld [vmem:[%s6176_s10 + $0xa] sm:$0xff]  ;;  %v6190_v5 = vld [vmem:[%s6176_s10 + $0x18] sm:$0xff] }
  0x14   : > { %v349_v1 = vld [vmem:[%s6176_s10 + $0x1] sm:$0xff]  ;;  %767 = vrot.lane.b32.xlu1 %v381_v0, %s6107_s11  ;;  %v350_v3 = vld [vmem:[%s6176_s10 + $0x9] sm:$0xff]  ;;  %v351_v6 = vld [vmem:[%s6176_s10 + $0x19] sm:$0xff] }
  0x15   : > { %639 = vrot.lane.b32.xlu0 %v349_v1, %s6108_s12  ;;  %v6187_v4 = vld [vmem:[%s6176_s10 + $0x20] sm:$0xff]  ;;  %v6218_v15 = vld [vmem:[%s6176_s10 + $0x30] sm:$0xff]  ;;  %5925 = vmatpush3.bf16.msra.mxu0 %v5922_v14  ;;  %v6241_v23 = vld [vmem:[%s6176_s10 + $0x38] sm:$0xff] }
  0x16   : > { %v5443_v7 = vld [vmem:[%s6176_s10 + $0x1a] sm:$0xff]  ;;  %v5444_v16 = vld [vmem:[%s6176_s10 + $0x22] sm:$0xff]  ;;  %5927 = vmatprep.subr.bf16.mxu0 %v5926_v19  ;;  %v5507_v22 = vld [vmem:[%s6176_s10 + $0x31] sm:$0xff] }
  0x17   : > { %v5412_v8 = vld [vmem:[%s6176_s10 + $0x21] sm:$0xff]  ;;  %v5539_v26 = vld [vmem:[%s6176_s10 + $0x32] sm:$0xff]  ;;  %v5509_v30 = vld [vmem:[%s6176_s10 + $0x49] sm:$0xff] }
  0x18   : > { %769 = vrot.lane.b32.xlu1 %v382_v2, %s6107_s11  ;;  %v5508_v27 = vld [vmem:[%s6176_s10 + $0x39] sm:$0xff]  ;;  %v6264_v29 = vld [vmem:[%s6176_s10 + $0x48] sm:$0xff]  ;;  %v6274_v31 = vld [vmem:[%s6176_s10 + $0x50] sm:$0xff] }
  0x19   : > { %641 = vrot.lane.b32.xlu0 %v350_v3, %s6108_s12  ;;  %5929 = vmatpush3.bf16.msra.mxu0 %v5926_v19  ;;  %v5540_v28 = vld [vmem:[%s6176_s10 + $0x3a] sm:$0xff]  ;;  %v5541_v32 = vld [vmem:[%s6176_s10 + $0x4a] sm:$0xff]  ;;  %v5542_v34 = vld [vmem:[%s6176_s10 + $0x52] sm:$0xff] }
  0x1a   : > { %5931 = vmatprep.subr.bf16.mxu0 %v5930_v24  ;;  %v5510_v33 = vld [vmem:[%s6176_s10 + $0x51] sm:$0xff]  ;;  %v6294_v35 = vld [vmem:[%s6176_s10 + $0x60] sm:$0xff]  ;;  %v6304_v37 = vld [vmem:[%s6176_s10 + $0x68] sm:$0xff] }
  0x1b   : > { %v5511_v36 = vld [vmem:[%s6176_s10 + $0x61] sm:$0xff]  ;;  %v5512_v39 = vld [vmem:[%s6176_s10 + $0x69] sm:$0xff]  ;;  %v6324_v43 = vld [vmem:[%s6176_s10 + $0x78] sm:$0xff] }
  0x1c   : > { %897 = vrot.lane.b32.xlu1 %v6187_v4, %s6109_s13  ;;  %v5543_v38 = vld [vmem:[%s6176_s10 + $0x62] sm:$0xff]  ;;  %v5544_v40 = vld [vmem:[%s6176_s10 + $0x6a] sm:$0xff]  ;;  %v5513_v48 = vld [vmem:[%s6176_s10 + $0x79] sm:$0xff] }
  0x1d   : > { %895 = vrot.lane.b32.xlu0 %v6190_v5, %s6109_s13  ;;  %5933 = vmatpush3.bf16.msra.mxu0 %v5930_v24  ;;  %v6338_v49 = vld [vmem:[%s6176_s10 + $0x80] sm:$0xff]  ;;  %v318_v10 = vld [vmem:[%s6176_s10 + $0x8] sm:$0xff]  ;;  %v5515_v21 = vld [vmem:[%s6176_s10 + $0x91] sm:$0xff] }
  0x1e   : > { %5782 = vmatprep.subr.mxu0 %v1903_v25  ;;  %v5545_v54 = vld [vmem:[%s6176_s10 + $0x7a] sm:$0xff]  ;;  %v5546_v60 = vld [vmem:[%s6176_s10 + $0x82] sm:$0xff] }
  0x1f   : > { %v5514_v55 = vld [vmem:[%s6176_s10 + $0x81] sm:$0xff] }
  0x20   : > { %643 = vrot.lane.b32.xlu1 %v351_v6, %s6108_s12  ;;  %v317_v63 = vld [vmem:[%s6176_s10] sm:$0xff] }
  0x21   : > { %1023 = vrot.lane.b32.xlu0 %v351_v6, %s6110_s14  ;;  %5783 = vmatpush3.msra.mxu0 %v1903_v25  ;;  %v6371_v6 = vld [vmem:[%s6176_s10 + $0x90] sm:$0xff] }
  0x24   : > { %1151 = vrot.lane.b32.xlu1 %v5443_v7, %s6111_s19 }
  0x25   : > { %1025 = vrot.lane.b32.xlu0 %v5412_v8, %s6110_s14 }
  0x28   : > { %771 = vrot.lane.b32.xlu1 %v5443_v7, %s6107_s11 }
  0x29   : > { %645 = vrot.lane.b32.xlu0 %v5412_v8, %s6108_s12 }
  0x2c   : > { %1279 = vrot.lane.b32.xlu1 %v6218_v15, %s6112_s30 }
  0x2d   : > { %1153 = vrot.lane.b32.xlu0 %v5444_v16, %s6111_s19 }
  0x30   : > { %899 = vrot.lane.b32.xlu1 %v6218_v15, %s6109_s13 }
  0x31   : > { %773 = vrot.lane.b32.xlu0 %v5444_v16, %s6107_s11 }
  0x34   : > { %1407 = vrot.lane.b32.xlu1 %v5507_v22, %s6113_s18 }
  0x35   : > { %1281 = vrot.lane.b32.xlu0 %v6241_v23, %s6112_s30 }
  0x38   : > { %1027 = vrot.lane.b32.xlu1 %v5507_v22, %s6110_s14 }
  0x39   : > { %901 = vrot.lane.b32.xlu0 %v6241_v23, %s6109_s13 }
  0x3c   : > { %1535 = vrot.lane.b32.xlu1 %v5539_v26, %s6114_s22 }
  0x3d   : > { %1409 = vrot.lane.b32.xlu0 %v5508_v27, %s6113_s18 }
  0x40   : > { %1029 = vrot.lane.b32.xlu1 %v5508_v27, %s6110_s14 }
  0x41   : > { %647 = vrot.lane.b32.xlu0 %v5507_v22, %s6108_s12  ;;  %v6396_v22 = vld [vmem:[%s6176_s10 + $0x98] sm:$0xff] }
  0x44   : > { %1537 = vrot.lane.b32.xlu1 %v5540_v28, %s6114_s22 }
  0x45   : > { %1155 = vrot.lane.b32.xlu0 %v5539_v26, %s6111_s19 }
  0x48   : > { %775 = vrot.lane.b32.xlu1 %v5539_v26, %s6107_s11 }
  0x49   : > { %649 = vrot.lane.b32.xlu0 %v5508_v27, %s6108_s12 }
  0x4c   : > { %1283 = vrot.lane.b32.xlu1 %v6264_v29, %s6112_s30 }
  0x4d   : > { %1157 = vrot.lane.b32.xlu0 %v5540_v28, %s6111_s19 }
  0x50   : > { %903 = vrot.lane.b32.xlu1 %v6264_v29, %s6109_s13 }
  0x51   : > { %777 = vrot.lane.b32.xlu0 %v5540_v28, %s6107_s11 }
  0x54   : > { %1411 = vrot.lane.b32.xlu1 %v5509_v30, %s6113_s18 }
  0x55   : > { %1285 = vrot.lane.b32.xlu0 %v6274_v31, %s6112_s30 }
  0x58   : > { %1031 = vrot.lane.b32.xlu1 %v5509_v30, %s6110_s14 }
  0x59   : > { %905 = vrot.lane.b32.xlu0 %v6274_v31, %s6109_s13 }
  0x5c   : > { %1539 = vrot.lane.b32.xlu1 %v5541_v32, %s6114_s22 }
  0x5d   : > { %1413 = vrot.lane.b32.xlu0 %v5510_v33, %s6113_s18 }
  0x60   : > { %1033 = vrot.lane.b32.xlu1 %v5510_v33, %s6110_s14 }
  0x61   : > { %651 = vrot.lane.b32.xlu0 %v5509_v30, %s6108_s12 }
  0x64   : > { %1541 = vrot.lane.b32.xlu1 %v5542_v34, %s6114_s22 }
  0x65   : > { %1159 = vrot.lane.b32.xlu0 %v5541_v32, %s6111_s19 }
  0x68   : > { %779 = vrot.lane.b32.xlu1 %v5541_v32, %s6107_s11 }
  0x69   : > { %653 = vrot.lane.b32.xlu0 %v5510_v33, %s6108_s12 }
  0x6c   : > { %1287 = vrot.lane.b32.xlu1 %v6294_v35, %s6112_s30 }
  0x6d   : > { %1161 = vrot.lane.b32.xlu0 %v5542_v34, %s6111_s19 }
  0x70   : > { %907 = vrot.lane.b32.xlu1 %v6294_v35, %s6109_s13 }
  0x71   : > { %781 = vrot.lane.b32.xlu0 %v5542_v34, %s6107_s11 }
  0x74   : > { %1415 = vrot.lane.b32.xlu1 %v5511_v36, %s6113_s18 }
  0x75   : > { %1289 = vrot.lane.b32.xlu0 %v6304_v37, %s6112_s30 }
  0x78   : > { %1035 = vrot.lane.b32.xlu1 %v5511_v36, %s6110_s14 }
  0x79   : > { %909 = vrot.lane.b32.xlu0 %v6304_v37, %s6109_s13 }
  0x7c   : > { %1543 = vrot.lane.b32.xlu1 %v5543_v38, %s6114_s22 }
  0x7d   : > { %1417 = vrot.lane.b32.xlu0 %v5512_v39, %s6113_s18 }
  0x80   : > { %1037 = vrot.lane.b32.xlu1 %v5512_v39, %s6110_s14 }
  0x81   : > { %655 = vrot.lane.b32.xlu0 %v5511_v36, %s6108_s12 }
  0x84   : > { %1545 = vrot.lane.b32.xlu1 %v5544_v40, %s6114_s22 }
  0x85   : > { %1163 = vrot.lane.b32.xlu0 %v5543_v38, %s6111_s19 }
  0x86   : > { %v768_v41 = vpop.permute.xlu1 %767 }
  0x87   : > { %v640_v42 = vpop.permute.xlu0 %639 }
  0x88   : > { %783 = vrot.lane.b32.xlu1 %v5543_v38, %s6107_s11  ;;  %v1632_v0 = vsel %vm1631_vm0, %v317_v63, %v640_v42  ;;  %v5547_v38 = vld [vmem:[%s6176_s10 + $0x92] sm:$0xff] }
  0x89   : > { %657 = vrot.lane.b32.xlu0 %v5512_v39, %s6108_s12  ;;  %v1665_v3 = vsel %vm1664_vm1, %v1632_v0, %v768_v41  ;;  %v5516_v39 = vld [vmem:[%s6176_s10 + $0x99] sm:$0xff] }
  0x8a   : > { %v6326_v44 = vpop.permute.xlu1 %769 }
  0x8b   : > { %v642_v45 = vpop.permute.xlu0 %641 }
  0x8c   : > { %1291 = vrot.lane.b32.xlu1 %v6324_v43, %s6112_s30  ;;  %v1633_v14 = vsel %vm1631_vm0, %v318_v10, %v642_v45  ;;  %v5548_v45 = vld [vmem:[%s6176_s10 + $0x9a] sm:$0xff] }
  0x8d   : > { %1165 = vrot.lane.b32.xlu0 %v5544_v40, %s6111_s19  ;;  %v1666_v20 = vsel %vm1664_vm1, %v1633_v14, %v6326_v44 }
  0x8e   : > { %v6331_v46 = vpop.permute.xlu1 %897 }
  0x8f   : > { %v896_v47 = vpop.permute.xlu0 %895  ;;  %v1699_v24 = vsel %vm1697_vm2, %v1666_v20, %v6331_v46 }
  0x90   : > { %911 = vrot.lane.b32.xlu1 %v6324_v43, %s6109_s13  ;;  %v1698_v7 = vsel %vm1697_vm2, %v1665_v3, %v896_v47  ;;  %v5517_v3 = vld [vmem:[%s6176_s10 + $0xa9] sm:$0xff] }
  0x91   : > { %785 = vrot.lane.b32.xlu0 %v5544_v40, %s6107_s11 }
  0x92   : > { %v6340_v50 = vpop.permute.xlu1 %643 }
  0x93   : > { %v1024_v51 = vpop.permute.xlu0 %1023 }
  0x94   : > { %1419 = vrot.lane.b32.xlu1 %v5513_v48, %s6113_s18  ;;  %v1731_v11 = vsel %vm1730_vm3, %v1698_v7, %v1024_v51  ;;  %v6465_v7 = vld [vmem:[%s6176_s10 + $0xb0] sm:$0xff] }
  0x95   : > { %1293 = vrot.lane.b32.xlu0 %v6338_v49, %s6112_s30 }
  0x96   : > { %v1152_v52 = vpop.permute.xlu1 %1151 }
  0x97   : > { %v1026_v53 = vpop.permute.xlu0 %1025  ;;  %v1764_v12 = vsel %vm1763_vm4, %v1731_v11, %v1152_v52  ;;  %v1634_v52 = vsel %vm1631_vm0, %v6190_v5, %v6340_v50 }
  0x98   : > { %1039 = vrot.lane.b32.xlu1 %v5513_v48, %s6110_s14  ;;  %v1732_v27 = vsel %vm1730_vm3, %v1699_v24, %v1026_v53  ;;  %v5550_v24 = vld [vmem:[%s6176_s10 + $0xb2] sm:$0xff] }
  0x99   : > { %913 = vrot.lane.b32.xlu0 %v6338_v49, %s6109_s13 }
  0x9a   : > { %v6350_v56 = vpop.permute.xlu1 %771 }
  0x9b   : > { %v6352_v57 = vpop.permute.xlu0 %645  ;;  %v1667_v53 = vsel %vm1664_vm1, %v1634_v52, %v6350_v56  ;;  %v5519_v52 = vld [vmem:[%s6176_s10 + $0xc1] sm:$0xff] }
  0x9c   : > { %1547 = vrot.lane.b32.xlu1 %v5545_v54, %s6114_s22 }
  0x9d   : > { %1421 = vrot.lane.b32.xlu0 %v5514_v55, %s6113_s18 }
  0x9e   : > { %v1280_v58 = vpop.permute.xlu1 %1279 }
  0x9f   : > { %v1154_v59 = vpop.permute.xlu0 %1153  ;;  %v1797_v13 = vsel %vm1796_vm5, %v1764_v12, %v1280_v58 }
  0xa0   : > { %1041 = vrot.lane.b32.xlu1 %v5514_v55, %s6110_s14  ;;  %v1765_v28 = vsel %vm1763_vm4, %v1732_v27, %v1154_v59 }
  0xa1   : > { %659 = vrot.lane.b32.xlu0 %v5513_v48, %s6108_s12 }
  0xa2   : > { %v6359_v61 = vpop.permute.xlu1 %899 }
  0xa3   : > { %v6361_v62 = vpop.permute.xlu0 %773 }
  0xa4   : > { %1549 = vrot.lane.b32.xlu1 %v5546_v60, %s6114_s22 }
  0xa5   : > { %1167 = vrot.lane.b32.xlu0 %v5545_v54, %s6111_s19 }
  0xa6   : > { %v1408_v1 = vpop.permute.xlu1 %1407 }
  0xa7   : > { %v1282_v2 = vpop.permute.xlu0 %1281  ;;  %v1830_v16 = vsel %vm1829_vm6, %v1797_v13, %v1408_v1  ;;  %v1635_v1 = vsel %vm1631_vm0, %v6187_v4, %v6352_v57 }
  0xa8   : > { %787 = vrot.lane.b32.xlu1 %v5545_v54, %s6107_s11  ;;  %v1798_v30 = vsel %vm1796_vm5, %v1765_v28, %v1282_v2  ;;  %v6439_v54 = vld [vmem:[%s6176_s10 + $0xa8] sm:$0xff]  ;;  %v1668_v2 = vsel %vm1664_vm1, %v1635_v1, %v6361_v62 }
  0xa9   : > { %661 = vrot.lane.b32.xlu0 %v5514_v55, %s6108_s12  ;;  %v1700_v55 = vsel %vm1697_vm2, %v1667_v53, %v6359_v61  ;;  %v6533_v53 = vld [vmem:[%s6176_s10 + $0xc8] sm:$0xff] }
  0xaa   : > { %v6374_v8 = vpop.permute.xlu1 %1027 }
  0xab   : > { %v6376_v9 = vpop.permute.xlu0 %901  ;;  %v1733_v5 = vsel %vm1730_vm3, %v1700_v55, %v6374_v8 }
  0xac   : > { %1295 = vrot.lane.b32.xlu1 %v6371_v6, %s6112_s30  ;;  %v1701_v8 = vsel %vm1697_vm2, %v1668_v2, %v6376_v9 }
  0xad   : > { %1169 = vrot.lane.b32.xlu0 %v5546_v60, %s6111_s19 }
  0xae   : > { %v1536_v17 = vpop.permute.xlu1 %1535 }
  0xaf   : > { %v1410_v18 = vpop.permute.xlu0 %1409  ;;  %v1863_v19 = vsel %vm1862_vm7, %v1830_v16, %v1536_v17  ;;  %v5549_v16 = vld [vmem:[%s6176_s10 + $0xaa] sm:$0xff] }
  0xb0   : > { %915 = vrot.lane.b32.xlu1 %v6371_v6, %s6109_s13  ;;  %5784 = vmatprep.mubr.msk.f32.mxu0 %vm1904_vm8, %v1863_v19  ;;  %v1831_v32 = vsel %vm1829_vm6, %v1798_v30, %v1410_v18  ;;  %v5518_v17 = vld [vmem:[%s6176_s10 + $0xb1] sm:$0xff] }
  0xb1   : > { %789 = vrot.lane.b32.xlu0 %v5546_v60, %s6107_s11 }
  0xb2   : > { %v1030_v25 = vpop.permute.xlu1 %1029 }
  0xb3   : > { %v6400_v26 = vpop.permute.xlu0 %647  ;;  %v1734_v57 = vsel %vm1730_vm3, %v1701_v8, %v1030_v25  ;;  %v5552_v8 = vld [vmem:[%s6176_s10 + $0xca] sm:$0xff] }
  0xb4   : > { %1423 = vrot.lane.b32.xlu1 %v5515_v21, %s6113_s18 }
  0xb5   : > { %1297 = vrot.lane.b32.xlu0 %v6396_v22, %s6112_s30 }
  0xb6   : > { %v1538_v33 = vpop.permute.xlu1 %1537 }
  0xb7   : > { %v1156_v34 = vpop.permute.xlu0 %1155  ;;  %v1864_v36 = vsel %vm1862_vm7, %v1831_v32, %v1538_v33  ;;  %v1636_v32 = vsel %vm1631_vm0, %v6218_v15, %v6400_v26 }
  0xb8   : > { %1043 = vrot.lane.b32.xlu1 %v5515_v21, %s6110_s14  ;;  %5785 = vmatmul.mubr.msk.f32.vlgmr.msra.gmra.mrb[0].mxu0 %vm1904_vm8, %v1864_v36  ;;  %v1766_v50 = vsel %vm1763_vm4, %v1733_v5, %v1156_v34  ;;  %v6508_v34 = vld [vmem:[%s6176_s10 + $0xc0] sm:$0xff] }
  0xb9   : > { %917 = vrot.lane.b32.xlu0 %v6396_v22, %s6109_s13 }
  0xba   : > { %v6416_v40 = vpop.permute.xlu1 %775 }
  0xbb   : > { %v6418_v41 = vpop.permute.xlu0 %649  ;;  %v1669_v33 = vsel %vm1664_vm1, %v1636_v32, %v6416_v40  ;;  %v5521_v32 = vld [vmem:[%s6176_s10 + $0xd9] sm:$0xff] }
  0xbc   : > { %1551 = vrot.lane.b32.xlu1 %v5547_v38, %s6114_s22 }
  0xbd   : > { %1425 = vrot.lane.b32.xlu0 %v5516_v39, %s6113_s18 }
  0xbe   : > { %v1284_v42 = vpop.permute.xlu1 %1283 }
  0xbf   : > { %v1158_v44 = vpop.permute.xlu0 %1157  ;;  %v1799_v56 = vsel %vm1796_vm5, %v1766_v50, %v1284_v42 }
  0xc0   : > { %1045 = vrot.lane.b32.xlu1 %v5516_v39, %s6110_s14  ;;  %v1767_v11 = vsel %vm1763_vm4, %v1734_v57, %v1158_v44 }
  0xc1   : > { %663 = vrot.lane.b32.xlu0 %v5515_v21, %s6108_s12 }
  0xc2   : > { %v6425_v46 = vpop.permute.xlu1 %903 }
  0xc3   : > { %v6427_v47 = vpop.permute.xlu0 %777  ;;  %v1702_v36 = vsel %vm1697_vm2, %v1669_v33, %v6425_v46  ;;  %v6601_v33 = vld [vmem:[%s6176_s10 + $0xe0] sm:$0xff] }
  0xc4   : > { %1553 = vrot.lane.b32.xlu1 %v5548_v45, %s6114_s22 }
  0xc5   : > { %1171 = vrot.lane.b32.xlu0 %v5547_v38, %s6111_s19 }
  0xc6   : > { %v1412_v48 = vpop.permute.xlu1 %1411 }
  0xc7   : > { %v1286_v51 = vpop.permute.xlu0 %1285  ;;  %v1832_v60 = vsel %vm1829_vm6, %v1799_v56, %v1412_v48  ;;  %v1637_v48 = vsel %vm1631_vm0, %v6241_v23, %v6418_v41 }
  0xc8   : > { %791 = vrot.lane.b32.xlu1 %v5547_v38, %s6107_s11  ;;  %v1800_v62 = vsel %vm1796_vm5, %v1767_v11, %v1286_v51  ;;  %v1670_v51 = vsel %vm1664_vm1, %v1637_v48, %v6427_v47 }
  0xc9   : > { %665 = vrot.lane.b32.xlu0 %v5516_v39, %s6108_s12 }
  0xca   : > { %v1032_v58 = vpop.permute.xlu1 %1031 }
  0xcb   : > { %v6443_v59 = vpop.permute.xlu0 %905  ;;  %v1735_v42 = vsel %vm1730_vm3, %v1702_v36, %v1032_v58 }
  0xcc   : > { %1299 = vrot.lane.b32.xlu1 %v6439_v54, %s6112_s30  ;;  %v1703_v55 = vsel %vm1697_vm2, %v1670_v51, %v6443_v59 }
  0xcd   : > { %1173 = vrot.lane.b32.xlu0 %v5548_v45, %s6111_s19 }
  0xce   : > { %v1540_v61 = vpop.permute.xlu1 %1539 }
  0xcf   : > { %v1414_v63 = vpop.permute.xlu0 %1413  ;;  %v1865_v0 = vsel %vm1862_vm7, %v1832_v60, %v1540_v61  ;;  %v5551_v61 = vld [vmem:[%s6176_s10 + $0xc2] sm:$0xff] }
  0xd0   : > { %919 = vrot.lane.b32.xlu1 %v6439_v54, %s6109_s13  ;;  %5787 = vmatprep.mubr.msk.f32.mxu0 %vm1904_vm8, %v1865_v0  ;;  %v1833_v12 = vsel %vm1829_vm6, %v1800_v62, %v1414_v63  ;;  %v5520_v63 = vld [vmem:[%s6176_s10 + $0xc9] sm:$0xff] }
  0xd1   : > { %793 = vrot.lane.b32.xlu0 %v5548_v45, %s6107_s11 }
  0xd2   : > { %v1034_v10 = vpop.permute.xlu1 %1033 }
  0xd3   : > { %v6469_v4 = vpop.permute.xlu0 %651  ;;  %v1736_v41 = vsel %vm1730_vm3, %v1703_v55, %v1034_v10  ;;  %v5554_v55 = vld [vmem:[%s6176_s10 + $0xe2] sm:$0xff] }
  0xd4   : > { %1427 = vrot.lane.b32.xlu1 %v5517_v3, %s6113_s18 }
  0xd5   : > { %1301 = vrot.lane.b32.xlu0 %v6465_v7, %s6112_s30 }
  0xd6   : > { %v1542_v13 = vpop.permute.xlu1 %1541 }
  0xd7   : > { %v1160_v9 = vpop.permute.xlu0 %1159  ;;  %v1866_v14 = vsel %vm1862_vm7, %v1833_v12, %v1542_v13  ;;  %v1638_v12 = vsel %vm1631_vm0, %v6264_v29, %v6469_v4 }
  0xd8   : > { %1047 = vrot.lane.b32.xlu1 %v5517_v3, %s6110_s14  ;;  %5788 = vmatmul.mubr.msk.f32.gmra.mrb[2].mxu0 %vm1904_vm8, %v1866_v14  ;;  %v1768_v15 = vsel %vm1763_vm4, %v1735_v42, %v1160_v9  ;;  %v6576_v9 = vld [vmem:[%s6176_s10 + $0xd8] sm:$0xff] }
  0xd9   : > { %921 = vrot.lane.b32.xlu0 %v6465_v7, %s6109_s13 }
  0xda   : > { %v6485_v18 = vpop.permute.xlu1 %779 }
  0xdb   : > { %v6487_v19 = vpop.permute.xlu0 %653  ;;  %v1671_v13 = vsel %vm1664_vm1, %v1638_v12, %v6485_v18  ;;  %v5523_v12 = vld [vmem:[%s6176_s10 + $0xf1] sm:$0xff] }
  0xdc   : > { %1555 = vrot.lane.b32.xlu1 %v5549_v16, %s6114_s22 }
  0xdd   : > { %1429 = vrot.lane.b32.xlu0 %v5518_v17, %s6113_s18 }
  0xde   : > { %v1288_v20 = vpop.permute.xlu1 %1287 }
  0xdf   : > { %v1162_v21 = vpop.permute.xlu0 %1161  ;;  %v1801_v26 = vsel %vm1796_vm5, %v1768_v15, %v1288_v20 }
  0xe0   : > { %1049 = vrot.lane.b32.xlu1 %v5518_v17, %s6110_s14  ;;  %v1769_v5 = vsel %vm1763_vm4, %v1736_v41, %v1162_v21 }
  0xe1   : > { %667 = vrot.lane.b32.xlu0 %v5517_v3, %s6108_s12 }
  0xe2   : > { %v6494_v25 = vpop.permute.xlu1 %907 }
  0xe3   : > { %v6496_v27 = vpop.permute.xlu0 %781  ;;  %v1704_v14 = vsel %vm1697_vm2, %v1671_v13, %v6494_v25  ;;  %v6669_v13 = vld [vmem:[%s6176_s10 + $0xf8] sm:$0xff] }
  0xe4   : > { %1557 = vrot.lane.b32.xlu1 %v5550_v24, %s6114_s22 }
  0xe5   : > { %1175 = vrot.lane.b32.xlu0 %v5549_v16, %s6111_s19 }
  0xe6   : > { %v1416_v28 = vpop.permute.xlu1 %1415 }
  0xe7   : > { %v1290_v30 = vpop.permute.xlu0 %1289  ;;  %v1834_v40 = vsel %vm1829_vm6, %v1801_v26, %v1416_v28  ;;  %v1639_v28 = vsel %vm1631_vm0, %v6274_v31, %v6487_v19 }
  0xe8   : > { %795 = vrot.lane.b32.xlu1 %v5549_v16, %s6107_s11  ;;  %v1802_v47 = vsel %vm1796_vm5, %v1769_v5, %v1290_v30  ;;  %v1672_v30 = vsel %vm1664_vm1, %v1639_v28, %v6496_v27 }
  0xe9   : > { %669 = vrot.lane.b32.xlu0 %v5518_v17, %s6108_s12 }
  0xea   : > { %v1036_v38 = vpop.permute.xlu1 %1035 }
  0xeb   : > { %v6512_v39 = vpop.permute.xlu0 %909  ;;  %v1737_v20 = vsel %vm1730_vm3, %v1704_v14, %v1036_v38 }
  0xec   : > { %1303 = vrot.lane.b32.xlu1 %v6508_v34, %s6112_s30  ;;  %v1705_v36 = vsel %vm1697_vm2, %v1672_v30, %v6512_v39 }
  0xed   : > { %1177 = vrot.lane.b32.xlu0 %v5550_v24, %s6111_s19 }
  0xee   : > { %v1544_v44 = vpop.permute.xlu1 %1543 }
  0xef   : > { %v1418_v45 = vpop.permute.xlu0 %1417  ;;  %v1867_v46 = vsel %vm1862_vm7, %v1834_v40, %v1544_v44  ;;  %v5553_v44 = vld [vmem:[%s6176_s10 + $0xda] sm:$0xff] }
  0xf0   : > { %923 = vrot.lane.b32.xlu1 %v6508_v34, %s6109_s13  ;;  %5790 = vmatprep.mubr.msk.f32.mxu0 %vm1904_vm8, %v1867_v46  ;;  %v1835_v50 = vsel %vm1829_vm6, %v1802_v47, %v1418_v45  ;;  %v5522_v45 = vld [vmem:[%s6176_s10 + $0xe1] sm:$0xff] }
  0xf1   : > { %797 = vrot.lane.b32.xlu0 %v5550_v24, %s6107_s11 }
  0xf2   : > { %v1038_v58 = vpop.permute.xlu1 %1037 }
  0xf3   : > { %v6537_v23 = vpop.permute.xlu0 %655  ;;  %v1738_v19 = vsel %vm1730_vm3, %v1705_v36, %v1038_v58  ;;  %v5556_v36 = vld [vmem:[%s6176_s10 + $0xfa] sm:$0xff] }
  0xf4   : > { %1431 = vrot.lane.b32.xlu1 %v5519_v52, %s6113_s18 }
  0xf5   : > { %1305 = vrot.lane.b32.xlu0 %v6533_v53, %s6112_s30 }
  0xf6   : > { %v1546_v56 = vpop.permute.xlu1 %1545 }
  0xf7   : > { %v1164_v59 = vpop.permute.xlu0 %1163  ;;  %v1868_v60 = vsel %vm1862_vm7, %v1835_v50, %v1546_v56  ;;  %v1640_v50 = vsel %vm1631_vm0, %v6294_v35, %v6537_v23 }
  0xf8   : > { %1051 = vrot.lane.b32.xlu1 %v5519_v52, %s6110_s14  ;;  %5791 = vmatmul.mubr.msk.f32.gmra.mrb[4].mxu0 %vm1904_vm8, %v1868_v60  ;;  %v1770_v29 = vsel %vm1763_vm4, %v1737_v20, %v1164_v59  ;;  %v6644_v59 = vld [vmem:[%s6176_s10 + $0xf0] sm:$0xff] }
  0xf9   : > { %925 = vrot.lane.b32.xlu0 %v6533_v53, %s6109_s13 }
  0xfa   : > { %v6553_v0 = vpop.permute.xlu1 %783 }
  0xfb   : > { %v6555_v1 = vpop.permute.xlu0 %657  ;;  %v1673_v56 = vsel %vm1664_vm1, %v1640_v50, %v6553_v0  ;;  %v5525_v50 = vld [vmem:[%s6176_s10 + $0x109] sm:$0xff] }
  0xfc   : > { %1559 = vrot.lane.b32.xlu1 %v5551_v61, %s6114_s22 }
  0xfd   : > { %1433 = vrot.lane.b32.xlu0 %v5520_v63, %s6113_s18 }
  0xfe   : > { %v1292_v2 = vpop.permute.xlu1 %1291 }
  0xff   : > { %v1166_v3 = vpop.permute.xlu0 %1165  ;;  %v1803_v4 = vsel %vm1796_vm5, %v1770_v29, %v1292_v2 }
 0x100   : > { %1053 = vrot.lane.b32.xlu1 %v5520_v63, %s6110_s14  ;;  %v1771_v42 = vsel %vm1763_vm4, %v1738_v19, %v1166_v3 }
 0x101   : > { %671 = vrot.lane.b32.xlu0 %v5519_v52, %s6108_s12 }
 0x102   : > { %v6562_v10 = vpop.permute.xlu1 %911 }
 0x103   : > { %v6564_v57 = vpop.permute.xlu0 %785  ;;  %v1706_v60 = vsel %vm1697_vm2, %v1673_v56, %v6562_v10  ;;  %v6737_v56 = vld [vmem:[%s6176_s10 + $0x110] sm:$0xff] }
 0x104   : > { %1561 = vrot.lane.b32.xlu1 %v5552_v8, %s6114_s22 }
 0x105   : > { %1179 = vrot.lane.b32.xlu0 %v5551_v61, %s6111_s19 }
 0x106   : > { %v1420_v11 = vpop.permute.xlu1 %1419 }
 0x107   : > { %v1294_v62 = vpop.permute.xlu0 %1293  ;;  %v1836_v18 = vsel %vm1829_vm6, %v1803_v4, %v1420_v11  ;;  %v1641_v11 = vsel %vm1631_vm0, %v6304_v37, %v6555_v1 }
 0x108   : > { %799 = vrot.lane.b32.xlu1 %v5551_v61, %s6107_s11  ;;  %v1804_v27 = vsel %vm1796_vm5, %v1771_v42, %v1294_v62  ;;  %v1674_v62 = vsel %vm1664_vm1, %v1641_v11, %v6564_v57 }
 0x109   : > { %673 = vrot.lane.b32.xlu0 %v5520_v63, %s6108_s12 }
 0x10a   : > { %v1040_v16 = vpop.permute.xlu1 %1039 }
 0x10b   : > { %v6580_v17 = vpop.permute.xlu0 %913  ;;  %v1739_v2 = vsel %vm1730_vm3, %v1706_v60, %v1040_v16 }
 0x10c   : > { %1307 = vrot.lane.b32.xlu1 %v6576_v9, %s6112_s30  ;;  %v1707_v14 = vsel %vm1697_vm2, %v1674_v62, %v6580_v17 }
 0x10d   : > { %1181 = vrot.lane.b32.xlu0 %v5552_v8, %s6111_s19 }
 0x10e   : > { %v1548_v21 = vpop.permute.xlu1 %1547 }
 0x10f   : > { %v1422_v24 = vpop.permute.xlu0 %1421  ;;  %v1869_v25 = vsel %vm1862_vm7, %v1836_v18, %v1548_v21  ;;  %v5555_v21 = vld [vmem:[%s6176_s10 + $0xf2] sm:$0xff] }
 0x110   : > { %927 = vrot.lane.b32.xlu1 %v6576_v9, %s6109_s13  ;;  %5793 = vmatprep.mubr.msk.f32.mxu0 %vm1904_vm8, %v1869_v25  ;;  %v1837_v15 = vsel %vm1829_vm6, %v1804_v27, %v1422_v24  ;;  %v5524_v24 = vld [vmem:[%s6176_s10 + $0xf9] sm:$0xff] }
 0x111   : > { %801 = vrot.lane.b32.xlu0 %v5552_v8, %s6107_s11 }
 0x112   : > { %v1042_v38 = vpop.permute.xlu1 %1041 }
 0x113   : > { %v6605_v31 = vpop.permute.xlu0 %659  ;;  %v1740_v1 = vsel %vm1730_vm3, %v1707_v14, %v1042_v38  ;;  %v5558_v14 = vld [vmem:[%s6176_s10 + $0x112] sm:$0xff] }
 0x114   : > { %1435 = vrot.lane.b32.xlu1 %v5521_v32, %s6113_s18 }
 0x115   : > { %1309 = vrot.lane.b32.xlu0 %v6601_v33, %s6112_s30 }
 0x116   : > { %v1550_v26 = vpop.permute.xlu1 %1549 }
 0x117   : > { %v1168_v39 = vpop.permute.xlu0 %1167  ;;  %v1870_v40 = vsel %vm1862_vm7, %v1837_v15, %v1550_v26  ;;  %v1642_v15 = vsel %vm1631_vm0, %v6324_v43, %v6605_v31 }
 0x118   : > { %1055 = vrot.lane.b32.xlu1 %v5521_v32, %s6110_s14  ;;  %5794 = vmatmul.mubr.msk.f32.gmra.mrb[6].mxu0 %vm1904_vm8, %v1870_v40  ;;  %v1772_v35 = vsel %vm1763_vm4, %v1739_v2, %v1168_v39  ;;  %v6712_v39 = vld [vmem:[%s6176_s10 + $0x108] sm:$0xff] }
 0x119   : > { %929 = vrot.lane.b32.xlu0 %v6601_v33, %s6109_s13 }
 0x11a   : > { %v6621_v46 = vpop.permute.xlu1 %787 }
 0x11b   : > { %v6623_v48 = vpop.permute.xlu0 %661  ;;  %v1675_v26 = vsel %vm1664_vm1, %v1642_v15, %v6621_v46  ;;  %v5527_v15 = vld [vmem:[%s6176_s10 + $0x121] sm:$0xff] }
 0x11c   : > { %1563 = vrot.lane.b32.xlu1 %v5553_v44, %s6114_s22 }
 0x11d   : > { %1437 = vrot.lane.b32.xlu0 %v5522_v45, %s6113_s18 }
 0x11e   : > { %v1296_v51 = vpop.permute.xlu1 %1295 }
 0x11f   : > { %v1170_v52 = vpop.permute.xlu0 %1169  ;;  %v1805_v23 = vsel %vm1796_vm5, %v1772_v35, %v1296_v51 }
 0x120   : > { %1057 = vrot.lane.b32.xlu1 %v5522_v45, %s6110_s14  ;;  %v1773_v20 = vsel %vm1763_vm4, %v1740_v1, %v1170_v52 }
 0x121   : > { %675 = vrot.lane.b32.xlu0 %v5521_v32, %s6108_s12 }
 0x122   : > { %v6630_v58 = vpop.permute.xlu1 %915 }
 0x123   : > { %v6632_v41 = vpop.permute.xlu0 %789  ;;  %v1708_v40 = vsel %vm1697_vm2, %v1675_v26, %v6630_v58  ;;  %v6805_v26 = vld [vmem:[%s6176_s10 + $0x128] sm:$0xff] }
 0x124   : > { %1565 = vrot.lane.b32.xlu1 %v5554_v55, %s6114_s22 }
 0x125   : > { %1183 = vrot.lane.b32.xlu0 %v5553_v44, %s6111_s19 }
 0x126   : > { %v1424_v5 = vpop.permute.xlu1 %1423 }
 0x127   : > { %v1298_v47 = vpop.permute.xlu0 %1297  ;;  %v1838_v0 = vsel %vm1829_vm6, %v1805_v23, %v1424_v5  ;;  %v1643_v5 = vsel %vm1631_vm0, %v6338_v49, %v6623_v48 }
 0x128   : > { %803 = vrot.lane.b32.xlu1 %v5553_v44, %s6107_s11  ;;  %v1806_v57 = vsel %vm1796_vm5, %v1773_v20, %v1298_v47  ;;  %v1676_v47 = vsel %vm1664_vm1, %v1643_v5, %v6632_v41 }
 0x129   : > { %677 = vrot.lane.b32.xlu0 %v5522_v45, %s6108_s12 }
 0x12a   : > { %v1044_v61 = vpop.permute.xlu1 %1043 }
 0x12b   : > { %v6648_v63 = vpop.permute.xlu0 %917  ;;  %v1741_v51 = vsel %vm1730_vm3, %v1708_v40, %v1044_v61 }
 0x12c   : > { %1311 = vrot.lane.b32.xlu1 %v6644_v59, %s6112_s30  ;;  %v1709_v60 = vsel %vm1697_vm2, %v1676_v47, %v6648_v63 }
 0x12d   : > { %1185 = vrot.lane.b32.xlu0 %v5554_v55, %s6111_s19 }
 0x12e   : > { %v1552_v3 = vpop.permute.xlu1 %1551 }
 0x12f   : > { %v1426_v8 = vpop.permute.xlu0 %1425  ;;  %v1871_v10 = vsel %vm1862_vm7, %v1838_v0, %v1552_v3  ;;  %v5557_v3 = vld [vmem:[%s6176_s10 + $0x10a] sm:$0xff] }
 0x130   : > { %931 = vrot.lane.b32.xlu1 %v6644_v59, %s6109_s13  ;;  %5796 = vmatprep.mubr.msk.f32.mxu0 %vm1904_vm8, %v1871_v10  ;;  %v1839_v29 = vsel %vm1829_vm6, %v1806_v57, %v1426_v8  ;;  %v5526_v8 = vld [vmem:[%s6176_s10 + $0x111] sm:$0xff] }
 0x131   : > { %805 = vrot.lane.b32.xlu0 %v5554_v55, %s6107_s11 }
 0x132   : > { %v1046_v16 = vpop.permute.xlu1 %1045 }
 0x133   : > { %v6673_v37 = vpop.permute.xlu0 %663  ;;  %v1742_v48 = vsel %vm1730_vm3, %v1709_v60, %v1046_v16  ;;  %v5560_v60 = vld [vmem:[%s6176_s10 + $0x12a] sm:$0xff] }
 0x134   : > { %1439 = vrot.lane.b32.xlu1 %v5523_v12, %s6113_s18 }
 0x135   : > { %1313 = vrot.lane.b32.xlu0 %v6669_v13, %s6112_s30 }
 0x136   : > { %v1554_v4 = vpop.permute.xlu1 %1553 }
 0x137   : > { %v1172_v17 = vpop.permute.xlu0 %1171  ;;  %v1872_v18 = vsel %vm1862_vm7, %v1839_v29, %v1554_v4  ;;  %v1644_v29 = vsel %vm1631_vm0, %v6371_v6, %v6673_v37 }
 0x138   : > { %1059 = vrot.lane.b32.xlu1 %v5523_v12, %s6110_s14  ;;  %5797 = vmatmul.mubr.msk.f32.gmra.mrb[8].mxu0 %vm1904_vm8, %v1872_v18  ;;  %v1774_v43 = vsel %vm1763_vm4, %v1741_v51, %v1172_v17  ;;  %v6780_v17 = vld [vmem:[%s6176_s10 + $0x120] sm:$0xff] }
 0x139   : > { %933 = vrot.lane.b32.xlu0 %v6669_v13, %s6109_s13 }
 0x13a   : > { %v6689_v25 = vpop.permute.xlu1 %791 }
 0x13b   : > { %v6691_v28 = vpop.permute.xlu0 %665  ;;  %v1677_v4 = vsel %vm1664_vm1, %v1644_v29, %v6689_v25 }
 0x13c   : > { %1567 = vrot.lane.b32.xlu1 %v5555_v21, %s6114_s22 }
 0x13d   : > { %1441 = vrot.lane.b32.xlu0 %v5524_v24, %s6113_s18 }
 0x13e   : > { %v1300_v30 = vpop.permute.xlu1 %1299 }
 0x13f   : > { %v1174_v32 = vpop.permute.xlu0 %1173  ;;  %v1807_v31 = vsel %vm1796_vm5, %v1774_v43, %v1300_v30 }
 0x140   : > { %1061 = vrot.lane.b32.xlu1 %v5524_v24, %s6110_s14  ;;  %v1775_v2 = vsel %vm1763_vm4, %v1742_v48, %v1174_v32 }
 0x141   : > { %679 = vrot.lane.b32.xlu0 %v5523_v12, %s6108_s12 }
 0x142   : > { %v6698_v38 = vpop.permute.xlu1 %919 }
 0x143   : > { %v6700_v19 = vpop.permute.xlu0 %793  ;;  %v1710_v18 = vsel %vm1697_vm2, %v1677_v4, %v6698_v38 }
 0x144   : > { %1569 = vrot.lane.b32.xlu1 %v5556_v36, %s6114_s22 }
 0x145   : > { %1187 = vrot.lane.b32.xlu0 %v5555_v21, %s6111_s19 }
 0x146   : > { %v1428_v42 = vpop.permute.xlu1 %1427 }
 0x147   : > { %v1302_v27 = vpop.permute.xlu0 %1301  ;;  %v1840_v46 = vsel %vm1829_vm6, %v1807_v31, %v1428_v42  ;;  %v1645_v42 = vsel %vm1631_vm0, %v6396_v22, %v6691_v28 }
 0x148   : > { %807 = vrot.lane.b32.xlu1 %v5555_v21, %s6107_s11  ;;  %v1808_v41 = vsel %vm1796_vm5, %v1775_v2, %v1302_v27  ;;  %v1678_v27 = vsel %vm1664_vm1, %v1645_v42, %v6700_v19 }
 0x149   : > { %681 = vrot.lane.b32.xlu0 %v5524_v24, %s6108_s12 }
 0x14a   : > { %v1048_v44 = vpop.permute.xlu1 %1047 }
 0x14b   : > { %v6716_v45 = vpop.permute.xlu0 %921  ;;  %v1743_v30 = vsel %vm1730_vm3, %v1710_v18, %v1048_v44 }
 0x14c   : > { %1315 = vrot.lane.b32.xlu1 %v6712_v39, %s6112_s30  ;;  %v1711_v40 = vsel %vm1697_vm2, %v1678_v27, %v6716_v45 }
 0x14d   : > { %1189 = vrot.lane.b32.xlu0 %v5556_v36, %s6111_s19 }
 0x14e   : > { %v1556_v52 = vpop.permute.xlu1 %1555 }
 0x14f   : > { %v1430_v55 = vpop.permute.xlu0 %1429  ;;  %v1873_v58 = vsel %vm1862_vm7, %v1840_v46, %v1556_v52  ;;  %v5559_v52 = vld [vmem:[%s6176_s10 + $0x122] sm:$0xff] }
 0x150   : > { %935 = vrot.lane.b32.xlu1 %v6712_v39, %s6109_s13  ;;  %5799 = vmatprep.mubr.msk.f32.mxu0 %vm1904_vm8, %v1873_v58  ;;  %v1841_v35 = vsel %vm1829_vm6, %v1808_v41, %v1430_v55  ;;  %v5528_v55 = vld [vmem:[%s6176_s10 + $0x129] sm:$0xff] }
 0x151   : > { %809 = vrot.lane.b32.xlu0 %v5556_v36, %s6107_s11 }
 0x152   : > { %v1050_v61 = vpop.permute.xlu1 %1049 }
 0x153   : > { %v6741_v49 = vpop.permute.xlu0 %667  ;;  %v1744_v28 = vsel %vm1730_vm3, %v1711_v40, %v1050_v61  ;;  %v5530_v40 = vld [vmem:[%s6176_s10 + $0x141] sm:$0xff] }
 0x154   : > { %1443 = vrot.lane.b32.xlu1 %v5525_v50, %s6113_s18 }
 0x155   : > { %1317 = vrot.lane.b32.xlu0 %v6737_v56, %s6112_s30 }
 0x156   : > { %v1558_v23 = vpop.permute.xlu1 %1557 }
 0x157   : > { %v1176_v63 = vpop.permute.xlu0 %1175  ;;  %v1874_v0 = vsel %vm1862_vm7, %v1841_v35, %v1558_v23  ;;  %v1646_v35 = vsel %vm1631_vm0, %v6439_v54, %v6741_v49 }
 0x158   : > { %1063 = vrot.lane.b32.xlu1 %v5525_v50, %s6110_s14  ;;  %5800 = vmatmul.mubr.msk.f32.gmra.mrb[10].mxu0 %vm1904_vm8, %v1874_v0  ;;  %v1776_v6 = vsel %vm1763_vm4, %v1743_v30, %v1176_v63  ;;  %v6850_v63 = vld [vmem:[%s6176_s10 + $0x138] sm:$0xff] }
 0x159   : > { %937 = vrot.lane.b32.xlu0 %v6737_v56, %s6109_s13 }
 0x15a   : > { %v6757_v10 = vpop.permute.xlu1 %795 }
 0x15b   : > { %v6759_v11 = vpop.permute.xlu0 %669  ;;  %v1679_v23 = vsel %vm1664_vm1, %v1646_v35, %v6757_v10 }
 0x15c   : > { %1571 = vrot.lane.b32.xlu1 %v5557_v3, %s6114_s22 }
 0x15d   : > { %1445 = vrot.lane.b32.xlu0 %v5526_v8, %s6113_s18 }
 0x15e   : > { %v1304_v62 = vpop.permute.xlu1 %1303 }
 0x15f   : > { %v1178_v12 = vpop.permute.xlu0 %1177  ;;  %v1809_v37 = vsel %vm1796_vm5, %v1776_v6, %v1304_v62  ;;  %v5529_v6 = vld [vmem:[%s6176_s10 + $0x139] sm:$0xff] }
 0x160   : > { %1065 = vrot.lane.b32.xlu1 %v5526_v8, %s6110_s14  ;;  %v1777_v51 = vsel %vm1763_vm4, %v1744_v28, %v1178_v12 }
 0x161   : > { %683 = vrot.lane.b32.xlu0 %v5525_v50, %s6108_s12 }
 0x162   : > { %v6766_v16 = vpop.permute.xlu1 %923 }
 0x163   : > { %v6768_v1 = vpop.permute.xlu0 %797  ;;  %v1712_v0 = vsel %vm1697_vm2, %v1679_v23, %v6766_v16 }
 0x164   : > { %1573 = vrot.lane.b32.xlu1 %v5558_v14, %s6114_s22 }
 0x165   : > { %1191 = vrot.lane.b32.xlu0 %v5557_v3, %s6111_s19 }
 0x166   : > { %v1432_v20 = vpop.permute.xlu1 %1431 }
 0x167   : > { %v1306_v57 = vpop.permute.xlu0 %1305  ;;  %v1842_v25 = vsel %vm1829_vm6, %v1809_v37, %v1432_v20  ;;  %v6885_v37 = vld [vmem:[%s6176_s10 + $0x140] sm:$0xff] }
 0x168   : > { %811 = vrot.lane.b32.xlu1 %v5557_v3, %s6107_s11  ;;  %v1810_v19 = vsel %vm1796_vm5, %v1777_v51, %v1306_v57 }
 0x169   : > { %685 = vrot.lane.b32.xlu0 %v5526_v8, %s6108_s12 }
 0x16a   : > { %v1052_v21 = vpop.permute.xlu1 %1051 }
 0x16b   : > { %v6784_v24 = vpop.permute.xlu0 %925  ;;  %v1745_v62 = vsel %vm1730_vm3, %v1712_v0, %v1052_v21  ;;  %v1647_v21 = vsel %vm1631_vm0, %v6465_v7, %v6759_v11 }
 0x16c   : > { %1319 = vrot.lane.b32.xlu1 %v6780_v17, %s6112_s30  ;;  %v1680_v30 = vsel %vm1664_vm1, %v1647_v21, %v6768_v1 }
 0x16d   : > { %1193 = vrot.lane.b32.xlu0 %v5558_v14, %s6111_s19 }
 0x16e   : > { %v1560_v32 = vpop.permute.xlu1 %1559 }
 0x16f   : > { %v1434_v36 = vpop.permute.xlu0 %1433  ;;  %v1875_v38 = vsel %vm1862_vm7, %v1842_v25, %v1560_v32  ;;  %v1713_v25 = vsel %vm1697_vm2, %v1680_v30, %v6784_v24 }
 0x170   : > { %939 = vrot.lane.b32.xlu1 %v6780_v17, %s6109_s13  ;;  %5802 = vmatprep.mubr.msk.f32.mxu0 %vm1904_vm8, %v1875_v38  ;;  %v1843_v43 = vsel %vm1829_vm6, %v1810_v19, %v1434_v36 }
 0x171   : > { %813 = vrot.lane.b32.xlu0 %v5558_v14, %s6107_s11 }
 0x172   : > { %v6809_v44 = vpop.permute.xlu1 %1053 }
 0x173   : > { %v6811_v22 = vpop.permute.xlu0 %671  ;;  %v1746_v11 = vsel %vm1730_vm3, %v1713_v25, %v6809_v44 }
 0x174   : > { %1447 = vrot.lane.b32.xlu1 %v5527_v15, %s6113_s18 }
 0x175   : > { %1321 = vrot.lane.b32.xlu0 %v6805_v26, %s6112_s30 }
 0x176   : > { %v1562_v31 = vpop.permute.xlu1 %1561 }
 0x177   : > { %v1180_v45 = vpop.permute.xlu0 %1179  ;;  %v1876_v46 = vsel %vm1862_vm7, %v1843_v43, %v1562_v31  ;;  %v5562_v43 = vld [vmem:[%s6176_s10 + $0x142] sm:$0xff] }
 0x178   : > { %1067 = vrot.lane.b32.xlu1 %v5527_v15, %s6110_s14  ;;  %5803 = vmatmul.mubr.msk.f32.gmra.mrb[12].mxu0 %vm1904_vm8, %v1876_v46  ;;  %v1778_v54 = vsel %vm1763_vm4, %v1745_v62, %v1180_v45 }
 0x179   : > { %941 = vrot.lane.b32.xlu0 %v6805_v26, %s6109_s13 }
 0x17a   : > { %v6827_v58 = vpop.permute.xlu1 %799 }
 0x17b   : > { %v6829_v5 = vpop.permute.xlu0 %673 }
 0x17c   : > { %1575 = vrot.lane.b32.xlu1 %v5559_v52, %s6114_s22 }
 0x17d   : > { %1449 = vrot.lane.b32.xlu0 %v5528_v55, %s6113_s18 }
 0x17e   : > { %v1308_v47 = vpop.permute.xlu1 %1307 }
 0x17f   : > { %v1182_v50 = vpop.permute.xlu0 %1181  ;;  %v1811_v10 = vsel %vm1796_vm5, %v1778_v54, %v1308_v47 }
 0x180   : > { %1069 = vrot.lane.b32.xlu1 %v5528_v55, %s6110_s14  ;;  %v1779_v36 = vsel %vm1763_vm4, %v1746_v11, %v1182_v50  ;;  %v6931_v50 = vld [vmem:[%s6176_s10 + $0x150] sm:$0xff] }
 0x181   : > { %687 = vrot.lane.b32.xlu0 %v5527_v15, %s6108_s12  ;;  %v5561_v15 = vld [vmem:[%s6176_s10 + $0x13a] sm:$0xff] }
 0x182   : > { %v6836_v61 = vpop.permute.xlu1 %927 }
 0x183   : > { %v6838_v48 = vpop.permute.xlu0 %801 }
 0x184   : > { %1577 = vrot.lane.b32.xlu1 %v5560_v60, %s6114_s22 }
 0x185   : > { %1195 = vrot.lane.b32.xlu0 %v5559_v52, %s6111_s19 }
 0x186   : > { %v1436_v2 = vpop.permute.xlu1 %1435 }
 0x187   : > { %v1310_v41 = vpop.permute.xlu0 %1309  ;;  %v1844_v16 = vsel %vm1829_vm6, %v1811_v10, %v1436_v2 }
 0x188   : > { %815 = vrot.lane.b32.xlu1 %v5559_v52, %s6107_s11  ;;  %v1812_v1 = vsel %vm1796_vm5, %v1779_v36, %v1310_v41  ;;  %v5532_v36 = vld [vmem:[%s6176_s10 + $0x159] sm:$0xff] }
 0x189   : > { %689 = vrot.lane.b32.xlu0 %v5528_v55, %s6108_s12  ;;  %v1648_v55 = vsel %vm1631_vm0, %v6508_v34, %v6811_v22 }
 0x18a   : > { %v6854_v3 = vpop.permute.xlu1 %1055  ;;  %v1681_v47 = vsel %vm1664_vm1, %v1648_v55, %v6827_v58 }
 0x18b   : > { %v6856_v8 = vpop.permute.xlu0 %929  ;;  %v6860_v49 = vpop.f32.mrb[0].mxu0 }
 0x18c   : > { %1323 = vrot.lane.b32.xlu1 %v6850_v63, %s6112_s30  ;;  %v2227_v12 = vsel %vm1631_vm0, %v6860_v49, 0.0  ;;  %v6868_v14 = vpop.f32.mrb[1].mxu0 }
 0x18d   : > { %1197 = vrot.lane.b32.xlu0 %v5560_v60, %s6111_s19  ;;  %v2226_v20 = vsel %vm1631_vm0, %v6868_v14, 0.0 }
 0x18e   : > { %v1564_v57 = vpop.permute.xlu1 %1563  ;;  %v2228_v4 = vadd.f32 %v2227_v12, %v2226_v20  ;;  %v1649_v12 = vsel %vm1631_vm0, %v6533_v53, %v6829_v5 }
 0x18f   : > { %v1438_v29 = vpop.permute.xlu0 %1437  ;;  %v1877_v18 = vsel %vm1862_vm7, %v1844_v16, %v1564_v57  ;;  %v1682_v20 = vsel %vm1664_vm1, %v1649_v12, %v6838_v48  ;;  %v5531_v57 = vld [vmem:[%s6176_s10 + $0x151] sm:$0xff]  ;;  %v5533_v12 = vld [vmem:[%s6176_s10 + $0x169] sm:$0xff] }
 0x190   : > { %943 = vrot.lane.b32.xlu1 %v6850_v63, %s6109_s13  ;;  %5805 = vmatprep.mubr.msk.f32.mxu0 %vm1904_vm8, %v1877_v18  ;;  %v1845_v38 = vsel %vm1829_vm6, %v1812_v1, %v1438_v29  ;;  %v6967_v29 = vld [vmem:[%s6176_s10 + $0x158] sm:$0xff]  ;;  %v1715_v53 = vsel %vm1697_vm2, %v1682_v20, %v6856_v8 }
 0x191   : > { %817 = vrot.lane.b32.xlu0 %v5560_v60, %s6107_s11  ;;  %v1714_v60 = vsel %vm1697_vm2, %v1681_v47, %v6836_v61 }
 0x192   : > { %v6889_v32 = vpop.permute.xlu1 %1057  ;;  %v1747_v35 = vsel %vm1730_vm3, %v1714_v60, %v6854_v3 }
 0x193   : > { %v6891_v7 = vpop.permute.xlu0 %675  ;;  %v1748_v21 = vsel %vm1730_vm3, %v1715_v53, %v6889_v32  ;;  %v5563_v32 = vld [vmem:[%s6176_s10 + $0x152] sm:$0xff] }
 0x194   : > { %1451 = vrot.lane.b32.xlu1 %v5529_v6, %s6113_s18 }
 0x195   : > { %1325 = vrot.lane.b32.xlu0 %v6885_v37, %s6112_s30 }
 0x196   : > { %v1566_v24 = vpop.permute.xlu1 %1565 }
 0x197   : > { %v1184_v42 = vpop.permute.xlu0 %1183  ;;  %v1878_v27 = vsel %vm1862_vm7, %v1845_v38, %v1566_v24 }
 0x198   : > { %1071 = vrot.lane.b32.xlu1 %v5529_v6, %s6110_s14  ;;  %5806 = vmatmul.mubr.msk.f32.gmra.mrb[14].mxu0 %vm1904_vm8, %v1878_v27  ;;  %v1780_v34 = vsel %vm1763_vm4, %v1747_v35, %v1184_v42  ;;  %v5564_v27 = vld [vmem:[%s6176_s10 + $0x15a] sm:$0xff] }
 0x199   : > { %945 = vrot.lane.b32.xlu0 %v6885_v37, %s6109_s13 }
 0x19a   : > { %v6908_v44 = vpop.permute.xlu1 %803 }
 0x19b   : > { %v6910_v28 = vpop.permute.xlu0 %677 }
 0x19c   : > { %1579 = vrot.lane.b32.xlu1 %v5561_v15, %s6114_s22 }
 0x19d   : > { %1453 = vrot.lane.b32.xlu0 %v5530_v40, %s6113_s18 }
 0x19e   : > { %v1312_v51 = vpop.permute.xlu1 %1311 }
 0x19f   : > { %v1186_v19 = vpop.permute.xlu0 %1185  ;;  %v1813_v58 = vsel %vm1796_vm5, %v1780_v34, %v1312_v51 }
 0x1a0   : > { %1073 = vrot.lane.b32.xlu1 %v5530_v40, %s6110_s14  ;;  %v1781_v48 = vsel %vm1763_vm4, %v1748_v21, %v1186_v19 }
 0x1a1   : > { %691 = vrot.lane.b32.xlu0 %v5529_v6, %s6108_s12 }
 0x1a2   : > { %v6917_v31 = vpop.permute.xlu1 %931 }
 0x1a3   : > { %v6919_v45 = vpop.permute.xlu0 %805 }
 0x1a4   : > { %1581 = vrot.lane.b32.xlu1 %v5562_v43, %s6114_s22 }
 0x1a5   : > { %1199 = vrot.lane.b32.xlu0 %v5561_v15, %s6111_s19 }
 0x1a6   : > { %v1440_v46 = vpop.permute.xlu1 %1439 }
 0x1a7   : > { %v1314_v52 = vpop.permute.xlu0 %1313  ;;  %v1846_v23 = vsel %vm1829_vm6, %v1813_v58, %v1440_v46 }
 0x1a8   : > { %819 = vrot.lane.b32.xlu1 %v5561_v15, %s6107_s11  ;;  %v1814_v30 = vsel %vm1796_vm5, %v1781_v48, %v1314_v52  ;;  %v7013_v52 = vld [vmem:[%s6176_s10 + $0x168] sm:$0xff] }
 0x1a9   : > { %693 = vrot.lane.b32.xlu0 %v5530_v40, %s6108_s12 }
 0x1aa   : > { %v6935_v2 = vpop.permute.xlu1 %1059 }
 0x1ab   : > { %v6937_v41 = vpop.permute.xlu0 %933  ;;  %v6942_v22 = vpop.f32.mrb[2].mxu0 }
 0x1ac   : > { %1327 = vrot.lane.b32.xlu1 %v6931_v50, %s6112_s30  ;;  %v6948_v61 = vpop.f32.mrb[3].mxu0  ;;  %v2231_v16 = vsel %vm1631_vm0, %v6942_v22, 0.0 }
 0x1ad   : > { %1201 = vrot.lane.b32.xlu0 %v5562_v43, %s6111_s19  ;;  %v2229_v0 = vsel %vm1631_vm0, %v6948_v61, 0.0 }
 0x1ae   : > { %v1568_v3 = vpop.permute.xlu1 %1567  ;;  %v2230_v54 = vadd.f32 %v2229_v0, %v2228_v4 }
 0x1af   : > { %v1442_v62 = vpop.permute.xlu0 %1441  ;;  %v1879_v10 = vsel %vm1862_vm7, %v1846_v23, %v1568_v3 }
 0x1b0   : > { %947 = vrot.lane.b32.xlu1 %v6931_v50, %s6109_s13  ;;  %5808 = vmatprep.mubr.msk.f32.mxu0 %vm1904_vm8, %v1879_v10  ;;  %v2232_v4 = vadd.f32 %v2231_v16, %v2230_v54  ;;  %v1847_v6 = vsel %vm1829_vm6, %v1814_v30, %v1442_v62  ;;  %v1651_v62 = vsel %vm1631_vm0, %v6601_v33, %v6910_v28  ;;  %v7049_v16 = vld [vmem:[%s6176_s10 + $0x170] sm:$0xff] }
 0x1b1   : > { %821 = vrot.lane.b32.xlu0 %v5562_v43, %s6107_s11  ;;  %v1650_v43 = vsel %vm1631_vm0, %v6576_v9, %v6891_v7  ;;  %v1684_v10 = vsel %vm1664_vm1, %v1651_v62, %v6919_v45 }
 0x1b2   : > { %v6971_v5 = vpop.permute.xlu1 %1061  ;;  %v1683_v46 = vsel %vm1664_vm1, %v1650_v43, %v6908_v44  ;;  %v1717_v33 = vsel %vm1697_vm2, %v1684_v10, %v6937_v41  ;;  %v5535_v10 = vld [vmem:[%s6176_s10 + $0x181] sm:$0xff] }
 0x1b3   : > { %v6973_v18 = vpop.permute.xlu0 %679  ;;  %v1716_v55 = vsel %vm1697_vm2, %v1683_v46, %v6917_v31  ;;  %v5503_v46 = vld [vmem:[%s6176_s10 + $0x180] sm:$0xff] }
 0x1b4   : > { %1455 = vrot.lane.b32.xlu1 %v5531_v57, %s6113_s18  ;;  %v1749_v35 = vsel %vm1730_vm3, %v1716_v55, %v6935_v2 }
 0x1b5   : > { %1329 = vrot.lane.b32.xlu0 %v6967_v29, %s6112_s30 }
 0x1b6   : > { %v1570_v8 = vpop.permute.xlu1 %1569 }
 0x1b7   : > { %v1188_v25 = vpop.permute.xlu0 %1187  ;;  %v1880_v11 = vsel %vm1862_vm7, %v1847_v6, %v1570_v8  ;;  %v5534_v6 = vld [vmem:[%s6176_s10 + $0x171] sm:$0xff] }
 0x1b8   : > { %1075 = vrot.lane.b32.xlu1 %v5531_v57, %s6110_s14  ;;  %5809 = vmatmul.mubr.msk.f32.gmra.mrb[16].mxu0 %vm1904_vm8, %v1880_v11  ;;  %v1782_v9 = vsel %vm1763_vm4, %v1749_v35, %v1188_v25 }
 0x1b9   : > { %949 = vrot.lane.b32.xlu0 %v6967_v29, %s6109_s13 }
 0x1ba   : > { %v6990_v1 = vpop.permute.xlu1 %807 }
 0x1bb   : > { %v6992_v38 = vpop.permute.xlu0 %681 }
 0x1bc   : > { %1583 = vrot.lane.b32.xlu1 %v5563_v32, %s6114_s22 }
 0x1bd   : > { %1457 = vrot.lane.b32.xlu0 %v5532_v36, %s6113_s18 }
 0x1be   : > { %v1316_v24 = vpop.permute.xlu1 %1315 }
 0x1bf   : > { %v1190_v42 = vpop.permute.xlu0 %1189  ;;  %v1815_v44 = vsel %vm1796_vm5, %v1782_v9, %v1316_v24 }
 0x1c0   : > { %1077 = vrot.lane.b32.xlu1 %v5532_v36, %s6110_s14 }
 0x1c1   : > { %695 = vrot.lane.b32.xlu0 %v5531_v57, %s6108_s12 }
 0x1c2   : > { %v6999_v15 = vpop.permute.xlu1 %935 }
 0x1c3   : > { %v7001_v40 = vpop.permute.xlu0 %809 }
 0x1c4   : > { %1585 = vrot.lane.b32.xlu1 %v5564_v27, %s6114_s22 }
 0x1c5   : > { %1203 = vrot.lane.b32.xlu0 %v5563_v32, %s6111_s19 }
 0x1c6   : > { %v1444_v51 = vpop.permute.xlu1 %1443 }
 0x1c7   : > { %v1318_v19 = vpop.permute.xlu0 %1317  ;;  %v1848_v34 = vsel %vm1829_vm6, %v1815_v44, %v1444_v51 }
 0x1c8   : > { %823 = vrot.lane.b32.xlu1 %v5563_v32, %s6107_s11 }
 0x1c9   : > { %697 = vrot.lane.b32.xlu0 %v5532_v36, %s6108_s12  ;;  %v5566_v36 = vld [vmem:[%s6176_s10 + $0x172] sm:$0xff] }
 0x1ca   : > { %v7017_v47 = vpop.permute.xlu1 %1063 }
 0x1cb   : > { %v7019_v60 = vpop.permute.xlu0 %937  ;;  %v7024_v7 = vpop.f32.mrb[4].mxu0 }
 0x1cc   : > { %1331 = vrot.lane.b32.xlu1 %v7013_v52, %s6112_s30  ;;  %v7030_v31 = vpop.f32.mrb[5].mxu0  ;;  %v2235_v54 = vsel %vm1631_vm0, %v7024_v7, 0.0 }
 0x1cd   : > { %1205 = vrot.lane.b32.xlu0 %v5564_v27, %s6111_s19  ;;  %v2233_v2 = vsel %vm1631_vm0, %v7030_v31, 0.0 }
 0x1ce   : > { %v1572_v58 = vpop.permute.xlu1 %1571  ;;  %v2234_v0 = vadd.f32 %v2233_v2, %v2232_v4  ;;  %v1750_v4 = vsel %vm1730_vm3, %v1717_v33, %v6971_v5  ;;  %v5565_v5 = vld [vmem:[%s6176_s10 + $0x16a] sm:$0xff] }
 0x1cf   : > { %v1446_v23 = vpop.permute.xlu0 %1445  ;;  %v1881_v3 = vsel %vm1862_vm7, %v1848_v34, %v1572_v58  ;;  %v1783_v45 = vsel %vm1763_vm4, %v1750_v4, %v1190_v42 }
 0x1d0   : > { %951 = vrot.lane.b32.xlu1 %v7013_v52, %s6109_s13  ;;  %5811 = vmatprep.mubr.msk.f32.mxu0 %vm1904_vm8, %v1881_v3  ;;  %v2236_v20 = vadd.f32 %v2235_v54, %v2234_v0  ;;  %v1816_v53 = vsel %vm1796_vm5, %v1783_v45, %v1318_v19  ;;  %v1652_v19 = vsel %vm1631_vm0, %v6644_v59, %v6973_v18 }
 0x1d1   : > { %825 = vrot.lane.b32.xlu0 %v5564_v27, %s6107_s11  ;;  %v1849_v21 = vsel %vm1829_vm6, %v1816_v53, %v1446_v23  ;;  %v1685_v43 = vsel %vm1664_vm1, %v1652_v19, %v6990_v1  ;;  %v1653_v3 = vsel %vm1631_vm0, %v6669_v13, %v6992_v38  ;;  %v5505_v19 = vld [vmem:[%s6176_s10 + $0x198] sm:$0xff] }
 0x1d2   : > { %v7053_v28 = vpop.permute.xlu1 %1065  ;;  %v1718_v55 = vsel %vm1697_vm2, %v1685_v43, %v6999_v15  ;;  %v1686_v54 = vsel %vm1664_vm1, %v1653_v3, %v7001_v40 }
 0x1d3   : > { %v7055_v57 = vpop.permute.xlu0 %683  ;;  %v1751_v44 = vsel %vm1730_vm3, %v1718_v55, %v7017_v47  ;;  %v1719_v33 = vsel %vm1697_vm2, %v1686_v54, %v7019_v60 }
 0x1d4   : > { %1459 = vrot.lane.b32.xlu1 %v5533_v12, %s6113_s18  ;;  %v1752_v4 = vsel %vm1730_vm3, %v1719_v33, %v7053_v28  ;;  %v5567_v28 = vld [vmem:[%s6176_s10 + $0x182] sm:$0xff]  ;;  %v1654_v55 = vsel %vm1631_vm0, %v6712_v39, %v7055_v57 }
 0x1d5   : > { %1333 = vrot.lane.b32.xlu0 %v7049_v16, %s6112_s30 }
 0x1d6   : > { %v1574_v41 = vpop.permute.xlu1 %1573 }
 0x1d7   : > { %v1192_v48 = vpop.permute.xlu0 %1191  ;;  %v1882_v30 = vsel %vm1862_vm7, %v1849_v21, %v1574_v41 }
 0x1d8   : > { %1079 = vrot.lane.b32.xlu1 %v5533_v12, %s6110_s14  ;;  %5812 = vmatmul.mubr.msk.f32.gmra.mrb[18].mxu0 %vm1904_vm8, %v1882_v30  ;;  %v1784_v59 = vsel %vm1763_vm4, %v1751_v44, %v1192_v48  ;;  %v5536_v48 = vld [vmem:[%s6176_s10 + $0x189] sm:$0xff] }
 0x1d9   : > { %953 = vrot.lane.b32.xlu0 %v7049_v16, %s6109_s13 }
 0x1da   : > { %v7072_v8 = vpop.permute.xlu1 %811 }
 0x1db   : > { %v7074_v25 = vpop.permute.xlu0 %685  ;;  %v1687_v44 = vsel %vm1664_vm1, %v1654_v55, %v7072_v8 }
 0x1dc   : > { %1587 = vrot.lane.b32.xlu1 %v5565_v5, %s6114_s22  ;;  %v1655_v33 = vsel %vm1631_vm0, %v6737_v56, %v7074_v25 }
 0x1dd   : > { %1461 = vrot.lane.b32.xlu0 %v5534_v6, %s6113_s18 }
 0x1de   : > { %v1320_v11 = vpop.permute.xlu1 %1319 }
 0x1df   : > { %v1194_v32 = vpop.permute.xlu0 %1193  ;;  %v1817_v1 = vsel %vm1796_vm5, %v1784_v59, %v1320_v11  ;;  %v5538_v59 = vld [vmem:[%s6176_s10 + $0x1a1] sm:$0xff] }
 0x1e0   : > { %1081 = vrot.lane.b32.xlu1 %v5534_v6, %s6110_s14  ;;  %v1785_v45 = vsel %vm1763_vm4, %v1752_v4, %v1194_v32  ;;  %v5474_v32 = vld [vmem:[%s6176_s10 + $0x18a] sm:$0xff] }
 0x1e1   : > { %699 = vrot.lane.b32.xlu0 %v5533_v12, %s6108_s12  ;;  %v5504_v12 = vld [vmem:[%s6176_s10 + $0x188] sm:$0xff] }
 0x1e2   : > { %v7081_v24 = vpop.permute.xlu1 %939 }
 0x1e3   : > { %v7083_v42 = vpop.permute.xlu0 %813 }
 0x1e4   : > { %1589 = vrot.lane.b32.xlu1 %v5566_v36, %s6114_s22 }
 0x1e5   : > { %1207 = vrot.lane.b32.xlu0 %v5565_v5, %s6111_s19 }
 0x1e6   : > { %v1448_v27 = vpop.permute.xlu1 %1447 }
 0x1e7   : > { %v1322_v51 = vpop.permute.xlu0 %1321  ;;  %v1850_v34 = vsel %vm1829_vm6, %v1817_v1, %v1448_v27  ;;  %v5537_v1 = vld [vmem:[%s6176_s10 + $0x199] sm:$0xff] }
 0x1e8   : > { %827 = vrot.lane.b32.xlu1 %v5565_v5, %s6107_s11  ;;  %v1818_v40 = vsel %vm1796_vm5, %v1785_v45, %v1322_v51  ;;  %v5506_v51 = vld [vmem:[%s6176_s10 + $0x1a0] sm:$0xff]  ;;  %v1688_v45 = vsel %vm1664_vm1, %v1655_v33, %v7083_v42 }
 0x1e9   : > { %701 = vrot.lane.b32.xlu0 %v5534_v6, %s6108_s12 }
 0x1ea   : > { %v7097_v35 = vpop.permute.xlu1 %1067 }
 0x1eb   : > { %v7099_v9 = vpop.permute.xlu0 %941  ;;  %v7104_v18 = vpop.f32.mrb[6].mxu0 }
 0x1ec   : > { %1335 = vrot.lane.b32.xlu1 %v5503_v46, %s6112_s30  ;;  %v7109_v15 = vpop.f32.mrb[7].mxu0  ;;  %v2239_v62 = vsel %vm1631_vm0, %v7104_v18, 0.0 }
 0x1ed   : > { %1209 = vrot.lane.b32.xlu0 %v5566_v36, %s6111_s19  ;;  %v2237_v2 = vsel %vm1631_vm0, %v7109_v15, 0.0 }
 0x1ee   : > { %v1576_v47 = vpop.permute.xlu1 %1575  ;;  %v2238_v23 = vadd.f32 %v2237_v2, %v2236_v20 }
 0x1ef   : > { %v1450_v58 = vpop.permute.xlu0 %1449  ;;  %v1883_v0 = vsel %vm1862_vm7, %v1850_v34, %v1576_v47  ;;  %v1720_v34 = vsel %vm1697_vm2, %v1687_v44, %v7081_v24  ;;  %v5569_v24 = vld [vmem:[%s6176_s10 + $0x19a] sm:$0xff] }
 0x1f0   : > { %955 = vrot.lane.b32.xlu1 %v5503_v46, %s6109_s13  ;;  %5814 = vmatprep.mubr.msk.f32.mxu0 %vm1904_vm8, %v1883_v0  ;;  %v2240_v20 = vadd.f32 %v2239_v62, %v2238_v23  ;;  %v1851_v53 = vsel %vm1829_vm6, %v1818_v40, %v1450_v58  ;;  %v1753_v39 = vsel %vm1730_vm3, %v1720_v34, %v7097_v35  ;;  %v5570_v0 = vld [vmem:[%s6176_s10 + $0x1a2] sm:$0xff]  ;;  %s5675_s10 = sshll.u32 %s9312_s28, 8 }
 0x1f1   : > { %829 = vrot.lane.b32.xlu0 %v5566_v36, %s6107_s11  ;;  %s8609_s25 = scalar_lea.vmem %s9195_s7, %s5675_s10 }
 0x1f2   : > { %v7129_v13 = vpop.permute.xlu1 %1069 }
 0x1f3   : > { %v7131_v38 = vpop.permute.xlu0 %687 }
 0x1f4   : > { %1463 = vrot.lane.b32.xlu1 %v5535_v10, %s6113_s18 }
 0x1f5   : > { %1337 = vrot.lane.b32.xlu0 %v5504_v12, %s6112_s30 }
 0x1f6   : > { %v1578_v21 = vpop.permute.xlu1 %1577 }
 0x1f7   : > { %v1196_v60 = vpop.permute.xlu0 %1195  ;;  %v1884_v41 = vsel %vm1862_vm7, %v1851_v53, %v1578_v21 }
 0x1f8   : > { %1083 = vrot.lane.b32.xlu1 %v5535_v10, %s6110_s14  ;;  %5815 = vmatmul.mubr.msk.f32.gmra.mrb[20].mxu0 %vm1904_vm8, %v1884_v41  ;;  %v1786_v57 = vsel %vm1763_vm4, %v1753_v39, %v1196_v60 }
 0x1f9   : > { %957 = vrot.lane.b32.xlu0 %v5504_v12, %s6109_s13 }
 0x1fa   : > { %v7146_v30 = vpop.permute.xlu1 %815 }
 0x1fb   : > { %v7148_v5 = vpop.permute.xlu0 %689 }
 0x1fc   : > { %1591 = vrot.lane.b32.xlu1 %v5567_v28, %s6114_s22 }
 0x1fd   : > { %1465 = vrot.lane.b32.xlu0 %v5536_v48, %s6113_s18 }
 0x1fe   : > { %v1324_v6 = vpop.permute.xlu1 %1323 }
 0x1ff   : > { %v1198_v11 = vpop.permute.xlu0 %1197  ;;  %v1819_v8 = vsel %vm1796_vm5, %v1786_v57, %v1324_v6 }
 0x200   : > { %1211 = vrot.lane.b32.xlu1 %v5567_v28, %s6111_s19 }
 0x201   : > { %1085 = vrot.lane.b32.xlu0 %v5536_v48, %s6110_s14 }
 0x202   : > { %v944_v36 = vpop.permute.xlu1 %943 }
 0x203   : > { %v7155_v27 = vpop.permute.xlu0 %817 }
 0x204   : > { %1213 = vrot.lane.b32.xlu1 %v5474_v32, %s6111_s19 }
 0x205   : > { %1593 = vrot.lane.b32.xlu0 %v5474_v32, %s6114_s22 }
 0x206   : > { %v1452_v43 = vpop.permute.xlu1 %1451 }
 0x207   : > { %v1326_v46 = vpop.permute.xlu0 %1325  ;;  %v1852_v3 = vsel %vm1829_vm6, %v1819_v8, %v1452_v43 }
 0x208   : > { %1341 = vrot.lane.b32.xlu1 %v5506_v51, %s6112_s30 }
 0x209   : > { %1339 = vrot.lane.b32.xlu0 %v5505_v19, %s6112_s30 }
 0x20a   : > { %v1072_v2 = vpop.permute.xlu1 %1071 }
 0x20b   : > { %v7172_v47 = vpop.permute.xlu0 %945  ;;  %v7177_v58 = vpop.f32.mrb[8].mxu0 }
 0x20c   : > { %1469 = vrot.lane.b32.xlu1 %v5538_v59, %s6113_s18  ;;  %v7182_v23 = vpop.f32.mrb[9].mxu0  ;;  %v2243_v4 = vsel %vm1631_vm0, %v7177_v58, 0.0 }
 0x20d   : > { %1467 = vrot.lane.b32.xlu0 %v5537_v1, %s6113_s18  ;;  %v2241_v62 = vsel %vm1631_vm0, %v7182_v23, 0.0 }
 0x20e   : > { %v1580_v35 = vpop.permute.xlu1 %1579  ;;  %v2242_v10 = vadd.f32 %v2241_v62, %v2240_v20  ;;  %v1721_v20 = vsel %vm1697_vm2, %v1688_v45, %v7099_v9 }
 0x20f   : > { %v1454_v54 = vpop.permute.xlu0 %1453  ;;  %v1885_v12 = vsel %vm1862_vm7, %v1852_v3, %v1580_v35  ;;  %v1754_v56 = vsel %vm1730_vm3, %v1721_v20, %v7129_v13 }
 0x210   : > { %1597 = vrot.lane.b32.xlu1 %v5570_v0, %s6114_s22  ;;  %5817 = vmatprep.mubr.msk.f32.mxu0 %vm1904_vm8, %v1885_v12  ;;  %v2244_v40 = vadd.f32 %v2243_v4, %v2242_v10  ;;  %v1787_v25 = vsel %vm1763_vm4, %v1754_v56, %v1198_v11 }
 0x211   : > { %1595 = vrot.lane.b32.xlu0 %v5569_v24, %s6114_s22  ;;  %v1820_v60 = vsel %vm1796_vm5, %v1787_v25, %v1326_v46  ;;  %v1656_v46 = vsel %vm1631_vm0, %v6780_v17, %v7131_v38 }
 0x212   : > { %v1074_v53 = vpop.permute.xlu1 %1073  ;;  %v1853_v41 = vsel %vm1829_vm6, %v1820_v60, %v1454_v54  ;;  %v1689_v55 = vsel %vm1664_vm1, %v1656_v46, %v7146_v30 }
 0x213   : > { %v692_v21 = vpop.permute.xlu0 %691  ;;  %v1722_v44 = vsel %vm1697_vm2, %v1689_v55, %v944_v36 }
 0x214   : > { %v1755_v34 = vsel %vm1730_vm3, %v1722_v44, %v1072_v2  ;;  %v1657_v2 = vsel %vm1631_vm0, %v6805_v26, %v7148_v5 }
 0x215   : > { %v1690_v35 = vsel %vm1664_vm1, %v1657_v2, %v7155_v27 }
 0x216   : > { %v1582_v28 = vpop.permute.xlu1 %1581  ;;  %v1723_v10 = vsel %vm1697_vm2, %v1690_v35, %v7172_v47 }
 0x217   : > { %v1200_v48 = vpop.permute.xlu0 %1199  ;;  %v1886_v42 = vsel %vm1862_vm7, %v1853_v41, %v1582_v28  ;;  %v1756_v4 = vsel %vm1730_vm3, %v1723_v10, %v1074_v53 }
 0x218   : > { %5818 = vmatmul.mubr.msk.f32.gmra.mrb[22].mxu0 %vm1904_vm8, %v1886_v42  ;;  %v1788_v39 = vsel %vm1763_vm4, %v1755_v34, %v1200_v48  ;;  %v1658_v42 = vsel %vm1631_vm0, %v6850_v63, %v692_v21 }
 0x21a   : > { %v820_v6 = vpop.permute.xlu1 %819 }
 0x21b   : > { %v7209_v32 = vpop.permute.xlu0 %693 }
 0x21e   : > { %v1328_v9 = vpop.permute.xlu1 %1327 }
 0x21f   : > { %v1202_v51 = vpop.permute.xlu0 %1201  ;;  %v1821_v8 = vsel %vm1796_vm5, %v1788_v39, %v1328_v9  ;;  %v1691_v9 = vsel %vm1664_vm1, %v1658_v42, %v820_v6 }
 0x220   : > { %v1789_v45 = vsel %vm1763_vm4, %v1756_v4, %v1202_v51 }
 0x222   : > { %v948_v19 = vpop.permute.xlu1 %947 }
 0x223   : > { %v7211_v43 = vpop.permute.xlu0 %821  ;;  %v1724_v51 = vsel %vm1697_vm2, %v1691_v9, %v948_v19 }
 0x226   : > { %v1456_v13 = vpop.permute.xlu1 %1455 }
 0x227   : > { %v1330_v11 = vpop.permute.xlu0 %1329  ;;  %v1854_v24 = vsel %vm1829_vm6, %v1821_v8, %v1456_v13 }
 0x228   : > { %v1822_v26 = vsel %vm1796_vm5, %v1789_v45, %v1330_v11 }
 0x22a   : > { %v1076_v59 = vpop.permute.xlu1 %1075 }
 0x22b   : > { %v950_v1 = vpop.permute.xlu0 %949  ;;  %v7221_v57 = vpop.f32.mrb[10].mxu0  ;;  %v1757_v46 = vsel %vm1730_vm3, %v1724_v51, %v1076_v59  ;;  %v1659_v59 = vsel %vm1631_vm0, %v6885_v37, %v7209_v32 }
 0x22c   : > { %v7224_v0 = vpop.f32.mrb[11].mxu0  ;;  %v2247_v62 = vsel %vm1631_vm0, %v7221_v57, 0.0 }
 0x22d   : > { %v2245_v17 = vsel %vm1631_vm0, %v7224_v0, 0.0 }
 0x22e   : > { %v1584_v38 = vpop.permute.xlu1 %1583  ;;  %v2246_v36 = vadd.f32 %v2245_v17, %v2244_v40 }
 0x22f   : > { %v1458_v30 = vpop.permute.xlu0 %1457  ;;  %v1887_v3 = vsel %vm1862_vm7, %v1854_v24, %v1584_v38  ;;  %v1692_v38 = vsel %vm1664_vm1, %v1659_v59, %v7211_v43 }
 0x230   : > { %5820 = vmatprep.mubr.msk.f32.mxu0 %vm1904_vm8, %v1887_v3  ;;  %v2248_v54 = vadd.f32 %v2247_v62, %v2246_v36  ;;  %v1855_v5 = vsel %vm1829_vm6, %v1822_v26, %v1458_v30  ;;  %v1725_v36 = vsel %vm1697_vm2, %v1692_v38, %v950_v1 }
 0x232   : > { %v1078_v12 = vpop.permute.xlu1 %1077 }
 0x233   : > { %v696_v33 = vpop.permute.xlu0 %695  ;;  %v1758_v62 = vsel %vm1730_vm3, %v1725_v36, %v1078_v12 }
 0x236   : > { %v1586_v40 = vpop.permute.xlu1 %1585 }
 0x237   : > { %v1204_v20 = vpop.permute.xlu0 %1203  ;;  %v1888_v56 = vsel %vm1862_vm7, %v1855_v5, %v1586_v40 }
 0x238   : > { %5821 = vmatmul.mubr.msk.f32.gmra.mrb[24].mxu0 %vm1904_vm8, %v1888_v56  ;;  %v1790_v55 = vsel %vm1763_vm4, %v1757_v46, %v1204_v20  ;;  %v1660_v56 = vsel %vm1631_vm0, %v6931_v50, %v696_v33 }
 0x23a   : > { %v824_v27 = vpop.permute.xlu1 %823 }
 0x23b   : > { %v7246_v25 = vpop.permute.xlu0 %697 }
 0x23e   : > { %v1332_v47 = vpop.permute.xlu1 %1331 }
 0x23f   : > { %v1206_v60 = vpop.permute.xlu0 %1205  ;;  %v1823_v34 = vsel %vm1796_vm5, %v1790_v55, %v1332_v47  ;;  %v1693_v47 = vsel %vm1664_vm1, %v1660_v56, %v824_v27 }
 0x240   : > { %v1791_v35 = vsel %vm1763_vm4, %v1758_v62, %v1206_v60 }
 0x242   : > { %v952_v41 = vpop.permute.xlu1 %951 }
 0x243   : > { %v7248_v28 = vpop.permute.xlu0 %825  ;;  %v1726_v60 = vsel %vm1697_vm2, %v1693_v47, %v952_v41 }
 0x246   : > { %v1460_v53 = vpop.permute.xlu1 %1459 }
 0x247   : > { %v1334_v48 = vpop.permute.xlu0 %1333  ;;  %v1856_v8 = vsel %vm1829_vm6, %v1823_v34, %v1460_v53 }
 0x24a   : > { %v1080_v13 = vpop.permute.xlu1 %1079 }
 0x24b   : > { %v954_v11 = vpop.permute.xlu0 %953  ;;  %v7256_v44 = vpop.f32.mrb[12].mxu0  ;;  %v1759_v42 = vsel %vm1730_vm3, %v1726_v60, %v1080_v13  ;;  %v1661_v13 = vsel %vm1631_vm0, %v6967_v29, %v7246_v25 }
 0x24c   : > { %v7259_v39 = vpop.f32.mrb[13].mxu0  ;;  %v2251_v17 = vsel %vm1631_vm0, %v7256_v44, 0.0 }
 0x24d   : > { %v2249_v63 = vsel %vm1631_vm0, %v7259_v39, 0.0 }
 0x24e   : > { %v1588_v21 = vpop.permute.xlu1 %1587  ;;  %v2250_v19 = vadd.f32 %v2249_v63, %v2248_v54  ;;  %v1824_v54 = vsel %vm1796_vm5, %v1791_v35, %v1334_v48 }
 0x24f   : > { %v1462_v6 = vpop.permute.xlu0 %1461  ;;  %v1889_v24 = vsel %vm1862_vm7, %v1856_v8, %v1588_v21  ;;  %v1694_v21 = vsel %vm1664_vm1, %v1661_v13, %v7248_v28 }
 0x250   : > { %5823 = vmatprep.mubr.msk.f32.mxu0 %vm1904_vm8, %v1889_v24  ;;  %v2252_v30 = vadd.f32 %v2251_v17, %v2250_v19  ;;  %v1857_v37 = vsel %vm1829_vm6, %v1824_v54, %v1462_v6  ;;  %v1727_v19 = vsel %vm1697_vm2, %v1694_v21, %v954_v11 }
 0x252   : > { %v1082_v3 = vpop.permute.xlu1 %1081 }
 0x253   : > { %v700_v2 = vpop.permute.xlu0 %699  ;;  %v1760_v17 = vsel %vm1730_vm3, %v1727_v19, %v1082_v3 }
 0x254   : > { %v1662_v11 = vsel %vm1631_vm0, %v7013_v52, %v700_v2 }
 0x256   : > { %v1590_v32 = vpop.permute.xlu1 %1589 }
 0x257   : > { %v1208_v10 = vpop.permute.xlu0 %1207  ;;  %v1890_v4 = vsel %vm1862_vm7, %v1857_v37, %v1590_v32 }
 0x258   : > { %5824 = vmatmul.mubr.msk.f32.gmra.mrb[26].mxu0 %vm1904_vm8, %v1890_v4  ;;  %v1792_v9 = vsel %vm1763_vm4, %v1759_v42, %v1208_v10 }
 0x25a   : > { %v828_v43 = vpop.permute.xlu1 %827 }
 0x25b   : > { %v702_v45 = vpop.permute.xlu0 %701  ;;  %v1695_v54 = vsel %vm1664_vm1, %v1662_v11, %v828_v43 }
 0x25c   : > { %v1663_v3 = vsel %vm1631_vm0, %v7049_v16, %v702_v45 }
 0x25e   : > { %v1336_v26 = vpop.permute.xlu1 %1335 }
 0x25f   : > { %v1210_v1 = vpop.permute.xlu0 %1209  ;;  %v1825_v46 = vsel %vm1796_vm5, %v1792_v9, %v1336_v26 }
 0x260   : > { %v1793_v38 = vsel %vm1763_vm4, %v1760_v17, %v1210_v1 }
 0x262   : > { %v956_v5 = vpop.permute.xlu1 %955 }
 0x263   : > { %v830_v40 = vpop.permute.xlu0 %829  ;;  %v1728_v32 = vsel %vm1697_vm2, %v1695_v54, %v956_v5 }
 0x264   : > { %v1696_v37 = vsel %vm1664_vm1, %v1663_v3, %v830_v40 }
 0x266   : > { %v1464_v20 = vpop.permute.xlu1 %1463 }
 0x267   : > { %v1338_v12 = vpop.permute.xlu0 %1337  ;;  %v1858_v34 = vsel %vm1829_vm6, %v1825_v46, %v1464_v20 }
 0x26a   : > { %v1084_v53 = vpop.permute.xlu1 %1083 }
 0x26b   : > { %v958_v48 = vpop.permute.xlu0 %957  ;;  %v7286_v51 = vpop.f32.mrb[14].mxu0  ;;  %v1761_v1 = vsel %vm1730_vm3, %v1728_v32, %v1084_v53 }
 0x26c   : > { %v7289_v55 = vpop.f32.mrb[15].mxu0  ;;  %v2255_v63 = vsel %vm1631_vm0, %v7286_v51, 0.0  ;;  %v1729_v10 = vsel %vm1697_vm2, %v1696_v37, %v958_v48 }
 0x26d   : > { %9234 = vst [vmem:[#allocation3_spill] sm:$0xff] %v7289_v55  ;;  %v2253_v50 = vsel %vm1631_vm0, %v7289_v55, 0.0 }
 0x26e   : > { %v1592_v33 = vpop.permute.xlu1 %1591  ;;  %v2254_v41 = vadd.f32 %v2253_v50, %v2252_v30  ;;  %v1826_v30 = vsel %vm1796_vm5, %v1793_v38, %v1338_v12 }
 0x26f   : > { %v1466_v27 = vpop.permute.xlu0 %1465  ;;  %v1891_v8 = vsel %vm1862_vm7, %v1858_v34, %v1592_v33  ;;  %v9198_v34 = vmov 0.0  }
 0x270   : > { %5826 = vmatprep.mubr.msk.f32.mxu0 %vm1904_vm8, %v1891_v8  ;;  %v2256_v6 = vadd.f32 %v2255_v63, %v2254_v41  ;;  %v1859_v29 = vsel %vm1829_vm6, %v1826_v30, %v1466_v27  ;;  %5832 = vmatprep.subr.mxu0 %v9198_v34  ;;  %3070 = vst.msk [vmem:[#allocation2] sm:$0xff] %vm1631_vm0, %v9198_v34  ;;  %3071 = vst.msk [vmem:[#allocation2 + $0x8] sm:$0xff] %vm1631_vm0, %v9198_v34  ;;  %v2295_v63 = vld [vmem:[%s9193_s5] sm:$0xff] }
 0x271   : > { %3075 = vst.msk [vmem:[#allocation2 + $0x198] sm:$0xff] %vm1631_vm0, %v9198_v34  ;;  %3076 = vst.msk [vmem:[#allocation2 + $0x1a0] sm:$0xff] %vm1631_vm0, %v9198_v34  ;;  %5842 = vmatprep.subr.mxu1 %v9198_v34  ;;  %5833 = vmatpush3.msra.mxu0 %v2295_v63 }
 0x272   : > { %v1212_v24 = vpop.permute.xlu1 %1211  ;;  %5843 = vmatpush3.msra.mxu1 %v2295_v63  ;;  %5837 = vmatprep.subr.mxu0 %v9198_v34  ;;  %v7416_v63 = vld [vmem:[%s9194_s6] sm:$0xff] }
 0x273   : > { %v1086_v59 = vpop.permute.xlu0 %1085  ;;  %v1794_v12 = vsel %vm1763_vm4, %v1761_v1, %v1212_v24  ;;  %5847 = vmatprep.subr.mxu1 %v9198_v34  ;;  %5844 = vmatprep.mubr.msk.f32.mxu1 %vm6116_vm9, %v9198_v34 }
 0x274   : > { %v1762_v20 = vsel %vm1730_vm3, %v1729_v10, %v1086_v59 }
 0x276   : > { %v1214_v25 = vpop.permute.xlu1 %1213 }
 0x277   : > { %v1594_v36 = vpop.permute.xlu0 %1593  ;;  %v1795_v52 = vsel %vm1763_vm4, %v1762_v20, %v1214_v25 }
 0x278   : > { %v1892_v62 = vsel %vm1862_vm7, %v1859_v29, %v1594_v36 }
 0x279   : > { %5827 = vmatmul.mubr.msk.f32.gmra.mrb[28].mxu0 %vm1904_vm8, %v1892_v62 }
 0x27a   : > { %v1342_v28 = vpop.permute.xlu1 %1341 }
 0x27b   : > { %v1340_v35 = vpop.permute.xlu0 %1339  ;;  %v1828_v16 = vsel %vm1796_vm5, %v1795_v52, %v1342_v28 }
 0x27c   : > { %v1827_v2 = vsel %vm1796_vm5, %v1794_v12, %v1340_v35 }
 0x27e   : > { %v1470_v4 = vpop.permute.xlu1 %1469 }
 0x27f   : > { %v1468_v26 = vpop.permute.xlu0 %1467  ;;  %v1861_v43 = vsel %vm1829_vm6, %v1828_v16, %v1470_v4 }
 0x280   : > { %v1860_v45 = vsel %vm1829_vm6, %v1827_v2, %v1468_v26 }
 0x282   : > { %v1598_v5 = vpop.permute.xlu1 %1597 }
 0x283   : > { %v1596_v40 = vpop.permute.xlu0 %1595  ;;  %v1894_v56 = vsel %vm1862_vm7, %v1861_v43, %v1598_v5 }
 0x284   : > { %v1893_v47 = vsel %vm1862_vm7, %v1860_v45, %v1596_v40 }
 0x285   : > { %5829 = vmatprep.mubr.msk.f32.mxu0 %vm1904_vm8, %v1893_v47 }
 0x286   : > { %5830 = vmatmul.mubr.msk.f32.gmra.mrb[30].mxu0 %vm1904_vm8, %v1894_v56 }
 0x287   : > { %5834 = vmatprep.mubr.msk.f32.mxu0 %vm6116_vm9, %v9198_v34 }
 0x28b   : > { %v7330_v60 = vpop.f32.mrb[16].mxu0 }
 0x28c   : > { %9235 = vst [vmem:[#allocation4_spill] sm:$0xff] %v7330_v60  ;;  %v7332_v53 = vpop.f32.mrb[17].mxu0  ;;  %v2259_v9 = vsel %vm1631_vm0, %v7330_v60, 0.0 }
 0x28d   : > { %9236 = vst [vmem:[#allocation5_spill] sm:$0xff] %v7332_v53  ;;  %v2257_v48 = vsel %vm1631_vm0, %v7332_v53, 0.0 }
 0x28e   : > { %v2258_v42 = vadd.f32 %v2257_v48, %v2256_v6 }
 0x290   : > { %v2260_v46 = vadd.f32 %v2259_v9, %v2258_v42 }
 0x2ab   : > { %v7348_v50 = vpop.f32.mrb[18].mxu0 }
 0x2ac   : > { %9237 = vst [vmem:[#allocation6_spill] sm:$0xff] %v7348_v50  ;;  %v7350_v33 = vpop.f32.mrb[19].mxu0  ;;  %v2263_v8 = vsel %vm1631_vm0, %v7348_v50, 0.0 }
 0x2ad   : > { %9238 = vst [vmem:[#allocation7_spill] sm:$0xff] %v7350_v33  ;;  %v2261_v27 = vsel %vm1631_vm0, %v7350_v33, 0.0 }
 0x2ae   : > { %v2262_v41 = vadd.f32 %v2261_v27, %v2260_v46 }
 0x2b0   : > { %v2264_v13 = vadd.f32 %v2263_v8, %v2262_v41 }
 0x2cb   : > { %v7361_v21 = vpop.f32.mrb[20].mxu0 }
 0x2cc   : > { %9239 = vst [vmem:[#allocation8_spill] sm:$0xff] %v7361_v21  ;;  %v7363_v6 = vpop.f32.mrb[21].mxu0  ;;  %v2267_v59 = vsel %vm1631_vm0, %v7361_v21, 0.0 }
 0x2cd   : > { %9240 = vst [vmem:[#allocation9_spill] sm:$0xff] %v7363_v6  ;;  %v2265_v19 = vsel %vm1631_vm0, %v7363_v6, 0.0 }
 0x2ce   : > { %v2266_v24 = vadd.f32 %v2265_v19, %v2264_v13 }
 0x2d0   : > { %v2268_v17 = vadd.f32 %v2267_v59, %v2266_v24 }
 0x2eb   : > { %v7369_v38 = vpop.f32.mrb[22].mxu0 }
 0x2ec   : > { %9241 = vst [vmem:[#allocation10_spill] sm:$0xff] %v7369_v38  ;;  %v7371_v30 = vpop.f32.mrb[23].mxu0  ;;  %v2271_v36 = vsel %vm1631_vm0, %v7369_v38, 0.0 }
 0x2ed   : > { %9242 = vst [vmem:[#allocation11_spill] sm:$0xff] %v7371_v30  ;;  %v2269_v29 = vsel %vm1631_vm0, %v7371_v30, 0.0 }
 0x2ee   : > { %v2270_v25 = vadd.f32 %v2269_v29, %v2268_v17  ;;  %v2445_v17 = vlaneseq }
 0x2f0   : > { %v2272_v62 = vadd.f32 %v2271_v36, %v2270_v25  ;;  %v7423_v29 = vshrl.u32 %v2445_v17, 7 }
 0x2f2   : > { %9251 = vst [vmem:[#allocation20_spill] sm:$0xff] %v7423_v29  ;;  %v9197_v25 = vsub.s32 0, %v7423_v29 }
 0x30b   : > { %v7381_v28 = vpop.f32.mrb[24].mxu0 }
 0x30c   : > { %9243 = vst [vmem:[#allocation12_spill] sm:$0xff] %v7381_v28  ;;  %v7383_v35 = vpop.f32.mrb[25].mxu0  ;;  %v2275_v54 = vsel %vm1631_vm0, %v7381_v28, 0.0 }
 0x30d   : > { %9244 = vst [vmem:[#allocation13_spill] sm:$0xff] %v7383_v35  ;;  %v2273_v11 = vsel %vm1631_vm0, %v7383_v35, 0.0 }
 0x30e   : > { %v2274_v3 = vadd.f32 %v2273_v11, %v2272_v62 }
 0x310   : > { %v2276_v37 = vadd.f32 %v2275_v54, %v2274_v3 }
 0x32b   : > { %v7389_v32 = vpop.f32.mrb[26].mxu0 }
 0x32c   : > { %9245 = vst [vmem:[#allocation14_spill] sm:$0xff] %v7389_v32  ;;  %v7391_v10 = vpop.f32.mrb[27].mxu0  ;;  %v2279_v1 = vsel %vm1631_vm0, %v7389_v32, 0.0 }
 0x32d   : > { %9246 = vst [vmem:[#allocation15_spill] sm:$0xff] %v7391_v10  ;;  %v2277_v4 = vsel %vm1631_vm0, %v7391_v10, 0.0 }
 0x32e   : > { %v2278_v26 = vadd.f32 %v2277_v4, %v2276_v37 }
 0x330   : > { %v2280_v20 = vadd.f32 %v2279_v1, %v2278_v26 }
 0x34c   : > { %v7397_v12 = vpop.f32.mrb[28].mxu0 }
 0x34d   : > { %9247 = vst [vmem:[#allocation16_spill] sm:$0xff] %v7397_v12  ;;  %v7399_v52 = vpop.f32.mrb[29].mxu0  ;;  %v2283_v43 = vsel %vm1631_vm0, %v7397_v12, 0.0 }
 0x34e   : > { %9248 = vst [vmem:[#allocation17_spill] sm:$0xff] %v7399_v52  ;;  %v2281_v16 = vsel %vm1631_vm0, %v7399_v52, 0.0 }
 0x34f   : > { %v2282_v2 = vadd.f32 %v2281_v16, %v2280_v20 }
 0x351   : > { %v2284_v45 = vadd.f32 %v2283_v43, %v2282_v2 }
 0x359   : > { %v7405_v5 = vpop.f32.mrb[30].mxu0 }
 0x35a   : > { %9249 = vst [vmem:[#allocation18_spill] sm:$0xff] %v7405_v5  ;;  %v7407_v40 = vpop.f32.mrb[31].mxu0  ;;  %v2287_v48 = vsel %vm1631_vm0, %v7405_v5, 0.0 }
 0x35b   : > { %9250 = vst [vmem:[#allocation19_spill] sm:$0xff] %v7407_v40  ;;  %v2285_v56 = vsel %vm1631_vm0, %v7407_v40, 0.0 }
 0x35c   : > { %v2286_v47 = vadd.f32 %v2285_v56, %v2284_v45 }
 0x35e   : > { %v2288_v42 = vadd.f32 %v2287_v48, %v2286_v47 }
 0x360   : > { %v2289_v9 = vrot.slane %v2288_v42, 4 }
 0x362   : > { %v2290_v46 = vadd.f32 %v2289_v9, %v2288_v42 }
 0x364   : > { %v2291_v27 = vrot.slane %v2290_v46, 2 }
 0x366   : > { %v2292_v41 = vadd.f32 %v2291_v27, %v2290_v46 }
 0x368   : > { %v2293_v8 = vrot.slane %v2292_v41, 1 }
 0x36a   : > { %v2294_v13 = vadd.f32 %v2293_v8, %v2292_v41 }
 0x36c   : > { %5835 = vmatmul.mubr.msk.f32.vlgmr.msra.gmra.mrb[32].mxu0 %vm1631_vm0, %v2294_v13 }
 0x36d   : > { %5838 = vmatpush3.msra.mxu0 %v7416_v63  ;;  %5839 = vmatprep.mubr.msk.f32.mxu0 %vm6116_vm9, %v9198_v34 }
 0x43f   : > { %v2365_v19 = vpop.f32.mrb[32].mxu0 }
 0x440   : > { %v2370_v24 = vmul.f32 0.00390625, %v2365_v19  ;;  %v5836_v59 = vpop.f32.mrb[33].mxu0 }
 0x442   : > { %5840 = vmatmul.mubr.msk.f32.vlgmr.msra.gmra.mrb[34].mxu0 %vm1631_vm0, %v2370_v24 }
 0x515   : > { %v2441_v36 = vpop.f32.mrb[34].mxu0 }
 0x516   : > { %v2448_v62 = vrot.slane %v2441_v36, %v9197_v25  ;;  %v5841_v11 = vpop.f32.mrb[35].mxu0 }
 0x518   : > { %v2449_v3 = vsub.f32 %v6868_v14, %v2448_v62  ;;  %v2450_v54 = vsub.f32 %v6860_v49, %v2448_v62  ;;  %v2451_v37 = vsub.f32 %v6948_v61, %v2448_v62  ;;  %v2452_v4 = vsub.f32 %v6942_v22, %v2448_v62 }
 0x519   : > { %v2453_v26 = vsub.f32 %v7030_v31, %v2448_v62  ;;  %v2454_v1 = vsub.f32 %v7024_v7, %v2448_v62  ;;  %v2455_v20 = vsub.f32 %v7109_v15, %v2448_v62  ;;  %v2456_v16 = vsub.f32 %v7104_v18, %v2448_v62 }
 0x51a   : > { %v2457_v2 = vsub.f32 %v7182_v23, %v2448_v62  ;;  %v2458_v43 = vsub.f32 %v7177_v58, %v2448_v62  ;;  %v2459_v45 = vsub.f32 %v7224_v0, %v2448_v62  ;;  %v2460_v56 = vsub.f32 %v7221_v57, %v2448_v62 }
 0x51b   : > { %v2461_v47 = vsub.f32 %v7259_v39, %v2448_v62  ;;  %v2462_v48 = vsub.f32 %v7256_v44, %v2448_v62  ;;  %v2463_v42 = vsub.f32 %v7289_v55, %v2448_v62  ;;  %v2464_v9 = vsub.f32 %v7286_v51, %v2448_v62 }
 0x51c   : > { %v2465_v46 = vsub.f32 %v7332_v53, %v2448_v62  ;;  %v2466_v27 = vsub.f32 %v7330_v60, %v2448_v62  ;;  %v7447_v41 = vsub.f32 %v7350_v33, %v2448_v62  ;;  %v7450_v8 = vsub.f32 %v7348_v50, %v2448_v62 }
 0x51d   : > { %v7453_v13 = vsub.f32 %v7363_v6, %v2448_v62  ;;  %v7456_v19 = vsub.f32 %v7361_v21, %v2448_v62  ;;  %v7459_v24 = vsub.f32 %v7371_v30, %v2448_v62  ;;  %v7462_v59 = vsub.f32 %v7369_v38, %v2448_v62 }
 0x51e   : > { %v7465_v17 = vsub.f32 %v7383_v35, %v2448_v62  ;;  %v7468_v36 = vsub.f32 %v7381_v28, %v2448_v62  ;;  %v7471_v11 = vsub.f32 %v7391_v10, %v2448_v62  ;;  %v7474_v25 = vsub.f32 %v7389_v32, %v2448_v62 }
 0x51f   : > { %v7477_v34 = vsub.f32 %v7399_v52, %v2448_v62  ;;  %v7480_v29 = vsub.f32 %v7397_v12, %v2448_v62  ;;  %v7483_v30 = vsub.f32 %v7407_v40, %v2448_v62  ;;  %v7486_v35 = vsub.f32 %v7405_v5, %v2448_v62 }
 0x520   : > { %v2481_v28 = vmul.f32 %v2449_v3, %v2449_v3  ;;  %v2482_v38 = vmul.f32 %v2450_v54, %v2450_v54  ;;  %v2483_v6 = vmul.f32 %v2451_v37, %v2451_v37  ;;  %v2484_v10 = vmul.f32 %v2452_v4, %v2452_v4 }
 0x521   : > { %v2485_v52 = vmul.f32 %v2453_v26, %v2453_v26  ;;  %v2486_v53 = vmul.f32 %v2454_v1, %v2454_v1  ;;  %v2487_v55 = vmul.f32 %v2455_v20, %v2455_v20  ;;  %v2488_v54 = vmul.f32 %v2456_v16, %v2456_v16 }
 0x522   : > { %v2513_v21 = vsel %vm1631_vm0, %v2481_v28, 0.0  ;;  %v2514_v32 = vsel %vm1631_vm0, %v2482_v38, 0.0  ;;  %v2516_v50 = vsel %vm1631_vm0, %v2483_v6, 0.0  ;;  %v2518_v40 = vsel %vm1631_vm0, %v2484_v10, 0.0 }
 0x523   : > { %v2515_v33 = vadd.f32 %v2514_v32, %v2513_v21  ;;  %v2520_v62 = vsel %vm1631_vm0, %v2485_v52, 0.0  ;;  %v2522_v37 = vsel %vm1631_vm0, %v2486_v53, 0.0  ;;  %v2489_v28 = vmul.f32 %v2457_v2, %v2457_v2 }
 0x524   : > { %v2524_v38 = vsel %vm1631_vm0, %v2487_v55, 0.0  ;;  %v2490_v32 = vmul.f32 %v2458_v43, %v2458_v43  ;;  %v2526_v6 = vsel %vm1631_vm0, %v2488_v54, 0.0  ;;  %v2493_v26 = vmul.f32 %v2461_v47, %v2461_v47 }
 0x525   : > { %v2517_v12 = vadd.f32 %v2516_v50, %v2515_v33  ;;  %v2491_v33 = vmul.f32 %v2459_v45, %v2459_v45  ;;  %v2528_v10 = vsel %vm1631_vm0, %v2489_v28, 0.0  ;;  %v2494_v20 = vmul.f32 %v2462_v48, %v2462_v48 }
 0x526   : > { %v2530_v52 = vsel %vm1631_vm0, %v2490_v32, 0.0  ;;  %v2495_v2 = vmul.f32 %v2463_v42, %v2463_v42  ;;  %v2536_v43 = vsel %vm1631_vm0, %v2493_v26, 0.0  ;;  %v2496_v45 = vmul.f32 %v2464_v9, %v2464_v9 }
 0x527   : > { %v2519_v60 = vadd.f32 %v2518_v40, %v2517_v12  ;;  %v2492_v40 = vmul.f32 %v2460_v56, %v2460_v56  ;;  %v2532_v53 = vsel %vm1631_vm0, %v2491_v33, 0.0  ;;  %v2497_v56 = vmul.f32 %v2465_v46, %v2465_v46 }
 0x528   : > { %v2498_v47 = vmul.f32 %v2466_v27, %v2466_v27  ;;  %v2542_v28 = vsel %vm1631_vm0, %v2496_v45, 0.0  ;;  %v2499_v48 = vmul.f32 %v7447_v41, %v7447_v41  ;;  %v2500_v9 = vmul.f32 %v7450_v8, %v7450_v8 }
 0x529   : > { %v2521_v3 = vadd.f32 %v2520_v62, %v2519_v60  ;;  %v2534_v55 = vsel %vm1631_vm0, %v2492_v40, 0.0  ;;  %v2544_v42 = vsel %vm1631_vm0, %v2497_v56, 0.0  ;;  %v2501_v46 = vmul.f32 %v7453_v13, %v7453_v13 }
 0x52a   : > { %v2546_v32 = vsel %vm1631_vm0, %v2498_v47, 0.0  ;;  %v2548_v27 = vsel %vm1631_vm0, %v2499_v48, 0.0  ;;  %v2502_v33 = vmul.f32 %v7456_v19, %v7456_v19  ;;  %v2550_v41 = vsel %vm1631_vm0, %v2500_v9, 0.0 }
 0x52b   : > { %v2523_v4 = vadd.f32 %v2522_v37, %v2521_v3  ;;  %v2538_v3 = vsel %vm1631_vm0, %v2494_v20, 0.0  ;;  %v2540_v37 = vsel %vm1631_vm0, %v2495_v2, 0.0  ;;  %v2552_v8 = vsel %vm1631_vm0, %v2501_v46, 0.0  ;;  %v3180_v46 = vld [vmem:[#allocation2 + $0x1] sm:$0xff] }
 0x52c   : > { %v2554_v13 = vsel %vm1631_vm0, %v2502_v33, 0.0  ;;  %v2505_v26 = vmul.f32 %v7465_v17, %v7465_v17  ;;  %v2508_v2 = vmul.f32 %v7474_v25, %v7474_v25  ;;  %v2511_v56 = vmul.f32 %v7483_v30, %v7483_v30  ;;  %3469 = vrot.lane.b32.xlu0 %v3180_v46, %s6108_s12 }
 0x52d   : > { %v2525_v21 = vadd.f32 %v2524_v38, %v2523_v4 }
 0x52f   : > { %v2527_v50 = vadd.f32 %v2526_v6, %v2525_v21 }
 0x531   : > { %v2529_v12 = vadd.f32 %v2528_v10, %v2527_v50 }
 0x533   : > { %v2531_v60 = vadd.f32 %v2530_v52, %v2529_v12  ;;  %v2503_v12 = vmul.f32 %v7459_v24, %v7459_v24  ;;  %v2504_v52 = vmul.f32 %v7462_v59, %v7462_v59  ;;  %v2560_v59 = vsel %vm1631_vm0, %v2505_v26, 0.0 }
 0x534   : > { %v5608_v26 = vmul.f32 -1.442695, %v6860_v49 }
 0x535   : > { %v2533_v1 = vadd.f32 %v2532_v53, %v2531_v60  ;;  %v2556_v19 = vsel %vm1631_vm0, %v2503_v12, 0.0  ;;  %v2558_v24 = vsel %vm1631_vm0, %v2504_v52, 0.0  ;;  %v3212_v12 = vld [vmem:[#allocation2 + $0x2] sm:$0xff] }
 0x536   : > { %3597 = vrot.lane.b32.xlu0 %v3212_v12, %s6107_s11 }
 0x537   : > { %v2535_v16 = vadd.f32 %v2534_v55, %v2533_v1  ;;  %v2506_v1 = vmul.f32 %v7468_v36, %v7468_v36  ;;  %v2507_v55 = vmul.f32 %v7471_v11, %v7471_v11  ;;  %v2566_v11 = vsel %vm1631_vm0, %v2508_v2, 0.0 }
 0x538   : > { %v5615_v2 = vmul.f32 -1.442695, %v7182_v23 }
 0x539   : > { %v2537_v62 = vadd.f32 %v2536_v43, %v2535_v16  ;;  %v2562_v17 = vsel %vm1631_vm0, %v2506_v1, 0.0  ;;  %v2564_v36 = vsel %vm1631_vm0, %v2507_v55, 0.0  ;;  %v5609_v1 = vmul.f32 -1.442695, %v6948_v61 }
 0x53a   : > { %v5614_v55 = vmul.f32 -1.442695, %v7104_v18 }
 0x53b   : > { %v2539_v54 = vadd.f32 %v2538_v3, %v2537_v62  ;;  %v2509_v62 = vmul.f32 %v7477_v34, %v7477_v34  ;;  %v2510_v3 = vmul.f32 %v7480_v29, %v7480_v29 }
 0x53d   : > { %v2541_v4 = vadd.f32 %v2540_v37, %v2539_v54  ;;  %v2568_v25 = vsel %vm1631_vm0, %v2509_v62, 0.0  ;;  %v2570_v34 = vsel %vm1631_vm0, %v2510_v3, 0.0  ;;  %v5620_v62 = vmul.f32 -1.442695, %v7256_v44 }
 0x53f   : > { %v2543_v38 = vadd.f32 %v2542_v28, %v2541_v4  ;;  %v2512_v4 = vmul.f32 %v7486_v35, %v7486_v35  ;;  %v2572_v28 = vsel %vm1631_vm0, %v2511_v56, 0.0  ;;  %v9252_v35 = vmov 0.0  }
 0x540   : > { %3073 = vst.msk [vmem:[#allocation2 + $0x10] sm:$0x3] %vm3072_vm10, %v9252_v35  ;;  %3077 = vst.msk [vmem:[#allocation2 + $0x1a8] sm:$0x3] %vm3072_vm10, %v9252_v35 }
 0x541   : > { %v2545_v21 = vadd.f32 %v2544_v42, %v2543_v38  ;;  %v2574_v29 = vsel %vm1631_vm0, %v2512_v4, 0.0  ;;  %3097 = vst.msk [vmem:[#allocation2 + $0x11] sm:$0x1] %vm3078_vm11, %v9252_v35  ;;  %3079 = vst.msk [vmem:[#allocation2] sm:$0x1] %vm3078_vm11, %v9252_v35 }
 0x542   : > { %3080 = vst.msk [vmem:[#allocation2 + $0x18] sm:$0x1] %vm3078_vm11, %v9252_v35  ;;  %3081 = vst.msk [vmem:[#allocation2 + $0x30] sm:$0x1] %vm3078_vm11, %v9252_v35 }
 0x543   : > { %v2547_v6 = vadd.f32 %v2546_v32, %v2545_v21  ;;  %3082 = vst.msk [vmem:[#allocation2 + $0x48] sm:$0x1] %vm3078_vm11, %v9252_v35  ;;  %3083 = vst.msk [vmem:[#allocation2 + $0x60] sm:$0x1] %vm3078_vm11, %v9252_v35 }
 0x544   : > { %3084 = vst.msk [vmem:[#allocation2 + $0x78] sm:$0x1] %vm3078_vm11, %v9252_v35  ;;  %3085 = vst.msk [vmem:[#allocation2 + $0x90] sm:$0x1] %vm3078_vm11, %v9252_v35 }
 0x545   : > { %v2549_v50 = vadd.f32 %v2548_v27, %v2547_v6  ;;  %3086 = vst.msk [vmem:[#allocation2 + $0xa8] sm:$0x1] %vm3078_vm11, %v9252_v35  ;;  %3087 = vst.msk [vmem:[#allocation2 + $0xc0] sm:$0x1] %vm3078_vm11, %v9252_v35 }
 0x546   : > { %3088 = vst.msk [vmem:[#allocation2 + $0xd8] sm:$0x1] %vm3078_vm11, %v9252_v35  ;;  %3089 = vst.msk [vmem:[#allocation2 + $0xf0] sm:$0x1] %vm3078_vm11, %v9252_v35 }
 0x547   : > { %v2551_v10 = vadd.f32 %v2550_v41, %v2549_v50  ;;  %v3181_v27 = vld [vmem:[#allocation2 + $0x9] sm:$0xff]  ;;  %3090 = vst.msk [vmem:[#allocation2 + $0x108] sm:$0x1] %vm3078_vm11, %v9252_v35  ;;  %3091 = vst.msk [vmem:[#allocation2 + $0x120] sm:$0x1] %vm3078_vm11, %v9252_v35 }
 0x548   : > { %3471 = vrot.lane.b32.xlu1 %v3181_v27, %s6108_s12  ;;  %3092 = vst.msk [vmem:[#allocation2 + $0x138] sm:$0x1] %vm3078_vm11, %v9252_v35  ;;  %3093 = vst.msk [vmem:[#allocation2 + $0x150] sm:$0x1] %vm3078_vm11, %v9252_v35 }
 0x549   : > { %v2553_v40 = vadd.f32 %v2552_v8, %v2551_v10  ;;  %3094 = vst.msk [vmem:[#allocation2 + $0x168] sm:$0x1] %vm3078_vm11, %v9252_v35  ;;  %3095 = vst.msk [vmem:[#allocation2 + $0x180] sm:$0x1] %vm3078_vm11, %v9252_v35  ;;  %v3213_v8 = vld [vmem:[#allocation2 + $0xa] sm:$0xff] }
 0x54a   : > { %3096 = vst.msk [vmem:[#allocation2 + $0x198] sm:$0x1] %vm3078_vm11, %v9252_v35  ;;  %3098 = vst.msk [vmem:[#allocation2 + $0x29] sm:$0x1] %vm3078_vm11, %v9252_v35 }
 0x54b   : > { %v2555_v60 = vadd.f32 %v2554_v13, %v2553_v40  ;;  %3099 = vst.msk [vmem:[#allocation2 + $0x41] sm:$0x1] %vm3078_vm11, %v9252_v35  ;;  %3100 = vst.msk [vmem:[#allocation2 + $0x59] sm:$0x1] %vm3078_vm11, %v9252_v35  ;;  %v3372_v40 = vld [vmem:[#allocation2 + $0x1a0] sm:$0xff] }
 0x54c   : > { %3101 = vst.msk [vmem:[#allocation2 + $0x71] sm:$0x1] %vm3078_vm11, %v9252_v35  ;;  %3102 = vst.msk [vmem:[#allocation2 + $0x89] sm:$0x1] %vm3078_vm11, %v9252_v35  ;;  %3599 = vrot.lane.b32.xlu1 %v3213_v8, %s6107_s11  ;;  %v3404_v13 = vld [vmem:[#allocation2 + $0x1a1] sm:$0xff] }
 0x54d   : > { %v2557_v53 = vadd.f32 %v2556_v19, %v2555_v60  ;;  %3103 = vst.msk [vmem:[#allocation2 + $0xa1] sm:$0x1] %vm3078_vm11, %v9252_v35  ;;  %3104 = vst.msk [vmem:[#allocation2 + $0xb9] sm:$0x1] %vm3078_vm11, %v9252_v35  ;;  %v3403_v60 = vld [vmem:[#allocation2 + $0x199] sm:$0xff] }
 0x54e   : > { %3105 = vst.msk [vmem:[#allocation2 + $0xd1] sm:$0x1] %vm3078_vm11, %v9252_v35  ;;  %3106 = vst.msk [vmem:[#allocation2 + $0xe9] sm:$0x1] %vm3078_vm11, %v9252_v35  ;;  %v5607_v19 = vmul.f32 -1.442695, %v6868_v14 }
 0x54f   : > { %v2559_v20 = vadd.f32 %v2558_v24, %v2557_v53  ;;  %3107 = vst.msk [vmem:[#allocation2 + $0x101] sm:$0x1] %vm3078_vm11, %v9252_v35  ;;  %3108 = vst.msk [vmem:[#allocation2 + $0x119] sm:$0x1] %vm3078_vm11, %v9252_v35  ;;  %v5610_v53 = vmul.f32 -1.442695, %v6942_v22 }
 0x550   : > { %3109 = vst.msk [vmem:[#allocation2 + $0x131] sm:$0x1] %vm3078_vm11, %v9252_v35  ;;  %3110 = vst.msk [vmem:[#allocation2 + $0x149] sm:$0x1] %vm3078_vm11, %v9252_v35  ;;  %4171 = vrot.lane.b32.xlu1 %v3372_v40, %s6112_s30  ;;  %v5612_v24 = vmul.f32 -1.442695, %v7024_v7 }
 0x551   : > { %v2561_v16 = vadd.f32 %v2560_v59, %v2559_v20  ;;  %3111 = vst.msk [vmem:[#allocation2 + $0x161] sm:$0x1] %vm3078_vm11, %v9252_v35  ;;  %3112 = vst.msk [vmem:[#allocation2 + $0x179] sm:$0x1] %vm3078_vm11, %v9252_v35  ;;  %v3371_v52 = vld [vmem:[#allocation2 + $0x198] sm:$0xff] }
 0x552   : > { %3113 = vst.msk [vmem:[#allocation2 + $0x191] sm:$0x1] %vm3078_vm11, %v9252_v35  ;;  %3114 = vst.msk [vmem:[#allocation2 + $0x1a9] sm:$0x1] %vm3078_vm11, %v9252_v35  ;;  %4169 = vrot.lane.b32.xlu0 %v3371_v52, %s6112_s30  ;;  %v5611_v20 = vmul.f32 -1.442695, %v7030_v31 }
 0x553   : > { %v2563_v43 = vadd.f32 %v2562_v17, %v2561_v16  ;;  %v5613_v59 = vmul.f32 -1.442695, %v7109_v15  ;;  %v5616_v16 = vmul.f32 -1.442695, %v7177_v58  ;;  %v5618_v17 = vmul.f32 -1.442695, %v7221_v57 }
 0x554   : > { %4299 = vrot.lane.b32.xlu1 %v3404_v13, %s6113_s18  ;;  %v9253_v52 = vld [vmem:[#allocation3_spill] sm:$0xff] }
 0x555   : > { %v2565_v45 = vadd.f32 %v2564_v36, %v2563_v43  ;;  %v5617_v43 = vmul.f32 -1.442695, %v7224_v0  ;;  %v5619_v36 = vmul.f32 -1.442695, %v7259_v39  ;;  %v5621_v13 = vmul.f32 -1.442695, %v9253_v52 }
 0x556   : > { %4297 = vrot.lane.b32.xlu0 %v3403_v60, %s6113_s18 }
 0x557   : > { %v2567_v54 = vadd.f32 %v2566_v11, %v2565_v45  ;;  %v5622_v11 = vmul.f32 -1.442695, %v7286_v51 }
 0x559   : > { %v2569_v37 = vadd.f32 %v2568_v25, %v2567_v54 }
 0x55b   : > { %v2571_v47 = vadd.f32 %v2570_v34, %v2569_v37 }
 0x55d   : > { %v2573_v38 = vadd.f32 %v2572_v28, %v2571_v47 }
 0x55f   : > { %v2575_v48 = vadd.f32 %v2574_v29, %v2573_v38 }
 0x561   : > { %v2576_v42 = vrot.slane %v2575_v48, 4 }
 0x563   : > { %v2577_v21 = vadd.f32 %v2576_v42, %v2575_v48 }
 0x565   : > { %v2578_v9 = vrot.slane %v2577_v21, 2 }
 0x567   : > { %v2579_v32 = vadd.f32 %v2578_v9, %v2577_v21 }
 0x569   : > { %v2580_v30 = vrot.slane %v2579_v32, 1 }
 0x56b   : > { %v2581_v6 = vadd.f32 %v2580_v30, %v2579_v32 }
 0x56d   : > { %5845 = vmatmul.mubr.msk.f32.vlgmr.msra.gmra.mrb[0].mxu1 %vm1631_vm0, %v2581_v6 }
 0x56e   : > { %5848 = vmatpush3.msra.mxu1 %v7416_v63  ;;  %5849 = vmatprep.mubr.msk.f32.mxu1 %vm6116_vm9, %v9252_v35 }
 0x640   : > { %v2651_v50 = vpop.f32.mrb[0].mxu1 }
 0x641   : > { %v2656_v33 = vmul.f32 0.003921569, %v2651_v50  ;;  %v5846_v41 = vpop.f32.mrb[1].mxu1 }
 0x643   : > { %v2657_v10 = vadd.f32 1e-05, %v2656_v33 }
 0x645   : > { %5969 = vrsqrt.f32 %v2657_v10 }
 0x646   : > { %5971 = vpow2.f32 %v5608_v26 }
 0x647   : > { %5973 = vpow2.f32 %v5607_v19 }
 0x648   : > { %5975 = vpow2.f32 %v5610_v53  ;;  %v9254_v53 = vld [vmem:[#allocation4_spill] sm:$0xff] }
 0x649   : > { %5977 = vpow2.f32 %v5609_v1  ;;  %v5624_v1 = vmul.f32 -1.442695, %v9254_v53 }
 0x64a   : > { %5979 = vpow2.f32 %v5612_v24 }
 0x64b   : > { %5981 = vpow2.f32 %v5611_v20  ;;  %v9255_v20 = vld [vmem:[#allocation5_spill] sm:$0xff] }
 0x64c   : > { %5983 = vpow2.f32 %v5614_v55  ;;  %v5623_v55 = vmul.f32 -1.442695, %v9255_v20 }
 0x64d   : > { %5985 = vpow2.f32 %v5613_v59 }
 0x64e   : > { %5987 = vpow2.f32 %v5616_v16  ;;  %v9256_v16 = vld [vmem:[#allocation6_spill] sm:$0xff] }
 0x64f   : > { %v5970_v63 = vpop.eup %5969  ;;  %5989 = vpow2.f32 %v5615_v2  ;;  %v5626_v2 = vmul.f32 -1.442695, %v9256_v16 }
 0x650   : > { %5850 = vmatmul.mubr.msk.f32.vlgmr.msra.gmra.mrb[2].mxu1 %vm1631_vm0, %v5970_v63  ;;  %v5972_v45 = vpop.eup %5971  ;;  %5991 = vpow2.f32 %v5618_v17 }
 0x651   : > { %v5974_v3 = vpop.eup %5973  ;;  %5993 = vpow2.f32 %v5617_v43  ;;  %v2829_v25 = vadd.f32 1.0, %v5972_v45  ;;  %v9257_v43 = vld [vmem:[#allocation7_spill] sm:$0xff]  ;;  %v9258_v45 = vld [vmem:[#allocation8_spill] sm:$0xff] }
 0x652   : > { %v5976_v54 = vpop.eup %5975  ;;  %5995 = vpow2.f32 %v5620_v62  ;;  %v2828_v4 = vadd.f32 1.0, %v5974_v3  ;;  %v5625_v62 = vmul.f32 -1.442695, %v9257_v43  ;;  %v5628_v3 = vmul.f32 -1.442695, %v9258_v45 }
 0x653   : > { %v5978_v56 = vpop.eup %5977  ;;  %5997 = vpow2.f32 %v5619_v36  ;;  %v2831_v47 = vadd.f32 1.0, %v5976_v54  ;;  %v9259_v54 = vld [vmem:[#allocation9_spill] sm:$0xff] }
 0x654   : > { %v5980_v37 = vpop.eup %5979  ;;  %5999 = vpow2.f32 %v5622_v11  ;;  %v2830_v38 = vadd.f32 1.0, %v5978_v56  ;;  %v5627_v56 = vmul.f32 -1.442695, %v9259_v54 }
 0x655   : > { %v5982_v34 = vpop.eup %5981  ;;  %6001 = vrcp.f32 %v2829_v25  ;;  %v2833_v48 = vadd.f32 1.0, %v5980_v37  ;;  %v9260_v37 = vld [vmem:[#allocation10_spill] sm:$0xff] }
 0x656   : > { %v5984_v28 = vpop.eup %5983  ;;  %6003 = vrcp.f32 %v2828_v4  ;;  %v2832_v21 = vadd.f32 1.0, %v5982_v34  ;;  %v5630_v4 = vmul.f32 -1.442695, %v9260_v37 }
 0x657   : > { %v5986_v29 = vpop.eup %5985  ;;  %6005 = vrcp.f32 %v2831_v47  ;;  %v2835_v32 = vadd.f32 1.0, %v5984_v28  ;;  %v9261_v47 = vld [vmem:[#allocation11_spill] sm:$0xff] }
 0x658   : > { %v5988_v42 = vpop.eup %5987  ;;  %6007 = vrcp.f32 %v2830_v38  ;;  %v2834_v6 = vadd.f32 1.0, %v5986_v29  ;;  %v5629_v28 = vmul.f32 -1.442695, %v9261_v47  ;;  %v9262_v29 = vld [vmem:[#allocation12_spill] sm:$0xff] }
 0x659   : > { %v5990_v9 = vpop.eup %5989  ;;  %6009 = vrcp.f32 %v2833_v48  ;;  %v2837_v46 = vadd.f32 1.0, %v5988_v42  ;;  %v5632_v48 = vmul.f32 -1.442695, %v9262_v29 }
 0x65a   : > { %v5992_v30 = vpop.eup %5991  ;;  %6011 = vrcp.f32 %v2832_v21  ;;  %v2836_v50 = vadd.f32 1.0, %v5990_v9  ;;  %v9263_v21 = vld [vmem:[#allocation13_spill] sm:$0xff] }
 0x65b   : > { %v5994_v35 = vpop.eup %5993  ;;  %6013 = vrcp.f32 %v2835_v32  ;;  %v2839_v41 = vadd.f32 1.0, %v5992_v30  ;;  %v5631_v9 = vmul.f32 -1.442695, %v9263_v21  ;;  %v9264_v30 = vld [vmem:[#allocation14_spill] sm:$0xff] }
 0x65c   : > { %v5996_v27 = vpop.eup %5995  ;;  %6015 = vrcp.f32 %v2834_v6  ;;  %v2838_v10 = vadd.f32 1.0, %v5994_v35  ;;  %v5634_v6 = vmul.f32 -1.442695, %v9264_v30 }
 0x65d   : > { %v5998_v33 = vpop.eup %5997  ;;  %6017 = vrcp.f32 %v2837_v46  ;;  %v2841_v12 = vadd.f32 1.0, %v5996_v27  ;;  %v9265_v46 = vld [vmem:[#allocation15_spill] sm:$0xff] }
 0x65e   : > { %v6000_v63 = vpop.eup %5999  ;;  %6019 = vrcp.f32 %v2836_v50  ;;  %v2840_v8 = vadd.f32 1.0, %v5998_v33  ;;  %v5633_v27 = vmul.f32 -1.442695, %v9265_v46  ;;  %v9266_v33 = vld [vmem:[#allocation16_spill] sm:$0xff] }
 0x65f   : > { %v7650_v40 = vpop.eup %6001  ;;  %6021 = vrcp.f32 %v2839_v41  ;;  %v2843_v26 = vadd.f32 1.0, %v6000_v63  ;;  %v5636_v41 = vmul.f32 -1.442695, %v9266_v33  ;;  %v9267_v63 = vld [vmem:[#allocation17_spill] sm:$0xff] }
 0x660   : > { %v7653_v60 = vpop.eup %6003  ;;  %6023 = vrcp.f32 %v2838_v10 }
 0x661   : > { %v7655_v19 = vpop.eup %6005  ;;  %6025 = vrcp.f32 %v2841_v12  ;;  %v5635_v12 = vmul.f32 -1.442695, %v9267_v63 }
 0x662   : > { %v7658_v24 = vpop.eup %6007  ;;  %6027 = vrcp.f32 %v2840_v8 }
 0x663   : > { %v7661_v59 = vpop.eup %6009  ;;  %6029 = vpow2.f32 %v5621_v13  ;;  %v5638_v13 = vmul.f32 -1.442695, %v7405_v5 }
 0x664   : > { %v7664_v17 = vpop.eup %6011  ;;  %6031 = vrcp.f32 %v2843_v26 }
 0x665   : > { %v7667_v36 = vpop.eup %6013  ;;  %6033 = vpow2.f32 %v5624_v1  ;;  %v9268_v1 = vld [vmem:[#allocation19_spill] sm:$0xff] }
 0x666   : > { %v7670_v11 = vpop.eup %6015  ;;  %6035 = vpow2.f32 %v5623_v55  ;;  %v5637_v55 = vmul.f32 -1.442695, %v9268_v1 }
 0x667   : > { %v7673_v25 = vpop.eup %6017  ;;  %6037 = vpow2.f32 %v5626_v2 }
 0x668   : > { %v7676_v34 = vpop.eup %6019  ;;  %6039 = vpow2.f32 %v5625_v62 }
 0x669   : > { %v7679_v38 = vpop.eup %6021  ;;  %6041 = vpow2.f32 %v5628_v3 }
 0x66a   : > { %v7682_v42 = vpop.eup %6023  ;;  %6043 = vpow2.f32 %v5627_v56 }
 0x66b   : > { %v7685_v32 = vpop.eup %6025  ;;  %6045 = vpow2.f32 %v5630_v4 }
 0x66c   : > { %v7688_v35 = vpop.eup %6027  ;;  %6047 = vpow2.f32 %v5629_v28 }
 0x66d   : > { %v6030_v50 = vpop.eup %6029  ;;  %6049 = vpow2.f32 %v5632_v48 }
 0x66e   : > { %v7692_v10 = vpop.eup %6031  ;;  %6051 = vpow2.f32 %v5631_v9  ;;  %v2842_v62 = vadd.f32 1.0, %v6030_v50 }
 0x66f   : > { %v6034_v8 = vpop.eup %6033  ;;  %6053 = vpow2.f32 %v5634_v6 }
 0x670   : > { %v6036_v26 = vpop.eup %6035  ;;  %6055 = vpow2.f32 %v5633_v27  ;;  %v2845_v56 = vadd.f32 1.0, %v6034_v8 }
 0x671   : > { %v6038_v2 = vpop.eup %6037  ;;  %6057 = vpow2.f32 %v5636_v41  ;;  %v2844_v28 = vadd.f32 1.0, %v6036_v26 }
 0x672   : > { %v6040_v3 = vpop.eup %6039  ;;  %6059 = vpow2.f32 %v5635_v12  ;;  %v2847_v9 = vadd.f32 1.0, %v6038_v2 }
 0x673   : > { %v6042_v4 = vpop.eup %6041  ;;  %6061 = vpow2.f32 %v5638_v13  ;;  %v2846_v6 = vadd.f32 1.0, %v6040_v3 }
 0x674   : > { %v6044_v48 = vpop.eup %6043  ;;  %6063 = vpow2.f32 %v5637_v55  ;;  %v2849_v27 = vadd.f32 1.0, %v6042_v4 }
 0x675   : > { %v6046_v63 = vpop.eup %6045  ;;  %6065 = vrcp.f32 %v2842_v62  ;;  %v2848_v1 = vadd.f32 1.0, %v6044_v48 }
 0x676   : > { %v6048_v5 = vpop.eup %6047  ;;  %6067 = vrcp.f32 %v2845_v56  ;;  %v2851_v41 = vadd.f32 1.0, %v6046_v63 }
 0x677   : > { %v6050_v33 = vpop.eup %6049  ;;  %6069 = vrcp.f32 %v2844_v28  ;;  %v2850_v12 = vadd.f32 1.0, %v6048_v5 }
 0x678   : > { %v6052_v50 = vpop.eup %6051  ;;  %6071 = vrcp.f32 %v2847_v9  ;;  %v2853_v13 = vadd.f32 1.0, %v6050_v33 }
 0x679   : > { %v6054_v8 = vpop.eup %6053  ;;  %6073 = vrcp.f32 %v2846_v6  ;;  %v2852_v55 = vadd.f32 1.0, %v6052_v50 }
 0x67a   : > { %v6056_v26 = vpop.eup %6055  ;;  %6075 = vrcp.f32 %v2849_v27  ;;  %v2855_v3 = vadd.f32 1.0, %v6054_v8 }
 0x67b   : > { %v6058_v2 = vpop.eup %6057  ;;  %6077 = vrcp.f32 %v2848_v1  ;;  %v2854_v4 = vadd.f32 1.0, %v6056_v26 }
 0x67c   : > { %v6060_v62 = vpop.eup %6059  ;;  %6079 = vrcp.f32 %v2851_v41  ;;  %v2857_v48 = vadd.f32 1.0, %v6058_v2 }
 0x67d   : > { %v6062_v56 = vpop.eup %6061  ;;  %6081 = vrcp.f32 %v2850_v12  ;;  %v2856_v63 = vadd.f32 1.0, %v6060_v62  ;;  %v2925_v62 = vmul.f32 %v7650_v40, %v6860_v49  ;;  %v2931_v49 = vmul.f32 %v7667_v36, %v7104_v18 }
 0x67e   : > { %v6064_v28 = vpop.eup %6063  ;;  %6083 = vrcp.f32 %v2853_v13  ;;  %v2859_v5 = vadd.f32 1.0, %v6062_v56  ;;  %v2924_v56 = vmul.f32 %v7653_v60, %v6868_v14  ;;  %v2930_v40 = vmul.f32 %v7670_v11, %v7109_v15 }
 0x67f   : > { %v6066_v9 = vpop.eup %6065  ;;  %6085 = vrcp.f32 %v2852_v55  ;;  %v2858_v33 = vadd.f32 1.0, %v6064_v28  ;;  %v2926_v28 = vmul.f32 %v7658_v24, %v6948_v61  ;;  %v2933_v14 = vmul.f32 %v7673_v25, %v7177_v58 }
 0x680   : > { %v6068_v6 = vpop.eup %6067  ;;  %6087 = vrcp.f32 %v2855_v3  ;;  %v2932_v61 = vmul.f32 %v7676_v34, %v7182_v23  ;;  %v2934_v60 = vmul.f32 %v7682_v42, %v7224_v0  ;;  %v2936_v15 = vmul.f32 %v7688_v35, %v7259_v39 }
 0x681   : > { %v6070_v27 = vpop.eup %6069  ;;  %6089 = vrcp.f32 %v2854_v4  ;;  %v2927_v4 = vmul.f32 %v7655_v19, %v6942_v22  ;;  %v2939_v58 = vmul.f32 %v7692_v10, %v7286_v51  ;;  %v2938_v19 = vmul.f32 %v6066_v9, %v9253_v52 }
 0x682   : > { %v6072_v1 = vpop.eup %6071  ;;  %6091 = vrcp.f32 %v2857_v48  ;;  %v2929_v48 = vmul.f32 %v7661_v59, %v7024_v7  ;;  %v2935_v7 = vmul.f32 %v7679_v38, %v7221_v57  ;;  %v2941_v23 = vmul.f32 %v6068_v6, %v9254_v53 }
 0x683   : > { %v6074_v50 = vpop.eup %6073  ;;  %6093 = vrcp.f32 %v2856_v63  ;;  %v2940_v57 = vmul.f32 %v6070_v27, %v9255_v20  ;;  %v2943_v59 = vmul.f32 %v6072_v1, %v9256_v16  ;;  %v9269_v16 = vld [vmem:[#allocation20_spill] sm:$0xff] }
 0x684   : > { %v6076_v41 = vpop.eup %6075  ;;  %6095 = vrcp.f32 %v2859_v5  ;;  %v2928_v5 = vmul.f32 %v7664_v17, %v7030_v31  ;;  %v2937_v31 = vmul.f32 %v7685_v32, %v7256_v44  ;;  %v2942_v0 = vmul.f32 %v6074_v50, %v9257_v43 }
 0x685   : > { %v6078_v8 = vpop.eup %6077  ;;  %6097 = vrcp.f32 %v2858_v33  ;;  %v2945_v44 = vmul.f32 %v6076_v41, %v9258_v45  ;;  %v9270_v25 = vsub.s32 0, %v9269_v16  ;;  %v9271_v45 = vld [vmem:[#allocation16_spill] sm:$0xff] }
 0x686   : > { %v6080_v12 = vpop.eup %6079  ;;  %v2944_v17 = vmul.f32 %v6078_v8, %v9259_v54  ;;  %v9272_v54 = vld [vmem:[#allocation17_spill] sm:$0xff] }
 0x687   : > { %v6082_v26 = vpop.eup %6081  ;;  %v2947_v39 = vmul.f32 %v6080_v12, %v9260_v37  ;;  %v9273_v37 = vld [vmem:[#allocation18_spill] sm:$0xff] }
 0x688   : > { %v6084_v13 = vpop.eup %6083  ;;  %v2946_v36 = vmul.f32 %v6082_v26, %v9261_v47  ;;  %v9274_v47 = vld [vmem:[#allocation19_spill] sm:$0xff] }
 0x689   : > { %v6086_v2 = vpop.eup %6085  ;;  %v2949_v51 = vmul.f32 %v6084_v13, %v9262_v29 }
 0x68a   : > { %v6088_v55 = vpop.eup %6087  ;;  %v2948_v53 = vmul.f32 %v6086_v2, %v9263_v21 }
 0x68b   : > { %v6090_v3 = vpop.eup %6089  ;;  %v2951_v11 = vmul.f32 %v6088_v55, %v9264_v30 }
 0x68c   : > { %v6092_v63 = vpop.eup %6091  ;;  %v2950_v20 = vmul.f32 %v6090_v3, %v9265_v46 }
 0x68d   : > { %v6094_v22 = vpop.eup %6093  ;;  %v2953_v38 = vmul.f32 %v6092_v63, %v9271_v45 }
 0x68e   : > { %v6096_v18 = vpop.eup %6095  ;;  %v2952_v42 = vmul.f32 %v6094_v22, %v9272_v54 }
 0x68f   : > { %v6098_v24 = vpop.eup %6097  ;;  %v2955_v32 = vmul.f32 %v6096_v18, %v9273_v37 }
 0x690   : > { %v2954_v35 = vmul.f32 %v6098_v24, %v9274_v47 }
 0x723   : > { %v2728_v52 = vpop.f32.mrb[2].mxu1 }
 0x724   : > { %v2959_v43 = vrot.slane %v2728_v52, %v9270_v25  ;;  %v5851_v34 = vpop.f32.mrb[3].mxu1  ;;  %v7752_v25 = vld [vmem:[%s9192_s4] ss:$0 sm:$0xff] }
 0x726   : > { %v2960_v29 = vmul.f32 %v2959_v43, %v2924_v56  ;;  %v2961_v10 = vmul.f32 %v2959_v43, %v2925_v62  ;;  %v2962_v9 = vmul.f32 %v2959_v43, %v2926_v28  ;;  %v2963_v21 = vmul.f32 %v2959_v43, %v2927_v4  ;;  %v5639_v62 = vld [vmem:[%s9191_s3] ss:$0 sm:$0xff] }
 0x727   : > { %v2964_v6 = vmul.f32 %v2959_v43, %v2928_v5  ;;  %v2965_v30 = vmul.f32 %v2959_v43, %v2929_v48  ;;  %v2966_v27 = vmul.f32 %v2959_v43, %v2930_v40  ;;  %v2967_v46 = vmul.f32 %v2959_v43, %v2931_v49 }
 0x728   : > { %v2968_v33 = vmul.f32 %v2959_v43, %v2932_v61  ;;  %v2969_v1 = vmul.f32 %v2959_v43, %v2933_v14  ;;  %v2970_v50 = vmul.f32 %v2959_v43, %v2934_v60  ;;  %v2971_v41 = vmul.f32 %v2959_v43, %v2935_v7 }
 0x729   : > { %v2972_v8 = vmul.f32 %v2959_v43, %v2936_v15  ;;  %v2973_v12 = vmul.f32 %v2959_v43, %v2937_v31  ;;  %v2974_v26 = vmul.f32 %v2959_v43, %v2938_v19  ;;  %v2975_v13 = vmul.f32 %v2959_v43, %v2939_v58 }
 0x72a   : > { %v2976_v2 = vmul.f32 %v2959_v43, %v2940_v57  ;;  %v2977_v55 = vmul.f32 %v2959_v43, %v2941_v23  ;;  %v2978_v3 = vmul.f32 %v2959_v43, %v2942_v0  ;;  %v2979_v63 = vmul.f32 %v2959_v43, %v2943_v59 }
 0x72b   : > { %v2980_v56 = vmul.f32 %v2959_v43, %v2944_v17  ;;  %v2981_v4 = vmul.f32 %v2959_v43, %v2945_v44  ;;  %v2982_v28 = vmul.f32 %v2959_v43, %v2946_v36  ;;  %v2983_v48 = vmul.f32 %v2959_v43, %v2947_v39 }
 0x72c   : > { %v2984_v5 = vmul.f32 %v2959_v43, %v2948_v53  ;;  %v2985_v49 = vmul.f32 %v2959_v43, %v2949_v51  ;;  %v2986_v40 = vmul.f32 %v2959_v43, %v2950_v20  ;;  %v2987_v14 = vmul.f32 %v2959_v43, %v2951_v11 }
 0x72d   : > { %v2988_v22 = vmul.f32 %v2959_v43, %v2952_v42  ;;  %v2989_v61 = vmul.f32 %v2959_v43, %v2953_v38  ;;  %v2990_v7 = vmul.f32 %v2959_v43, %v2954_v35  ;;  %v2991_v60 = vmul.f32 %v2959_v43, %v2955_v32 }
 0x72e   : > { %v2999_v31 = vmul.f32 %v5639_v62, %v2960_v29  ;;  %v3000_v18 = vmul.f32 %v5639_v62, %v2961_v10  ;;  %v3001_v15 = vmul.f32 %v5639_v62, %v2962_v9  ;;  %v3002_v58 = vmul.f32 %v5639_v62, %v2963_v21 }
 0x72f   : > { %v3003_v19 = vmul.f32 %v5639_v62, %v2964_v6  ;;  %v3004_v23 = vmul.f32 %v5639_v62, %v2965_v30  ;;  %v3005_v24 = vmul.f32 %v5639_v62, %v2966_v27  ;;  %v3006_v57 = vmul.f32 %v5639_v62, %v2967_v46 }
 0x730   : > { %v3007_v59 = vmul.f32 %v5639_v62, %v2968_v33  ;;  %v3008_v0 = vmul.f32 %v5639_v62, %v2969_v1  ;;  %v3009_v44 = vmul.f32 %v5639_v62, %v2970_v50  ;;  %v3010_v17 = vmul.f32 %v5639_v62, %v2971_v41 }
 0x731   : > { %v3011_v39 = vmul.f32 %v5639_v62, %v2972_v8  ;;  %v3012_v36 = vmul.f32 %v5639_v62, %v2973_v12  ;;  %v3013_v51 = vmul.f32 %v5639_v62, %v2974_v26  ;;  %v3014_v52 = vmul.f32 %v5639_v62, %v2975_v13 }
 0x732   : > { %v3015_v53 = vmul.f32 %v5639_v62, %v2976_v2  ;;  %v3016_v11 = vmul.f32 %v5639_v62, %v2977_v55  ;;  %v3017_v20 = vmul.f32 %v5639_v62, %v2978_v3  ;;  %v3018_v16 = vmul.f32 %v5639_v62, %v2979_v63 }
 0x733   : > { %v3019_v43 = vmul.f32 %v5639_v62, %v2980_v56  ;;  %v3020_v34 = vmul.f32 %v5639_v62, %v2981_v4  ;;  %v3021_v45 = vmul.f32 %v5639_v62, %v2982_v28  ;;  %v3022_v38 = vmul.f32 %v5639_v62, %v2983_v48 }
 0x734   : > { %v3023_v54 = vmul.f32 %v5639_v62, %v2984_v5  ;;  %v3024_v42 = vmul.f32 %v5639_v62, %v2985_v49  ;;  %v3025_v37 = vmul.f32 %v5639_v62, %v2986_v40  ;;  %v3026_v32 = vmul.f32 %v5639_v62, %v2987_v14 }
 0x735   : > { %v3027_v47 = vmul.f32 %v5639_v62, %v2988_v22  ;;  %v3028_v35 = vmul.f32 %v5639_v62, %v2989_v61  ;;  %v3029_v29 = vmul.f32 %v5639_v62, %v2990_v7  ;;  %v3030_v10 = vmul.f32 %v5639_v62, %v2991_v60 }
 0x736   : > { %v3038_v9 = vadd.f32 %v7752_v25, %v2999_v31  ;;  %v3039_v21 = vadd.f32 %v7752_v25, %v3000_v18  ;;  %v3040_v6 = vadd.f32 %v7752_v25, %v3001_v15  ;;  %v3041_v30 = vadd.f32 %v7752_v25, %v3002_v58 }
 0x737   : > { %v3042_v27 = vadd.f32 %v7752_v25, %v3003_v19  ;;  %v3043_v46 = vadd.f32 %v7752_v25, %v3004_v23  ;;  %v3044_v33 = vadd.f32 %v7752_v25, %v3005_v24  ;;  %v3045_v1 = vadd.f32 %v7752_v25, %v3006_v57 }
 0x738   : > { %v3046_v50 = vadd.f32 %v7752_v25, %v3007_v59  ;;  %v3047_v41 = vadd.f32 %v7752_v25, %v3008_v0  ;;  %v3048_v8 = vadd.f32 %v7752_v25, %v3009_v44  ;;  %v3049_v12 = vadd.f32 %v7752_v25, %v3010_v17  ;;  %3116 = vst.msk [vmem:[#allocation2 + $0x19] sm:$0xff] %vm1631_vm0, %v3038_v9 }
 0x739   : > { %3117 = vst.msk [vmem:[#allocation2 + $0x21] sm:$0xff] %vm1631_vm0, %v3039_v21  ;;  %3118 = vst.msk [vmem:[#allocation2 + $0x31] sm:$0xff] %vm1631_vm0, %v3040_v6  ;;  %v3050_v26 = vadd.f32 %v7752_v25, %v3011_v39  ;;  %v3051_v13 = vadd.f32 %v7752_v25, %v3012_v36  ;;  %v3052_v2 = vadd.f32 %v7752_v25, %v3013_v51 }
 0x73a   : > { %3119 = vst.msk [vmem:[#allocation2 + $0x39] sm:$0xff] %vm1631_vm0, %v3041_v30  ;;  %v3053_v55 = vadd.f32 %v7752_v25, %v3014_v52  ;;  %3120 = vst.msk [vmem:[#allocation2 + $0x49] sm:$0xff] %vm1631_vm0, %v3042_v27  ;;  %v3054_v3 = vadd.f32 %v7752_v25, %v3015_v53  ;;  %v3055_v63 = vadd.f32 %v7752_v25, %v3016_v11  ;;  %v4717_v27 = vld [vmem:[%s9190_s2] sm:$0xff] }
 0x73b   : > { %3121 = vst.msk [vmem:[#allocation2 + $0x51] sm:$0xff] %vm1631_vm0, %v3043_v46  ;;  %3122 = vst.msk [vmem:[#allocation2 + $0x61] sm:$0xff] %vm1631_vm0, %v3044_v33  ;;  %v3056_v62 = vadd.f32 %v7752_v25, %v3017_v20  ;;  %v3057_v56 = vadd.f32 %v7752_v25, %v3018_v16  ;;  %v3058_v4 = vadd.f32 %v7752_v25, %v3019_v43  ;;  %v4718_v46 = vld [vmem:[%s9190_s2 + $0x8] sm:$0xff] }
 0x73c   : > { %3123 = vst.msk [vmem:[#allocation2 + $0x69] sm:$0xff] %vm1631_vm0, %v3045_v1  ;;  %3124 = vst.msk [vmem:[#allocation2 + $0x79] sm:$0xff] %vm1631_vm0, %v3046_v50  ;;  %v3059_v28 = vadd.f32 %v7752_v25, %v3020_v34  ;;  %v3060_v48 = vadd.f32 %v7752_v25, %v3021_v45  ;;  %v3061_v5 = vadd.f32 %v7752_v25, %v3022_v38  ;;  %v4719_v1 = vld [vmem:[%s9190_s2 + $0x10] sm:$0xff]  ;;  %v4720_v50 = vld [vmem:[%s9190_s2 + $0x18] sm:$0xff] }
 0x73d   : > { %3125 = vst.msk [vmem:[#allocation2 + $0x81] sm:$0xff] %vm1631_vm0, %v3047_v41  ;;  %3126 = vst.msk [vmem:[#allocation2 + $0x91] sm:$0xff] %vm1631_vm0, %v3048_v8  ;;  %v3062_v49 = vadd.f32 %v7752_v25, %v3023_v54  ;;  %v3063_v40 = vadd.f32 %v7752_v25, %v3024_v42  ;;  %v3064_v14 = vadd.f32 %v7752_v25, %v3025_v37  ;;  %v4721_v8 = vld [vmem:[%s9190_s2 + $0x20] sm:$0xff] }
 0x73e   : > { %3127 = vst.msk [vmem:[#allocation2 + $0x99] sm:$0xff] %vm1631_vm0, %v3049_v12  ;;  %3128 = vst.msk [vmem:[#allocation2 + $0xa9] sm:$0xff] %vm1631_vm0, %v3050_v26  ;;  %v3065_v22 = vadd.f32 %v7752_v25, %v3026_v32  ;;  %v3066_v61 = vadd.f32 %v7752_v25, %v3027_v47  ;;  %v3067_v7 = vadd.f32 %v7752_v25, %v3028_v35  ;;  %v4722_v12 = vld [vmem:[%s9190_s2 + $0x28] sm:$0xff] }
 0x73f   : > { %3129 = vst.msk [vmem:[#allocation2 + $0xb1] sm:$0xff] %vm1631_vm0, %v3051_v13  ;;  %3130 = vst.msk [vmem:[#allocation2 + $0xc1] sm:$0xff] %vm1631_vm0, %v3052_v2  ;;  %v3068_v60 = vadd.f32 %v7752_v25, %v3029_v29  ;;  %v3069_v31 = vadd.f32 %v7752_v25, %v3030_v10  ;;  %v7820_v15 = vld [vmem:[#allocation2 + $0x19] sm:$0xff]  ;;  %v5934_v33 = vpack.c.bf16 %v4718_v46, %v4717_v27  ;;  %v4723_v2 = vld [vmem:[%s9190_s2 + $0x30] sm:$0xff] }
 0x740   : > { %3131 = vst.msk [vmem:[#allocation2 + $0xc9] sm:$0xff] %vm1631_vm0, %v3053_v55  ;;  %3132 = vst.msk [vmem:[#allocation2 + $0xd9] sm:$0xff] %vm1631_vm0, %v3054_v3  ;;  %v7818_v18 = vld [vmem:[#allocation2 + $0x21] sm:$0xff]  ;;  %3473 = vrot.lane.b32.xlu0 %v7820_v15, %s6108_s12  ;;  %v7828_v19 = vld [vmem:[#allocation2 + $0x31] sm:$0xff]  ;;  %v5938_v41 = vpack.c.bf16 %v4720_v50, %v4719_v1  ;;  %v5942_v26 = vpack.c.bf16 %v4722_v12, %v4721_v8 }
 0x741   : > { %3133 = vst.msk [vmem:[#allocation2 + $0xe1] sm:$0xff] %vm1631_vm0, %v3055_v63  ;;  %3134 = vst.msk [vmem:[#allocation2 + $0xf1] sm:$0xff] %vm1631_vm0, %v3056_v62  ;;  %3475 = vrot.lane.b32.xlu1 %v7818_v18, %s6108_s12  ;;  %v7826_v58 = vld [vmem:[#allocation2 + $0x39] sm:$0xff]  ;;  %v7836_v24 = vld [vmem:[#allocation2 + $0x49] sm:$0xff]  ;;  %5935 = vmatprep.subr.bf16.mxu1 %v5934_v33 }
 0x742   : > { %3135 = vst.msk [vmem:[#allocation2 + $0xf9] sm:$0xff] %vm1631_vm0, %v3057_v56  ;;  %3136 = vst.msk [vmem:[#allocation2 + $0x109] sm:$0xff] %vm1631_vm0, %v3058_v4  ;;  %v7834_v23 = vld [vmem:[#allocation2 + $0x51] sm:$0xff]  ;;  %v7844_v59 = vld [vmem:[#allocation2 + $0x61] sm:$0xff]  ;;  %5937 = vmatpush3.bf16.msra.mxu1 %v5934_v33  ;;  %v7966_v56 = vpop.permute.xlu0 %3469  ;;  %v7968_v4 = vpop.permute.xlu1 %3471 }
 0x743   : > { %3137 = vst.msk [vmem:[#allocation2 + $0x111] sm:$0xff] %vm1631_vm0, %v3059_v28  ;;  %3138 = vst.msk [vmem:[#allocation2 + $0x121] sm:$0xff] %vm1631_vm0, %v3060_v48  ;;  %v7842_v57 = vld [vmem:[#allocation2 + $0x69] sm:$0xff]  ;;  %v7852_v44 = vld [vmem:[#allocation2 + $0x79] sm:$0xff]  ;;  %5939 = vmatprep.subr.bf16.mxu1 %v5938_v41 }
 0x744   : > { %3139 = vst.msk [vmem:[#allocation2 + $0x129] sm:$0xff] %vm1631_vm0, %v3061_v5  ;;  %3140 = vst.msk [vmem:[#allocation2 + $0x139] sm:$0xff] %vm1631_vm0, %v3062_v49  ;;  %3477 = vrot.lane.b32.xlu0 %v7828_v19, %s6108_s12  ;;  %v7850_v0 = vld [vmem:[#allocation2 + $0x81] sm:$0xff]  ;;  %v7860_v39 = vld [vmem:[#allocation2 + $0x91] sm:$0xff] }
 0x745   : > { %3141 = vst.msk [vmem:[#allocation2 + $0x141] sm:$0xff] %vm1631_vm0, %v3063_v40  ;;  %3142 = vst.msk [vmem:[#allocation2 + $0x151] sm:$0xff] %vm1631_vm0, %v3064_v14  ;;  %3479 = vrot.lane.b32.xlu1 %v7826_v58, %s6108_s12  ;;  %v7858_v17 = vld [vmem:[#allocation2 + $0x99] sm:$0xff]  ;;  %v7868_v51 = vld [vmem:[#allocation2 + $0xa9] sm:$0xff] }
 0x746   : > { %3143 = vst.msk [vmem:[#allocation2 + $0x159] sm:$0xff] %vm1631_vm0, %v3065_v22  ;;  %3144 = vst.msk [vmem:[#allocation2 + $0x169] sm:$0xff] %vm1631_vm0, %v3066_v61  ;;  %v7866_v36 = vld [vmem:[#allocation2 + $0xb1] sm:$0xff]  ;;  %v7876_v53 = vld [vmem:[#allocation2 + $0xc1] sm:$0xff]  ;;  %5941 = vmatpush3.bf16.msra.mxu1 %v5938_v41  ;;  %v7973_v28 = vpop.permute.xlu0 %3597  ;;  %v7975_v48 = vpop.permute.xlu1 %3599 }
 0x747   : > { %3145 = vst.msk [vmem:[#allocation2 + $0x171] sm:$0xff] %vm1631_vm0, %v3067_v7  ;;  %3146 = vst.msk [vmem:[#allocation2 + $0x181] sm:$0xff] %vm1631_vm0, %v3068_v60  ;;  %v7874_v52 = vld [vmem:[#allocation2 + $0xc9] sm:$0xff]  ;;  %v7884_v20 = vld [vmem:[#allocation2 + $0xd9] sm:$0xff]  ;;  %5943 = vmatprep.subr.bf16.mxu1 %v5942_v26 }
 0x748   : > { %3147 = vst.msk [vmem:[#allocation2 + $0x189] sm:$0xff] %vm1631_vm0, %v3069_v31  ;;  %3481 = vrot.lane.b32.xlu0 %v7836_v24, %s6108_s12  ;;  %v7882_v11 = vld [vmem:[#allocation2 + $0xe1] sm:$0xff]  ;;  %v3200_v25 = vld [vmem:[#allocation2 + $0xf1] sm:$0xff] }
 0x749   : > { %3483 = vrot.lane.b32.xlu1 %v7834_v23, %s6108_s12  ;;  %v3201_v16 = vld [vmem:[#allocation2 + $0xf9] sm:$0xff]  ;;  %v3202_v34 = vld [vmem:[#allocation2 + $0x109] sm:$0xff] }
 0x74a   : > { %v3203_v43 = vld [vmem:[#allocation2 + $0x111] sm:$0xff]  ;;  %v3204_v38 = vld [vmem:[#allocation2 + $0x121] sm:$0xff]  ;;  %5945 = vmatpush3.bf16.msra.mxu1 %v5942_v26  ;;  %v7979_v5 = vpop.permute.xlu1 %4171  ;;  %v7981_v49 = vpop.permute.xlu0 %4169 }
 0x74b   : > { %v3205_v45 = vld [vmem:[#allocation2 + $0x129] sm:$0xff]  ;;  %v3206_v42 = vld [vmem:[#allocation2 + $0x139] sm:$0xff]  ;;  %9275 = vst [vmem:[#allocation3_spill] sm:$0xff] %v7979_v5  ;;  %9276 = vst [vmem:[#allocation4_spill] sm:$0xff] %v7981_v49 }
 0x74c   : > { %3485 = vrot.lane.b32.xlu0 %v7844_v59, %s6108_s12  ;;  %v3207_v54 = vld [vmem:[#allocation2 + $0x141] sm:$0xff]  ;;  %v3208_v32 = vld [vmem:[#allocation2 + $0x151] sm:$0xff] }
 0x74d   : > { %3487 = vrot.lane.b32.xlu1 %v7842_v57, %s6108_s12  ;;  %v3209_v37 = vld [vmem:[#allocation2 + $0x159] sm:$0xff]  ;;  %v3210_v35 = vld [vmem:[#allocation2 + $0x169] sm:$0xff] }
 0x74e   : > { %v3211_v47 = vld [vmem:[#allocation2 + $0x171] sm:$0xff]  ;;  %v3215_v29 = vld [vmem:[#allocation2 + $0x22] sm:$0xff]  ;;  %v3214_v10 = vld [vmem:[#allocation2 + $0x1a] sm:$0xff]  ;;  %v7995_v22 = vpop.permute.xlu1 %4299  ;;  %v7997_v61 = vpop.permute.xlu0 %4297 }
 0x74f   : > { %v3217_v9 = vld [vmem:[#allocation2 + $0x3a] sm:$0xff]  ;;  %v3216_v21 = vld [vmem:[#allocation2 + $0x32] sm:$0xff]  ;;  %v7983_v40 = vld [vmem:[#allocation2 + $0x48] sm:$0xff]  ;;  %9277 = vst [vmem:[#allocation5_spill] sm:$0xff] %v7995_v22 }
 0x750   : > { %3489 = vrot.lane.b32.xlu0 %v7852_v44, %s6108_s12  ;;  %v7906_v6 = vld [vmem:[#allocation2 + $0x20] sm:$0xff]  ;;  %v7908_v30 = vld [vmem:[#allocation2 + $0x18] sm:$0xff]  ;;  %v7938_v13 = vld [vmem:[#allocation2 + $0x30] sm:$0xff]  ;;  %9278 = vst [vmem:[#allocation6_spill] sm:$0xff] %v7997_v61 }
 0x751   : > { %3491 = vrot.lane.b32.xlu1 %v7850_v0, %s6108_s12  ;;  %v4724_v55 = vld [vmem:[%s9190_s2 + $0x38] sm:$0xff]  ;;  %v4725_v62 = vld [vmem:[%s9190_s2 + $0x40] sm:$0xff]  ;;  %v7989_v14 = vld [vmem:[#allocation2 + $0x50] sm:$0xff] }
 0x752   : > { %v5946_v3 = vpack.c.bf16 %v4724_v55, %v4723_v2  ;;  %v7950_v63 = vld [vmem:[#allocation2 + $0x38] sm:$0xff]  ;;  %v3407_v31 = vld [vmem:[#allocation2 + $0x4a] sm:$0xff]  ;;  %v8097_v8 = vld [vmem:[#allocation2 + $0x80] sm:$0xff] }
 0x753   : > { %v8081_v33 = vld [vmem:[#allocation2 + $0x78] sm:$0xff]  ;;  %v8131_v22 = vld [vmem:[#allocation2 + $0x90] sm:$0xff] }
 0x754   : > { %3493 = vrot.lane.b32.xlu0 %v7860_v39, %s6108_s12  ;;  %5947 = vmatprep.subr.bf16.mxu1 %v5946_v3 }
 0x755   : > { %3495 = vrot.lane.b32.xlu1 %v7858_v17, %s6108_s12  ;;  %5949 = vmatpush3.bf16.msra.mxu1 %v5946_v3  ;;  %v3411_v3 = vld [vmem:[#allocation2 + $0x7a] sm:$0xff] }
 0x756   : > { %5868 = vmatprep.subr.mxu1 %v4725_v62 }
 0x758   : > { %3497 = vrot.lane.b32.xlu0 %v7868_v51, %s6108_s12 }
 0x759   : > { %3499 = vrot.lane.b32.xlu1 %v7866_v36, %s6108_s12  ;;  %5869 = vmatpush3.msra.mxu1 %v4725_v62 }
 0x75c   : > { %3501 = vrot.lane.b32.xlu0 %v7876_v53, %s6108_s12 }
 0x75d   : > { %3503 = vrot.lane.b32.xlu1 %v7874_v52, %s6108_s12 }
 0x760   : > { %3505 = vrot.lane.b32.xlu0 %v7884_v20, %s6108_s12 }
 0x761   : > { %3507 = vrot.lane.b32.xlu1 %v7882_v11, %s6108_s12 }
 0x764   : > { %3509 = vrot.lane.b32.xlu0 %v3200_v25, %s6108_s12 }
 0x765   : > { %3511 = vrot.lane.b32.xlu1 %v3201_v16, %s6108_s12 }
 0x768   : > { %3513 = vrot.lane.b32.xlu0 %v3202_v34, %s6108_s12 }
 0x769   : > { %3515 = vrot.lane.b32.xlu1 %v3203_v43, %s6108_s12  ;;  %v8027_v43 = vld [vmem:[#allocation2 + $0x60] sm:$0xff] }
 0x76c   : > { %3517 = vrot.lane.b32.xlu0 %v3204_v38, %s6108_s12 }
 0x76d   : > { %3519 = vrot.lane.b32.xlu1 %v3205_v45, %s6108_s12 }
 0x770   : > { %3521 = vrot.lane.b32.xlu0 %v3206_v42, %s6108_s12 }
 0x771   : > { %3523 = vrot.lane.b32.xlu1 %v3207_v54, %s6108_s12  ;;  %v8043_v54 = vld [vmem:[#allocation2 + $0x68] sm:$0xff] }
 0x774   : > { %3525 = vrot.lane.b32.xlu0 %v3208_v32, %s6108_s12 }
 0x775   : > { %3527 = vrot.lane.b32.xlu1 %v3209_v37, %s6108_s12 }
 0x778   : > { %3529 = vrot.lane.b32.xlu0 %v3210_v35, %s6108_s12  ;;  %v3409_v35 = vld [vmem:[#allocation2 + $0x62] sm:$0xff] }
 0x779   : > { %3531 = vrot.lane.b32.xlu1 %v3211_v47, %s6108_s12 }
 0x77c   : > { %3601 = vrot.lane.b32.xlu0 %v3214_v10, %s6107_s11 }
 0x77d   : > { %3603 = vrot.lane.b32.xlu1 %v3215_v29, %s6107_s11 }
 0x780   : > { %3605 = vrot.lane.b32.xlu0 %v3216_v21, %s6107_s11 }
 0x781   : > { %3607 = vrot.lane.b32.xlu1 %v3217_v9, %s6107_s11 }
 0x784   : > { %3725 = vrot.lane.b32.xlu0 %v7908_v30, %s6109_s13 }
 0x785   : > { %3727 = vrot.lane.b32.xlu1 %v7906_v6, %s6109_s13 }
 0x788   : > { %3853 = vrot.lane.b32.xlu0 %v7820_v15, %s6110_s14 }
 0x789   : > { %3855 = vrot.lane.b32.xlu1 %v7818_v18, %s6110_s14 }
 0x78c   : > { %3981 = vrot.lane.b32.xlu0 %v3214_v10, %s6111_s19 }
 0x78d   : > { %3983 = vrot.lane.b32.xlu1 %v3215_v29, %s6111_s19 }
 0x790   : > { %4109 = vrot.lane.b32.xlu0 %v7938_v13, %s6112_s30 }
 0x791   : > { %3729 = vrot.lane.b32.xlu1 %v7938_v13, %s6109_s13 }
 0x794   : > { %4111 = vrot.lane.b32.xlu0 %v7950_v63, %s6112_s30 }
 0x795   : > { %4237 = vrot.lane.b32.xlu1 %v7828_v19, %s6113_s18 }
 0x798   : > { %3731 = vrot.lane.b32.xlu0 %v7950_v63, %s6109_s13 }
 0x799   : > { %3857 = vrot.lane.b32.xlu1 %v7828_v19, %s6110_s14 }
 0x79c   : > { %4239 = vrot.lane.b32.xlu0 %v7826_v58, %s6113_s18 }
 0x79d   : > { %4365 = vrot.lane.b32.xlu1 %v3216_v21, %s6114_s22 }
 0x7a0   : > { %3859 = vrot.lane.b32.xlu0 %v7826_v58, %s6110_s14 }
 0x7a1   : > { %3985 = vrot.lane.b32.xlu1 %v3216_v21, %s6111_s19  ;;  %v3410_v21 = vld [vmem:[#allocation2 + $0x6a] sm:$0xff] }
 0x7a4   : > { %4367 = vrot.lane.b32.xlu0 %v3217_v9, %s6114_s22 }
 0x7a5   : > { %3987 = vrot.lane.b32.xlu1 %v3217_v9, %s6111_s19 }
 0x7a8   : > { %4113 = vrot.lane.b32.xlu0 %v7983_v40, %s6112_s30 }
 0x7a9   : > { %3733 = vrot.lane.b32.xlu1 %v7983_v40, %s6109_s13 }
 0x7ac   : > { %4115 = vrot.lane.b32.xlu0 %v7989_v14, %s6112_s30 }
 0x7ad   : > { %4241 = vrot.lane.b32.xlu1 %v7836_v24, %s6113_s18 }
 0x7b0   : > { %3735 = vrot.lane.b32.xlu0 %v7989_v14, %s6109_s13 }
 0x7b1   : > { %3861 = vrot.lane.b32.xlu1 %v7836_v24, %s6110_s14  ;;  %v3408_v24 = vld [vmem:[#allocation2 + $0x52] sm:$0xff] }
 0x7b2   : > { %v8005_v60 = vpop.permute.xlu0 %3473 }
 0x7b3   : > { %v8003_v7 = vpop.permute.xlu1 %3475 }
 0x7b4   : > { %4243 = vrot.lane.b32.xlu0 %v7834_v23, %s6113_s18 }
 0x7b5   : > { %4369 = vrot.lane.b32.xlu1 %v3407_v31, %s6114_s22 }
 0x7b6   : > { %v8012_v15 = vpop.permute.xlu0 %3477 }
 0x7b7   : > { %v8010_v18 = vpop.permute.xlu1 %3479 }
 0x7b8   : > { %3863 = vrot.lane.b32.xlu0 %v7834_v23, %s6110_s14 }
 0x7b9   : > { %3989 = vrot.lane.b32.xlu1 %v3407_v31, %s6111_s19 }
 0x7ba   : > { %v8019_v19 = vpop.permute.xlu0 %3481 }
 0x7bb   : > { %v8017_v58 = vpop.permute.xlu1 %3483 }
 0x7bc   : > { %4371 = vrot.lane.b32.xlu0 %v3408_v24, %s6114_s22 }
 0x7bd   : > { %3609 = vrot.lane.b32.xlu1 %v3407_v31, %s6107_s11 }
 0x7be   : > { %v8025_v25 = vpop.permute.xlu0 %3485 }
 0x7bf   : > { %v8023_v16 = vpop.permute.xlu1 %3487 }
 0x7c0   : > { %3991 = vrot.lane.b32.xlu0 %v3408_v24, %s6111_s19 }
 0x7c1   : > { %4117 = vrot.lane.b32.xlu1 %v8027_v43, %s6112_s30 }
 0x7c2   : > { %v8034_v34 = vpop.permute.xlu0 %3489 }
 0x7c3   : > { %v8032_v23 = vpop.permute.xlu1 %3491 }
 0x7c4   : > { %3611 = vrot.lane.b32.xlu0 %v3408_v24, %s6107_s11 }
 0x7c5   : > { %3737 = vrot.lane.b32.xlu1 %v8027_v43, %s6109_s13 }
 0x7c6   : > { %v8041_v38 = vpop.permute.xlu0 %3493 }
 0x7c7   : > { %v8039_v45 = vpop.permute.xlu1 %3495 }
 0x7c8   : > { %4119 = vrot.lane.b32.xlu0 %v8043_v54, %s6112_s30 }
 0x7c9   : > { %4245 = vrot.lane.b32.xlu1 %v7844_v59, %s6113_s18 }
 0x7ca   : > { %v8051_v37 = vpop.permute.xlu0 %3497 }
 0x7cb   : > { %v8049_v42 = vpop.permute.xlu1 %3499 }
 0x7cc   : > { %3739 = vrot.lane.b32.xlu0 %v8043_v54, %s6109_s13 }
 0x7cd   : > { %3865 = vrot.lane.b32.xlu1 %v7844_v59, %s6110_s14 }
 0x7ce   : > { %v8059_v47 = vpop.permute.xlu0 %3501 }
 0x7cf   : > { %v8057_v32 = vpop.permute.xlu1 %3503 }
 0x7d0   : > { %4247 = vrot.lane.b32.xlu0 %v7842_v57, %s6113_s18 }
 0x7d1   : > { %4373 = vrot.lane.b32.xlu1 %v3409_v35, %s6114_s22 }
 0x7d2   : > { %v8066_v10 = vpop.permute.xlu0 %3505 }
 0x7d3   : > { %v8064_v29 = vpop.permute.xlu1 %3507  ;;  %9280 = vst [vmem:[#allocation8_spill] sm:$0xff] %v8066_v10  ;;  %v3414_v10 = vld [vmem:[#allocation2 + $0x9a] sm:$0xff] }
 0x7d4   : > { %9279 = vst [vmem:[#allocation7_spill] sm:$0xff] %v8064_v29  ;;  %3867 = vrot.lane.b32.xlu0 %v7842_v57, %s6110_s14 }
 0x7d5   : > { %3993 = vrot.lane.b32.xlu1 %v3409_v35, %s6111_s19 }
 0x7d6   : > { %v8073_v9 = vpop.permute.xlu0 %3509 }
 0x7d7   : > { %v8071_v59 = vpop.permute.xlu1 %3511  ;;  %9282 = vst [vmem:[#allocation10_spill] sm:$0xff] %v8073_v9 }
 0x7d8   : > { %9281 = vst [vmem:[#allocation9_spill] sm:$0xff] %v8071_v59  ;;  %4375 = vrot.lane.b32.xlu0 %v3410_v21, %s6114_s22  ;;  %v3149_v59 = vld [vmem:[#allocation2 + $0x8] sm:$0xff] }
 0x7d9   : > { %3613 = vrot.lane.b32.xlu1 %v3409_v35, %s6107_s11  ;;  %v3412_v35 = vld [vmem:[#allocation2 + $0x82] sm:$0xff] }
 0x7da   : > { %v8079_v46 = vpop.permute.xlu0 %3513 }
 0x7db   : > { %v8077_v27 = vpop.permute.xlu1 %3515  ;;  %9284 = vst [vmem:[#allocation12_spill] sm:$0xff] %v8079_v46 }
 0x7dc   : > { %9283 = vst [vmem:[#allocation11_spill] sm:$0xff] %v8077_v27  ;;  %3995 = vrot.lane.b32.xlu0 %v3410_v21, %s6111_s19 }
 0x7dd   : > { %4121 = vrot.lane.b32.xlu1 %v8081_v33, %s6112_s30 }
 0x7de   : > { %v8088_v1 = vpop.permute.xlu0 %3517 }
 0x7df   : > { %v8086_v57 = vpop.permute.xlu1 %3519  ;;  %9286 = vst [vmem:[#allocation14_spill] sm:$0xff] %v8088_v1 }
 0x7e0   : > { %9285 = vst [vmem:[#allocation13_spill] sm:$0xff] %v8086_v57  ;;  %3615 = vrot.lane.b32.xlu0 %v3410_v21, %s6107_s11  ;;  %v3413_v57 = vld [vmem:[#allocation2 + $0x92] sm:$0xff] }
 0x7e1   : > { %3741 = vrot.lane.b32.xlu1 %v8081_v33, %s6109_s13 }
 0x7e2   : > { %v8095_v41 = vpop.permute.xlu0 %3521 }
 0x7e3   : > { %v8093_v50 = vpop.permute.xlu1 %3523  ;;  %9288 = vst [vmem:[#allocation20_spill] sm:$0xff] %v8095_v41 }
 0x7e4   : > { %9287 = vst [vmem:[#allocation15_spill] sm:$0xff] %v8093_v50  ;;  %4123 = vrot.lane.b32.xlu0 %v8097_v8, %s6112_s30 }
 0x7e5   : > { %4249 = vrot.lane.b32.xlu1 %v7852_v44, %s6113_s18 }
 0x7e6   : > { %v8105_v26 = vpop.permute.xlu0 %3525 }
 0x7e7   : > { %v8103_v12 = vpop.permute.xlu1 %3527  ;;  %9290 = vst [vmem:[#allocation17_spill] sm:$0xff] %v8105_v26  ;;  %v3148_v26 = vld [vmem:[#allocation2] sm:$0xff] }
 0x7e8   : > { %9289 = vst [vmem:[#allocation16_spill] sm:$0xff] %v8103_v12  ;;  %3743 = vrot.lane.b32.xlu0 %v8097_v8, %s6109_s13 }
 0x7e9   : > { %3869 = vrot.lane.b32.xlu1 %v7852_v44, %s6110_s14 }
 0x7ea   : > { %v8113_v55 = vpop.permute.xlu0 %3529 }
 0x7eb   : > { %v8111_v2 = vpop.permute.xlu1 %3531  ;;  %9292 = vst [vmem:[#allocation19_spill] sm:$0xff] %v8113_v55 }
 0x7ec   : > { %9291 = vst [vmem:[#allocation18_spill] sm:$0xff] %v8111_v2  ;;  %4251 = vrot.lane.b32.xlu0 %v7850_v0, %s6113_s18  ;;  %v8139_v2 = vld [vmem:[#allocation2 + $0x98] sm:$0xff] }
 0x7ed   : > { %4377 = vrot.lane.b32.xlu1 %v3411_v3, %s6114_s22 }
 0x7ee   : > { %v8120_v31 = vpop.permute.xlu0 %3601 }
 0x7ef   : > { %v8118_v62 = vpop.permute.xlu1 %3603 }
 0x7f0   : > { %3871 = vrot.lane.b32.xlu0 %v7850_v0, %s6110_s14 }
 0x7f1   : > { %3997 = vrot.lane.b32.xlu1 %v3411_v3, %s6111_s19 }
 0x7f2   : > { %v8127_v24 = vpop.permute.xlu0 %3605 }
 0x7f3   : > { %v8125_v44 = vpop.permute.xlu1 %3607 }
 0x7f4   : > { %4379 = vrot.lane.b32.xlu0 %v3412_v35, %s6114_s22 }
 0x7f5   : > { %3617 = vrot.lane.b32.xlu1 %v3411_v3, %s6107_s11 }
 0x7f6   : > { %v3726_v61 = vpop.permute.xlu0 %3725 }
 0x7f7   : > { %v3728_v21 = vpop.permute.xlu1 %3727 }
 0x7f8   : > { %3999 = vrot.lane.b32.xlu0 %v3412_v35, %s6111_s19 }
 0x7f9   : > { %4125 = vrot.lane.b32.xlu1 %v8131_v22, %s6112_s30 }
 0x7fa   : > { %v3854_v0 = vpop.permute.xlu0 %3853 }
 0x7fb   : > { %v3856_v5 = vpop.permute.xlu1 %3855 }
 0x7fc   : > { %3619 = vrot.lane.b32.xlu0 %v3412_v35, %s6107_s11  ;;  %v4461_v35 = vsel %vm1631_vm0, %v3148_v26, %v7966_v56 }
 0x7fd   : > { %3745 = vrot.lane.b32.xlu1 %v8131_v22, %s6109_s13  ;;  %v4493_v1 = vsel %vm1664_vm1, %v4461_v35, %v7973_v28  ;;  %v4462_v28 = vsel %vm1631_vm0, %v3149_v59, %v7968_v4  ;;  %v8175_v59 = vld [vmem:[#allocation2 + $0xa8] sm:$0xff] }
 0x7fe   : > { %v3982_v3 = vpop.permute.xlu0 %3981  ;;  %v4525_v27 = vsel %vm1697_vm2, %v4493_v1, %v3726_v61 }
 0x7ff   : > { %v3984_v49 = vpop.permute.xlu1 %3983  ;;  %v4557_v9 = vsel %vm1730_vm3, %v4525_v27, %v3854_v0 }
 0x800   : > { %4127 = vrot.lane.b32.xlu0 %v8139_v2, %s6112_s30  ;;  %v4589_v56 = vsel %vm1763_vm4, %v4557_v9, %v3982_v3  ;;  %v4494_v9 = vsel %vm1664_vm1, %v4462_v28, %v7975_v48  ;;  %v8189_v3 = vld [vmem:[#allocation2 + $0xb0] sm:$0xff] }
 0x801   : > { %4253 = vrot.lane.b32.xlu1 %v7860_v39, %s6113_s18 }
 0x802   : > { %v4110_v12 = vpop.permute.xlu0 %4109 }
 0x803   : > { %v3730_v55 = vpop.permute.xlu1 %3729  ;;  %v4621_v26 = vsel %vm1796_vm5, %v4589_v56, %v4110_v12 }
 0x804   : > { %3747 = vrot.lane.b32.xlu0 %v8139_v2, %s6109_s13 }
 0x805   : > { %3873 = vrot.lane.b32.xlu1 %v7860_v39, %s6110_s14 }
 0x806   : > { %v4112_v41 = vpop.permute.xlu0 %4111 }
 0x807   : > { %v4238_v50 = vpop.permute.xlu1 %4237 }
 0x808   : > { %4255 = vrot.lane.b32.xlu0 %v7858_v17, %s6113_s18  ;;  %v4653_v61 = vsel %vm1829_vm6, %v4621_v26, %v4238_v50  ;;  %v4463_v26 = vsel %vm1631_vm0, %v7908_v30, %v8005_v60 }
 0x809   : > { %4381 = vrot.lane.b32.xlu1 %v3413_v57, %s6114_s22 }
 0x80a   : > { %v8157_v46 = vpop.permute.xlu0 %3731 }
 0x80b   : > { %v3858_v39 = vpop.permute.xlu1 %3857 }
 0x80c   : > { %3875 = vrot.lane.b32.xlu0 %v7858_v17, %s6110_s14  ;;  %v4526_v17 = vsel %vm1697_vm2, %v4494_v9, %v3728_v21  ;;  %v3415_v9 = vld [vmem:[#allocation2 + $0xaa] sm:$0xff] }
 0x80d   : > { %4001 = vrot.lane.b32.xlu1 %v3413_v57, %s6111_s19  ;;  %v4558_v50 = vsel %vm1730_vm3, %v4526_v17, %v3856_v5 }
 0x80e   : > { %v4240_v35 = vpop.permute.xlu0 %4239  ;;  %v4590_v12 = vsel %vm1763_vm4, %v4558_v50, %v3984_v49 }
 0x80f   : > { %v4366_v1 = vpop.permute.xlu1 %4365 }
 0x810   : > { %v4685_v29 = vsel %vm1862_vm7, %v4653_v61, %v4366_v1  ;;  %4383 = vrot.lane.b32.xlu0 %v3414_v10, %s6114_s22 }
 0x811   : > { %3621 = vrot.lane.b32.xlu1 %v3413_v57, %s6107_s11  ;;  %5870 = vmatprep.mubr.msk.f32.mxu1 %vm1904_vm8, %v4685_v29  ;;  %v4622_v57 = vsel %vm1796_vm5, %v4590_v12, %v4112_v41 }
 0x812   : > { %v3860_v4 = vpop.permute.xlu0 %3859  ;;  %v4654_v48 = vsel %vm1829_vm6, %v4622_v57, %v4240_v35 }
 0x813   : > { %v3986_v27 = vpop.permute.xlu1 %3985 }
 0x814   : > { %4003 = vrot.lane.b32.xlu0 %v3414_v10, %s6111_s19 }
 0x815   : > { %4129 = vrot.lane.b32.xlu1 %v8175_v59, %s6112_s30 }
 0x816   : > { %v4368_v0 = vpop.permute.xlu0 %4367 }
 0x817   : > { %v3988_v29 = vpop.permute.xlu1 %3987  ;;  %v4686_v21 = vsel %vm1862_vm7, %v4654_v48, %v4368_v0  ;;  %v3416_v0 = vld [vmem:[#allocation2 + $0xb2] sm:$0xff] }
 0x818   : > { %3623 = vrot.lane.b32.xlu0 %v3414_v10, %s6107_s11  ;;  %5871 = vmatmul.mubr.msk.f32.vlgmr.msra.gmra.mrb[4].mxu1 %vm1904_vm8, %v4686_v21  ;;  %v4495_v10 = vsel %vm1664_vm1, %v4463_v26, %v8120_v31  ;;  %v8246_v26 = vld [vmem:[#allocation2 + $0xc8] sm:$0xff] }
 0x819   : > { %3749 = vrot.lane.b32.xlu1 %v8175_v59, %s6109_s13  ;;  %v4527_v28 = vsel %vm1697_vm2, %v4495_v10, %v3730_v55 }
 0x81a   : > { %v4114_v49 = vpop.permute.xlu0 %4113  ;;  %v4559_v35 = vsel %vm1730_vm3, %v4527_v28, %v3858_v39  ;;  %v4464_v39 = vsel %vm1631_vm0, %v7906_v6, %v8003_v7 }
 0x81b   : > { %v3734_v5 = vpop.permute.xlu1 %3733  ;;  %v4591_v17 = vsel %vm1763_vm4, %v4559_v35, %v3986_v27  ;;  %v4496_v27 = vsel %vm1664_vm1, %v4464_v39, %v8118_v62  ;;  %v4465_v35 = vsel %vm1631_vm0, %v7938_v13, %v8012_v15 }
 0x81c   : > { %4131 = vrot.lane.b32.xlu0 %v8189_v3, %s6112_s30  ;;  %v4528_v50 = vsel %vm1697_vm2, %v4496_v27, %v8157_v46 }
 0x81d   : > { %4257 = vrot.lane.b32.xlu1 %v7868_v51, %s6113_s18  ;;  %v4560_v48 = vsel %vm1730_vm3, %v4528_v50, %v3860_v4 }
 0x81e   : > { %v4116_v56 = vpop.permute.xlu0 %4115  ;;  %v4592_v6 = vsel %vm1763_vm4, %v4560_v48, %v3988_v29 }
 0x81f   : > { %v4242_v41 = vpop.permute.xlu1 %4241 }
 0x820   : > { %3751 = vrot.lane.b32.xlu0 %v8189_v3, %s6109_s13 }
 0x821   : > { %3877 = vrot.lane.b32.xlu1 %v7868_v51, %s6110_s14  ;;  %v4623_v51 = vsel %vm1796_vm5, %v4591_v17, %v4114_v49  ;;  %v8234_v49 = vld [vmem:[#allocation2 + $0xc0] sm:$0xff] }
 0x822   : > { %v8205_v1 = vpop.permute.xlu0 %3735  ;;  %v4655_v30 = vsel %vm1829_vm6, %v4623_v51, %v4242_v41 }
 0x823   : > { %v3862_v61 = vpop.permute.xlu1 %3861 }
 0x824   : > { %4259 = vrot.lane.b32.xlu0 %v7866_v36, %s6113_s18 }
 0x825   : > { %4385 = vrot.lane.b32.xlu1 %v3415_v9, %s6114_s22 }
 0x826   : > { %v4244_v31 = vpop.permute.xlu0 %4243 }
 0x827   : > { %v4370_v60 = vpop.permute.xlu1 %4369 }
 0x828   : > { %v4687_v55 = vsel %vm1862_vm7, %v4655_v30, %v4370_v60  ;;  %3879 = vrot.lane.b32.xlu0 %v7866_v36, %s6110_s14  ;;  %v4624_v36 = vsel %vm1796_vm5, %v4592_v6, %v4116_v56 }
 0x829   : > { %4005 = vrot.lane.b32.xlu1 %v3415_v9, %s6111_s19  ;;  %5873 = vmatprep.mubr.msk.f32.mxu1 %vm1904_vm8, %v4687_v55  ;;  %v4656_v7 = vsel %vm1829_vm6, %v4624_v36, %v4244_v31  ;;  %v3417_v31 = vld [vmem:[#allocation2 + $0xc2] sm:$0xff]  ;;  %v8291_v36 = vld [vmem:[#allocation2 + $0xd8] sm:$0xff] }
 0x82a   : > { %v3864_v57 = vpop.permute.xlu0 %3863 }
 0x82b   : > { %v3990_v12 = vpop.permute.xlu1 %3989 }
 0x82c   : > { %4387 = vrot.lane.b32.xlu0 %v3416_v0, %s6114_s22 }
 0x82d   : > { %3625 = vrot.lane.b32.xlu1 %v3415_v9, %s6107_s11  ;;  %v4497_v9 = vsel %vm1664_vm1, %v4465_v35, %v8127_v24 }
 0x82e   : > { %v4372_v21 = vpop.permute.xlu0 %4371  ;;  %v4529_v17 = vsel %vm1697_vm2, %v4497_v9, %v3734_v5 }
 0x82f   : > { %v8232_v62 = vpop.permute.xlu1 %3609  ;;  %v4688_v46 = vsel %vm1862_vm7, %v4656_v7, %v4372_v21  ;;  %v4561_v60 = vsel %vm1730_vm3, %v4529_v17, %v3862_v61  ;;  %v4466_v61 = vsel %vm1631_vm0, %v7950_v63, %v8010_v18 }
 0x830   : > { %4007 = vrot.lane.b32.xlu0 %v3416_v0, %s6111_s19  ;;  %5874 = vmatmul.mubr.msk.f32.gmra.mrb[6].mxu1 %vm1904_vm8, %v4688_v46  ;;  %v4593_v55 = vsel %vm1763_vm4, %v4561_v60, %v3990_v12  ;;  %v4498_v39 = vsel %vm1664_vm1, %v4466_v61, %v8125_v44 }
 0x831   : > { %4133 = vrot.lane.b32.xlu1 %v8234_v49, %s6112_s30  ;;  %v4530_v27 = vsel %vm1697_vm2, %v4498_v39, %v8205_v1  ;;  %v3420_v39 = vld [vmem:[#allocation2 + $0xe2] sm:$0xff] }
 0x832   : > { %v3992_v29 = vpop.permute.xlu0 %3991  ;;  %v4562_v48 = vsel %vm1730_vm3, %v4530_v27, %v3864_v57 }
 0x833   : > { %v4118_v4 = vpop.permute.xlu1 %4117  ;;  %v4594_v63 = vsel %vm1763_vm4, %v4562_v48, %v3992_v29 }
 0x834   : > { %3627 = vrot.lane.b32.xlu0 %v3416_v0, %s6107_s11  ;;  %v3418_v0 = vld [vmem:[#allocation2 + $0xca] sm:$0xff] }
 0x835   : > { %3753 = vrot.lane.b32.xlu1 %v8234_v49, %s6109_s13 }
 0x836   : > { %v8244_v56 = vpop.permute.xlu0 %3611 }
 0x837   : > { %v3738_v41 = vpop.permute.xlu1 %3737 }
 0x838   : > { %4135 = vrot.lane.b32.xlu0 %v8246_v26, %s6112_s30 }
 0x839   : > { %4261 = vrot.lane.b32.xlu1 %v7876_v53, %s6113_s18 }
 0x83a   : > { %v4120_v28 = vpop.permute.xlu0 %4119 }
 0x83b   : > { %v4246_v10 = vpop.permute.xlu1 %4245 }
 0x83c   : > { %3755 = vrot.lane.b32.xlu0 %v8246_v26, %s6109_s13 }
 0x83d   : > { %3881 = vrot.lane.b32.xlu1 %v7876_v53, %s6110_s14  ;;  %v4625_v53 = vsel %vm1796_vm5, %v4593_v55, %v4118_v4  ;;  %v8305_v4 = vld [vmem:[#allocation2 + $0xe0] sm:$0xff] }
 0x83e   : > { %v8262_v30 = vpop.permute.xlu0 %3739  ;;  %v4657_v13 = vsel %vm1829_vm6, %v4625_v53, %v4246_v10  ;;  %v3419_v55 = vld [vmem:[#allocation2 + $0xda] sm:$0xff] }
 0x83f   : > { %v3866_v51 = vpop.permute.xlu1 %3865 }
 0x840   : > { %4263 = vrot.lane.b32.xlu0 %v7874_v52, %s6113_s18 }
 0x841   : > { %4389 = vrot.lane.b32.xlu1 %v3417_v31, %s6114_s22 }
 0x842   : > { %v4248_v24 = vpop.permute.xlu0 %4247 }
 0x843   : > { %v4374_v15 = vpop.permute.xlu1 %4373 }
 0x844   : > { %v4689_v5 = vsel %vm1862_vm7, %v4657_v13, %v4374_v15  ;;  %3883 = vrot.lane.b32.xlu0 %v7874_v52, %s6110_s14  ;;  %v4626_v52 = vsel %vm1796_vm5, %v4594_v63, %v4120_v28  ;;  %v4467_v28 = vsel %vm1631_vm0, %v7983_v40, %v8019_v19 }
 0x845   : > { %4009 = vrot.lane.b32.xlu1 %v3417_v31, %s6111_s19  ;;  %5876 = vmatprep.mubr.msk.f32.mxu1 %vm1904_vm8, %v4689_v5  ;;  %v4658_v18 = vsel %vm1829_vm6, %v4626_v52, %v4248_v24  ;;  %v4499_v35 = vsel %vm1664_vm1, %v4467_v28, %v8232_v62  ;;  %v8364_v52 = vld [vmem:[#allocation2 + $0xf8] sm:$0xff] }
 0x846   : > { %v3868_v12 = vpop.permute.xlu0 %3867  ;;  %v4531_v9 = vsel %vm1697_vm2, %v4499_v35, %v3738_v41 }
 0x847   : > { %v3994_v50 = vpop.permute.xlu1 %3993 }
 0x848   : > { %4391 = vrot.lane.b32.xlu0 %v3418_v0, %s6114_s22 }
 0x849   : > { %3629 = vrot.lane.b32.xlu1 %v3417_v31, %s6107_s11  ;;  %v4563_v31 = vsel %vm1730_vm3, %v4531_v9, %v3866_v51  ;;  %v4468_v51 = vsel %vm1631_vm0, %v7989_v14, %v8017_v58  ;;  %v3421_v9 = vld [vmem:[#allocation2 + $0xf2] sm:$0xff] }
 0x84a   : > { %v4376_v6 = vpop.permute.xlu0 %4375  ;;  %v4595_v53 = vsel %vm1763_vm4, %v4563_v31, %v3994_v50  ;;  %v4500_v13 = vsel %vm1664_vm1, %v4468_v51, %v8244_v56  ;;  %v8350_v50 = vld [vmem:[#allocation2 + $0xf0] sm:$0xff]  ;;  %v3390_v31 = vld [vmem:[#allocation2 + $0xf9] sm:$0xff] }
 0x84b   : > { %v8289_v44 = vpop.permute.xlu1 %3613  ;;  %v4690_v1 = vsel %vm1862_vm7, %v4658_v18, %v4376_v6  ;;  %v4532_v15 = vsel %vm1697_vm2, %v4500_v13, %v8262_v30  ;;  %v3389_v18 = vld [vmem:[#allocation2 + $0xf1] sm:$0xff]  ;;  %v3422_v51 = vld [vmem:[#allocation2 + $0xfa] sm:$0xff] }
 0x84c   : > { %4011 = vrot.lane.b32.xlu0 %v3418_v0, %s6111_s19  ;;  %5877 = vmatmul.mubr.msk.f32.gmra.mrb[8].mxu1 %vm1904_vm8, %v4690_v1  ;;  %v4564_v61 = vsel %vm1730_vm3, %v4532_v15, %v3868_v12 }
 0x84d   : > { %4137 = vrot.lane.b32.xlu1 %v8291_v36, %s6112_s30 }
 0x84e   : > { %v3996_v7 = vpop.permute.xlu0 %3995 }
 0x84f   : > { %v4122_v57 = vpop.permute.xlu1 %4121  ;;  %v4596_v14 = vsel %vm1763_vm4, %v4564_v61, %v3996_v7 }
 0x850   : > { %3631 = vrot.lane.b32.xlu0 %v3418_v0, %s6107_s11 }
 0x851   : > { %3757 = vrot.lane.b32.xlu1 %v8291_v36, %s6109_s13 }
 0x852   : > { %v8303_v46 = vpop.permute.xlu0 %3615 }
 0x853   : > { %v8301_v21 = vpop.permute.xlu1 %3741 }
 0x854   : > { %4139 = vrot.lane.b32.xlu0 %v8305_v4, %s6112_s30 }
 0x855   : > { %4265 = vrot.lane.b32.xlu1 %v7884_v20, %s6113_s18 }
 0x856   : > { %v4124_v10 = vpop.permute.xlu0 %4123 }
 0x857   : > { %v4250_v29 = vpop.permute.xlu1 %4249 }
 0x858   : > { %3759 = vrot.lane.b32.xlu0 %v8305_v4, %s6109_s13 }
 0x859   : > { %3885 = vrot.lane.b32.xlu1 %v7884_v20, %s6110_s14  ;;  %v4627_v20 = vsel %vm1796_vm5, %v4595_v53, %v4122_v57  ;;  %v4469_v57 = vsel %vm1631_vm0, %v8027_v43, %v8025_v25 }
 0x85a   : > { %v8321_v60 = vpop.permute.xlu0 %3743  ;;  %v4659_v40 = vsel %vm1829_vm6, %v4627_v20, %v4250_v29  ;;  %v4501_v7 = vsel %vm1664_vm1, %v4469_v57, %v8289_v44 }
 0x85b   : > { %v3870_v17 = vpop.permute.xlu1 %3869  ;;  %v4533_v29 = vsel %vm1697_vm2, %v4501_v7, %v8301_v21  ;;  %v3423_v7 = vld [vmem:[#allocation2 + $0x10a] sm:$0xff] }
 0x85c   : > { %4267 = vrot.lane.b32.xlu0 %v7882_v11, %s6113_s18  ;;  %v4565_v35 = vsel %vm1730_vm3, %v4533_v29, %v3870_v17  ;;  %v4470_v17 = vsel %vm1631_vm0, %v8043_v54, %v8023_v16  ;;  %v3392_v29 = vld [vmem:[#allocation2 + $0x111] sm:$0xff] }
 0x85d   : > { %4393 = vrot.lane.b32.xlu1 %v3419_v55, %s6114_s22  ;;  %v4502_v20 = vsel %vm1664_vm1, %v4470_v17, %v8303_v46 }
 0x85e   : > { %v4252_v62 = vpop.permute.xlu0 %4251 }
 0x85f   : > { %v4378_v19 = vpop.permute.xlu1 %4377 }
 0x860   : > { %v4691_v41 = vsel %vm1862_vm7, %v4659_v40, %v4378_v19  ;;  %3887 = vrot.lane.b32.xlu0 %v7882_v11, %s6110_s14  ;;  %v4628_v11 = vsel %vm1796_vm5, %v4596_v14, %v4124_v10  ;;  %v4534_v40 = vsel %vm1697_vm2, %v4502_v20, %v8321_v60  ;;  %v8462_v20 = vld [vmem:[#allocation2 + $0x120] sm:$0xff] }
 0x861   : > { %4013 = vrot.lane.b32.xlu1 %v3419_v55, %s6111_s19  ;;  %5879 = vmatprep.mubr.msk.f32.mxu1 %vm1904_vm8, %v4691_v41  ;;  %v4660_v58 = vsel %vm1829_vm6, %v4628_v11, %v4252_v62  ;;  %v8420_v11 = vld [vmem:[#allocation2 + $0x110] sm:$0xff] }
 0x862   : > { %v3872_v5 = vpop.permute.xlu0 %3871 }
 0x863   : > { %v3998_v24 = vpop.permute.xlu1 %3997  ;;  %v4566_v41 = vsel %vm1730_vm3, %v4534_v40, %v3872_v5 }
 0x864   : > { %4395 = vrot.lane.b32.xlu0 %v3420_v39, %s6114_s22  ;;  %v4597_v25 = vsel %vm1763_vm4, %v4565_v35, %v3998_v24  ;;  %v8406_v24 = vld [vmem:[#allocation2 + $0x108] sm:$0xff] }
 0x865   : > { %3633 = vrot.lane.b32.xlu1 %v3419_v55, %s6107_s11 }
 0x866   : > { %v4380_v27 = vpop.permute.xlu0 %4379 }
 0x867   : > { %v8348_v56 = vpop.permute.xlu1 %3617  ;;  %v4692_v30 = vsel %vm1862_vm7, %v4660_v58, %v4380_v27  ;;  %v3391_v58 = vld [vmem:[#allocation2 + $0x109] sm:$0xff] }
 0x868   : > { %4015 = vrot.lane.b32.xlu0 %v3420_v39, %s6111_s19  ;;  %5880 = vmatmul.mubr.msk.f32.gmra.mrb[10].mxu1 %vm1904_vm8, %v4692_v30 }
 0x869   : > { %4141 = vrot.lane.b32.xlu1 %v8350_v50, %s6112_s30 }
 0x86a   : > { %v4000_v48 = vpop.permute.xlu0 %3999 }
 0x86b   : > { %v4126_v12 = vpop.permute.xlu1 %4125  ;;  %v4598_v13 = vsel %vm1763_vm4, %v4566_v41, %v4000_v48 }
 0x86c   : > { %3635 = vrot.lane.b32.xlu0 %v3420_v39, %s6107_s11  ;;  %v4629_v43 = vsel %vm1796_vm5, %v4597_v25, %v4126_v12  ;;  %v4471_v12 = vsel %vm1631_vm0, %v8081_v33, %v8034_v34 }
 0x86d   : > { %3761 = vrot.lane.b32.xlu1 %v8350_v50, %s6109_s13  ;;  %v4503_v48 = vsel %vm1664_vm1, %v4471_v12, %v8348_v56  ;;  %v3394_v12 = vld [vmem:[#allocation2 + $0x129] sm:$0xff] }
 0x86e   : > { %v8362_v63 = vpop.permute.xlu0 %3619 }
 0x86f   : > { %v8360_v0 = vpop.permute.xlu1 %3745 }
 0x870   : > { %4143 = vrot.lane.b32.xlu0 %v8364_v52, %s6112_s30 }
 0x871   : > { %4269 = vrot.lane.b32.xlu1 %v3389_v18, %s6113_s18 }
 0x872   : > { %v4128_v1 = vpop.permute.xlu0 %4127 }
 0x873   : > { %v4254_v6 = vpop.permute.xlu1 %4253  ;;  %v4630_v16 = vsel %vm1796_vm5, %v4598_v13, %v4128_v1  ;;  %v3393_v13 = vld [vmem:[#allocation2 + $0x121] sm:$0xff] }
 0x874   : > { %3763 = vrot.lane.b32.xlu0 %v8364_v52, %s6109_s13  ;;  %v4661_v44 = vsel %vm1829_vm6, %v4629_v43, %v4254_v6 }
 0x875   : > { %3889 = vrot.lane.b32.xlu1 %v3389_v18, %s6110_s14  ;;  %v4535_v18 = vsel %vm1697_vm2, %v4503_v48, %v8360_v0 }
 0x876   : > { %v8379_v28 = vpop.permute.xlu0 %3747 }
 0x877   : > { %v3874_v10 = vpop.permute.xlu1 %3873 }
 0x878   : > { %4271 = vrot.lane.b32.xlu0 %v3390_v31, %s6113_s18  ;;  %v4567_v57 = vsel %vm1730_vm3, %v4535_v18, %v3874_v10  ;;  %v4472_v10 = vsel %vm1631_vm0, %v8097_v8, %v8032_v23 }
 0x879   : > { %4397 = vrot.lane.b32.xlu1 %v3421_v9, %s6114_s22 }
 0x87a   : > { %v4256_v53 = vpop.permute.xlu0 %4255 }
 0x87b   : > { %v4382_v55 = vpop.permute.xlu1 %4381  ;;  %v4662_v54 = vsel %vm1829_vm6, %v4630_v16, %v4256_v53  ;;  %v3424_v53 = vld [vmem:[#allocation2 + $0x112] sm:$0xff] }
 0x87c   : > { %v4693_v21 = vsel %vm1862_vm7, %v4661_v44, %v4382_v55  ;;  %3891 = vrot.lane.b32.xlu0 %v3390_v31, %s6110_s14  ;;  %v4504_v31 = vsel %vm1664_vm1, %v4472_v10, %v8362_v63 }
 0x87d   : > { %4017 = vrot.lane.b32.xlu1 %v3421_v9, %s6111_s19  ;;  %5882 = vmatprep.mubr.msk.f32.mxu1 %vm1904_vm8, %v4693_v21  ;;  %v4536_v25 = vsel %vm1697_vm2, %v4504_v31, %v8379_v28 }
 0x87e   : > { %v3876_v62 = vpop.permute.xlu0 %3875 }
 0x87f   : > { %v4002_v19 = vpop.permute.xlu1 %4001  ;;  %v4568_v55 = vsel %vm1730_vm3, %v4536_v25, %v3876_v62 }
 0x880   : > { %4399 = vrot.lane.b32.xlu0 %v3422_v51, %s6114_s22  ;;  %v4599_v34 = vsel %vm1763_vm4, %v4567_v57, %v4002_v19 }
 0x881   : > { %3637 = vrot.lane.b32.xlu1 %v3421_v9, %s6107_s11 }
 0x882   : > { %v4384_v15 = vpop.permute.xlu0 %4383 }
 0x883   : > { %v8404_v46 = vpop.permute.xlu1 %3621  ;;  %v4694_v60 = vsel %vm1862_vm7, %v4662_v54, %v4384_v15  ;;  %v4473_v15 = vsel %vm1631_vm0, %v8131_v22, %v8041_v38 }
 0x884   : > { %4019 = vrot.lane.b32.xlu0 %v3422_v51, %s6111_s19  ;;  %5883 = vmatmul.mubr.msk.f32.gmra.mrb[12].mxu1 %vm1904_vm8, %v4694_v60  ;;  %v4505_v60 = vsel %vm1664_vm1, %v4473_v15, %v8404_v46 }
 0x885   : > { %4145 = vrot.lane.b32.xlu1 %v8406_v24, %s6112_s30 }
 0x886   : > { %v4004_v61 = vpop.permute.xlu0 %4003 }
 0x887   : > { %v4130_v5 = vpop.permute.xlu1 %4129  ;;  %v4600_v21 = vsel %vm1763_vm4, %v4568_v55, %v4004_v61  ;;  %v3395_v55 = vld [vmem:[#allocation2 + $0x139] sm:$0xff] }
 0x888   : > { %3639 = vrot.lane.b32.xlu0 %v3422_v51, %s6107_s11  ;;  %v4631_v33 = vsel %vm1796_vm5, %v4599_v34, %v4130_v5  ;;  %v8476_v51 = vld [vmem:[#allocation2 + $0x128] sm:$0xff] }
 0x889   : > { %3765 = vrot.lane.b32.xlu1 %v8406_v24, %s6109_s13 }
 0x88a   : > { %v8418_v14 = vpop.permute.xlu0 %3623 }
 0x88b   : > { %v8416_v39 = vpop.permute.xlu1 %3749 }
 0x88c   : > { %4147 = vrot.lane.b32.xlu0 %v8420_v11, %s6112_s30  ;;  %v4537_v5 = vsel %vm1697_vm2, %v4505_v60, %v8416_v39  ;;  %v4476_v60 = vsel %vm1631_vm0, %v8189_v3, %v8049_v42 }
 0x88d   : > { %4273 = vrot.lane.b32.xlu1 %v3391_v58, %s6113_s18 }
 0x88e   : > { %v4132_v30 = vpop.permute.xlu0 %4131 }
 0x88f   : > { %v4258_v27 = vpop.permute.xlu1 %4257  ;;  %v4632_v23 = vsel %vm1796_vm5, %v4600_v21, %v4132_v30  ;;  %v3425_v30 = vld [vmem:[#allocation2 + $0x122] sm:$0xff] }
 0x890   : > { %3767 = vrot.lane.b32.xlu0 %v8420_v11, %s6109_s13  ;;  %v4663_v56 = vsel %vm1829_vm6, %v4631_v33, %v4258_v27 }
 0x891   : > { %3893 = vrot.lane.b32.xlu1 %v3391_v58, %s6110_s14 }
 0x892   : > { %v8435_v1 = vpop.permute.xlu0 %3751 }
 0x893   : > { %v3878_v6 = vpop.permute.xlu1 %3877 }
 0x894   : > { %4275 = vrot.lane.b32.xlu0 %v3392_v29, %s6113_s18  ;;  %v4569_v27 = vsel %vm1730_vm3, %v4537_v5, %v3878_v6  ;;  %v4474_v6 = vsel %vm1631_vm0, %v8139_v2, %v8039_v45 }
 0x895   : > { %4401 = vrot.lane.b32.xlu1 %v3423_v7, %s6114_s22  ;;  %v4506_v57 = vsel %vm1664_vm1, %v4474_v6, %v8418_v14 }
 0x896   : > { %v4260_v9 = vpop.permute.xlu0 %4259 }
 0x897   : > { %v4386_v35 = vpop.permute.xlu1 %4385  ;;  %v4664_v8 = vsel %vm1829_vm6, %v4632_v23, %v4260_v9  ;;  %v4475_v23 = vsel %vm1631_vm0, %v8175_v59, %v8051_v37 }
 0x898   : > { %v4695_v0 = vsel %vm1862_vm7, %v4663_v56, %v4386_v35  ;;  %3895 = vrot.lane.b32.xlu0 %v3392_v29, %s6110_s14  ;;  %v3426_v56 = vld [vmem:[#allocation2 + $0x12a] sm:$0xff] }
 0x899   : > { %4021 = vrot.lane.b32.xlu1 %v3423_v7, %s6111_s19  ;;  %5885 = vmatprep.mubr.msk.f32.mxu1 %vm1904_vm8, %v4695_v0  ;;  %v8518_v0 = vld [vmem:[#allocation2 + $0x138] sm:$0xff] }
 0x89a   : > { %v3880_v44 = vpop.permute.xlu0 %3879 }
 0x89b   : > { %v4006_v43 = vpop.permute.xlu1 %4005 }
 0x89c   : > { %4403 = vrot.lane.b32.xlu0 %v3424_v53, %s6114_s22  ;;  %v4601_v22 = vsel %vm1763_vm4, %v4569_v27, %v4006_v43 }
 0x89d   : > { %3641 = vrot.lane.b32.xlu1 %v3423_v7, %s6107_s11  ;;  %v4538_v7 = vsel %vm1697_vm2, %v4506_v57, %v8435_v1 }
 0x89e   : > { %v4388_v17 = vpop.permute.xlu0 %4387  ;;  %v4570_v33 = vsel %vm1730_vm3, %v4538_v7, %v3880_v44  ;;  %v8532_v44 = vld [vmem:[#allocation2 + $0x140] sm:$0xff]  ;;  %v3397_v7 = vld [vmem:[#allocation2 + $0x151] sm:$0xff] }
 0x89f   : > { %v8460_v63 = vpop.permute.xlu1 %3625  ;;  %v4696_v28 = vsel %vm1862_vm7, %v4664_v8, %v4388_v17 }
 0x8a0   : > { %4023 = vrot.lane.b32.xlu0 %v3424_v53, %s6111_s19  ;;  %5886 = vmatmul.mubr.msk.f32.gmra.mrb[14].mxu1 %vm1904_vm8, %v4696_v28  ;;  %v4507_v8 = vsel %vm1664_vm1, %v4475_v23, %v8460_v63 }
 0x8a1   : > { %4149 = vrot.lane.b32.xlu1 %v8462_v20, %s6112_s30 }
 0x8a2   : > { %v4008_v19 = vpop.permute.xlu0 %4007 }
 0x8a3   : > { %v4134_v40 = vpop.permute.xlu1 %4133  ;;  %v4602_v35 = vsel %vm1763_vm4, %v4570_v33, %v4008_v19 }
 0x8a4   : > { %3643 = vrot.lane.b32.xlu0 %v3424_v53, %s6107_s11  ;;  %v4633_v38 = vsel %vm1796_vm5, %v4601_v22, %v4134_v40  ;;  %v3428_v22 = vld [vmem:[#allocation2 + $0x142] sm:$0xff] }
 0x8a5   : > { %3769 = vrot.lane.b32.xlu1 %v8462_v20, %s6109_s13 }
 0x8a6   : > { %v8474_v41 = vpop.permute.xlu0 %3627 }
 0x8a7   : > { %v8472_v62 = vpop.permute.xlu1 %3753  ;;  %v4508_v5 = vsel %vm1664_vm1, %v4476_v60, %v8474_v41  ;;  %v3367_v60 = vld [vmem:[#allocation2 + $0x168] sm:$0xff] }
 0x8a8   : > { %4151 = vrot.lane.b32.xlu0 %v8476_v51, %s6112_s30  ;;  %v4539_v17 = vsel %vm1697_vm2, %v4507_v8, %v8472_v62 }
 0x8a9   : > { %4277 = vrot.lane.b32.xlu1 %v3393_v13, %s6113_s18 }
 0x8aa   : > { %v4136_v54 = vpop.permute.xlu0 %4135 }
 0x8ab   : > { %v4262_v16 = vpop.permute.xlu1 %4261  ;;  %v4634_v45 = vsel %vm1796_vm5, %v4602_v35, %v4136_v54 }
 0x8ac   : > { %3771 = vrot.lane.b32.xlu0 %v8476_v51, %s6109_s13  ;;  %v4665_v46 = vsel %vm1829_vm6, %v4633_v38, %v4262_v16  ;;  %v3396_v16 = vld [vmem:[#allocation2 + $0x141] sm:$0xff] }
 0x8ad   : > { %3897 = vrot.lane.b32.xlu1 %v3393_v13, %s6110_s14  ;;  %v3427_v13 = vld [vmem:[#allocation2 + $0x13a] sm:$0xff] }
 0x8ae   : > { %v8491_v58 = vpop.permute.xlu0 %3755 }
 0x8af   : > { %v3882_v61 = vpop.permute.xlu1 %3881 }
 0x8b0   : > { %4279 = vrot.lane.b32.xlu0 %v3394_v12, %s6113_s18  ;;  %v4571_v19 = vsel %vm1730_vm3, %v4539_v17, %v3882_v61  ;;  %v4540_v61 = vsel %vm1697_vm2, %v4508_v5, %v8491_v58 }
 0x8b1   : > { %4405 = vrot.lane.b32.xlu1 %v3425_v30, %s6114_s22 }
 0x8b2   : > { %v4264_v18 = vpop.permute.xlu0 %4263 }
 0x8b3   : > { %v4390_v48 = vpop.permute.xlu1 %4389  ;;  %v4666_v2 = vsel %vm1829_vm6, %v4634_v45, %v4264_v18 }
 0x8b4   : > { %v4697_v39 = vsel %vm1862_vm7, %v4665_v46, %v4390_v48  ;;  %3899 = vrot.lane.b32.xlu0 %v3394_v12, %s6110_s14  ;;  %v3365_v48 = vld [vmem:[#allocation2 + $0x150] sm:$0xff] }
 0x8b5   : > { %4025 = vrot.lane.b32.xlu1 %v3425_v30, %s6111_s19  ;;  %5888 = vmatprep.mubr.msk.f32.mxu1 %vm1904_vm8, %v4697_v39 }
 0x8b6   : > { %v3884_v34 = vpop.permute.xlu0 %3883 }
 0x8b7   : > { %v4010_v29 = vpop.permute.xlu1 %4009  ;;  %v4572_v12 = vsel %vm1730_vm3, %v4540_v61, %v3884_v34 }
 0x8b8   : > { %4407 = vrot.lane.b32.xlu0 %v3426_v56, %s6114_s22  ;;  %v4603_v37 = vsel %vm1763_vm4, %v4571_v19, %v4010_v29  ;;  %v3366_v29 = vld [vmem:[#allocation2 + $0x158] sm:$0xff] }
 0x8b9   : > { %3645 = vrot.lane.b32.xlu1 %v3425_v30, %s6107_s11 }
 0x8ba   : > { %v4392_v9 = vpop.permute.xlu0 %4391 }
 0x8bb   : > { %v8516_v14 = vpop.permute.xlu1 %3629  ;;  %v4698_v1 = vsel %vm1862_vm7, %v4666_v2, %v4392_v9 }
 0x8bc   : > { %4027 = vrot.lane.b32.xlu0 %v3426_v56, %s6111_s19  ;;  %5889 = vmatmul.mubr.msk.f32.gmra.mrb[16].mxu1 %vm1904_vm8, %v4698_v1 }
 0x8bd   : > { %4153 = vrot.lane.b32.xlu1 %v8518_v0, %s6112_s30 }
 0x8be   : > { %v4012_v31 = vpop.permute.xlu0 %4011 }
 0x8bf   : > { %v4138_v10 = vpop.permute.xlu1 %4137  ;;  %v4604_v38 = vsel %vm1763_vm4, %v4572_v12, %v4012_v31  ;;  %v3398_v31 = vld [vmem:[#allocation2 + $0x159] sm:$0xff]  ;;  %v3399_v12 = vld [vmem:[#allocation2 + $0x169] sm:$0xff] }
 0x8c0   : > { %3647 = vrot.lane.b32.xlu0 %v3426_v56, %s6107_s11  ;;  %v4635_v59 = vsel %vm1796_vm5, %v4603_v37, %v4138_v10  ;;  %v4477_v56 = vsel %vm1631_vm0, %v8234_v49, %v8059_v47  ;;  %v3429_v10 = vld [vmem:[#allocation2 + $0x152] sm:$0xff]  ;;  %v3430_v37 = vld [vmem:[#allocation2 + $0x15a] sm:$0xff] }
 0x8c1   : > { %3773 = vrot.lane.b32.xlu1 %v8518_v0, %s6109_s13  ;;  %v4509_v35 = vsel %vm1664_vm1, %v4477_v56, %v8516_v14 }
 0x8c2   : > { %v8530_v43 = vpop.permute.xlu0 %3631 }
 0x8c3   : > { %v8528_v25 = vpop.permute.xlu1 %3757 }
 0x8c4   : > { %4155 = vrot.lane.b32.xlu0 %v8532_v44, %s6112_s30  ;;  %v4541_v45 = vsel %vm1697_vm2, %v4509_v35, %v8528_v25 }
 0x8c5   : > { %4281 = vrot.lane.b32.xlu1 %v3395_v55, %s6113_s18 }
 0x8c6   : > { %v4140_v21 = vpop.permute.xlu0 %4139 }
 0x8c7   : > { %v4266_v53 = vpop.permute.xlu1 %4265  ;;  %v4636_v42 = vsel %vm1796_vm5, %v4604_v38, %v4140_v21  ;;  %v4478_v21 = vsel %vm1631_vm0, %v8246_v26, %v8057_v32 }
 0x8c8   : > { %3775 = vrot.lane.b32.xlu0 %v8532_v44, %s6109_s13  ;;  %v4667_v63 = vsel %vm1829_vm6, %v4635_v59, %v4266_v53  ;;  %v4510_v8 = vsel %vm1664_vm1, %v4478_v21, %v8530_v43 }
 0x8c9   : > { %3901 = vrot.lane.b32.xlu1 %v3395_v55, %s6110_s14 }
 0x8ca   : > { %v8547_v40 = vpop.permute.xlu0 %3759 }
 0x8cb   : > { %v3886_v28 = vpop.permute.xlu1 %3885  ;;  %v4542_v32 = vsel %vm1697_vm2, %v4510_v8, %v8547_v40  ;;  %v3432_v8 = vld [vmem:[#allocation2 + $0x172] sm:$0xff] }
 0x8cc   : > { %4283 = vrot.lane.b32.xlu0 %v3396_v16, %s6113_s18  ;;  %v4573_v1 = vsel %vm1730_vm3, %v4541_v45, %v3886_v28 }
 0x8cd   : > { %4409 = vrot.lane.b32.xlu1 %v3427_v13, %s6114_s22 }
 0x8ce   : > { %v4268_v15 = vpop.permute.xlu0 %4267 }
 0x8cf   : > { %v4394_v54 = vpop.permute.xlu1 %4393  ;;  %v4668_v3 = vsel %vm1829_vm6, %v4636_v42, %v4268_v15 }
 0x8d0   : > { %v4699_v62 = vsel %vm1862_vm7, %v4667_v63, %v4394_v54  ;;  %3903 = vrot.lane.b32.xlu0 %v3396_v16, %s6110_s14 }
 0x8d1   : > { %4029 = vrot.lane.b32.xlu1 %v3427_v13, %s6111_s19  ;;  %5891 = vmatprep.mubr.msk.f32.mxu1 %vm1904_vm8, %v4699_v62 }
 0x8d2   : > { %v3888_v30 = vpop.permute.xlu0 %3887 }
 0x8d3   : > { %v4014_v27 = vpop.permute.xlu1 %4013 }
 0x8d4   : > { %4411 = vrot.lane.b32.xlu0 %v3428_v22, %s6114_s22  ;;  %v4605_v47 = vsel %vm1763_vm4, %v4573_v1, %v4014_v27 }
 0x8d5   : > { %3649 = vrot.lane.b32.xlu1 %v3427_v13, %s6107_s11  ;;  %v4574_v13 = vsel %vm1730_vm3, %v4542_v32, %v3888_v30 }
 0x8d6   : > { %v4396_v46 = vpop.permute.xlu0 %4395 }
 0x8d7   : > { %v8572_v41 = vpop.permute.xlu1 %3633  ;;  %v4700_v58 = vsel %vm1862_vm7, %v4668_v3, %v4396_v46  ;;  %v9293_v3 = vld [vmem:[#allocation8_spill] sm:$0xff] }
 0x8d8   : > { %4031 = vrot.lane.b32.xlu0 %v3428_v22, %s6111_s19  ;;  %5892 = vmatmul.mubr.msk.f32.gmra.mrb[18].mxu1 %vm1904_vm8, %v4700_v58  ;;  %v4479_v46 = vsel %vm1631_vm0, %v8291_v36, %v9293_v3  ;;  %v3400_v36 = vld [vmem:[#allocation2 + $0x171] sm:$0xff]  ;;  %v3433_v3 = vld [vmem:[#allocation2 + $0x182] sm:$0xff] }
 0x8d9   : > { %4157 = vrot.lane.b32.xlu1 %v3365_v48, %s6112_s30  ;;  %v4511_v58 = vsel %vm1664_vm1, %v4479_v46, %v8572_v41  ;;  %v3402_v46 = vld [vmem:[#allocation2 + $0x189] sm:$0xff] }
 0x8da   : > { %v4016_v39 = vpop.permute.xlu0 %4015 }
 0x8db   : > { %v4142_v18 = vpop.permute.xlu1 %4141  ;;  %v4606_v59 = vsel %vm1763_vm4, %v4574_v13, %v4016_v39  ;;  %v3369_v13 = vld [vmem:[#allocation2 + $0x180] sm:$0xff] }
 0x8dc   : > { %3651 = vrot.lane.b32.xlu0 %v3428_v22, %s6107_s11  ;;  %v4637_v49 = vsel %vm1796_vm5, %v4605_v47, %v4142_v18  ;;  %v3368_v22 = vld [vmem:[#allocation2 + $0x170] sm:$0xff] }
 0x8dd   : > { %3777 = vrot.lane.b32.xlu1 %v3365_v48, %s6109_s13 }
 0x8de   : > { %v8582_v57 = vpop.permute.xlu0 %3635 }
 0x8df   : > { %v8580_v6 = vpop.permute.xlu1 %3761 }
 0x8e0   : > { %4159 = vrot.lane.b32.xlu0 %v3366_v29, %s6112_s30  ;;  %v4543_v48 = vsel %vm1697_vm2, %v4511_v58, %v8580_v6 }
 0x8e1   : > { %4285 = vrot.lane.b32.xlu1 %v3397_v7, %s6113_s18 }
 0x8e2   : > { %v4144_v33 = vpop.permute.xlu0 %4143 }
 0x8e3   : > { %v4270_v34 = vpop.permute.xlu1 %4269  ;;  %v4638_v40 = vsel %vm1796_vm5, %v4606_v59, %v4144_v33 }
 0x8e4   : > { %3779 = vrot.lane.b32.xlu0 %v3366_v29, %s6109_s13  ;;  %v4669_v14 = vsel %vm1829_vm6, %v4637_v49, %v4270_v34  ;;  %v3431_v29 = vld [vmem:[#allocation2 + $0x16a] sm:$0xff] }
 0x8e5   : > { %3905 = vrot.lane.b32.xlu1 %v3397_v7, %s6110_s14 }
 0x8e6   : > { %v8597_v9 = vpop.permute.xlu0 %3763 }
 0x8e7   : > { %v8595_v2 = vpop.permute.xlu1 %3889 }
 0x8e8   : > { %4287 = vrot.lane.b32.xlu0 %v3398_v31, %s6113_s18  ;;  %v4575_v7 = vsel %vm1730_vm3, %v4543_v48, %v8595_v2 }
 0x8e9   : > { %4413 = vrot.lane.b32.xlu1 %v3429_v10, %s6114_s22 }
 0x8ea   : > { %v4272_v55 = vpop.permute.xlu0 %4271 }
 0x8eb   : > { %v4398_v25 = vpop.permute.xlu1 %4397  ;;  %v8615_v23 = vpop.f32.mrb[4].mxu1  ;;  %v4670_v63 = vsel %vm1829_vm6, %v4638_v40, %v4272_v55  ;;  %v3401_v40 = vld [vmem:[#allocation2 + $0x181] sm:$0xff] }
 0x8ec   : > { %v4701_v53 = vsel %vm1862_vm7, %v4669_v14, %v4398_v25  ;;  %3907 = vrot.lane.b32.xlu0 %v3398_v31, %s6110_s14  ;;  %v5048_v17 = vsel %vm1631_vm0, %v8615_v23, 0.0  ;;  %5253 = vst.msk [vmem:[%s8609_s25 + $0x8] sm:$0xff] %vm1631_vm0, %v8615_v23  ;;  %v8626_v28 = vpop.f32.mrb[5].mxu1  ;;  %v9294_v31 = vld [vmem:[#allocation7_spill] sm:$0xff] }
 0x8ed   : > { %4033 = vrot.lane.b32.xlu1 %v3429_v10, %s6111_s19  ;;  %5894 = vmatprep.mubr.msk.f32.mxu1 %vm1904_vm8, %v4701_v53  ;;  %v5047_v26 = vsel %vm1631_vm0, %v8626_v28, 0.0  ;;  %5252 = vst.msk [vmem:[%s8609_s25] sm:$0xff] %vm1631_vm0, %v8626_v28  ;;  %v4480_v47 = vsel %vm1631_vm0, %v8305_v4, %v9294_v31 }
 0x8ee   : > { %v8636_v19 = vpop.permute.xlu0 %3891  ;;  %v5049_v16 = vadd.f32 %v5048_v17, %v5047_v26  ;;  %v4512_v14 = vsel %vm1664_vm1, %v4480_v47, %v8582_v57  ;;  %v3339_v47 = vld [vmem:[#allocation2 + $0x18a] sm:$0xff] }
 0x8ef   : > { %v4018_v43 = vpop.permute.xlu1 %4017  ;;  %v4544_v55 = vsel %vm1697_vm2, %v4512_v14, %v8597_v9 }
 0x8f0   : > { %4415 = vrot.lane.b32.xlu0 %v3430_v37, %s6114_s22  ;;  %v4607_v34 = vsel %vm1763_vm4, %v4575_v7, %v4018_v43  ;;  %v4576_v4 = vsel %vm1730_vm3, %v4544_v55, %v8636_v19 }
 0x8f1   : > { %3653 = vrot.lane.b32.xlu1 %v3429_v10, %s6107_s11 }
 0x8f2   : > { %v4400_v15 = vpop.permute.xlu0 %4399 }
 0x8f3   : > { %v8644_v54 = vpop.permute.xlu1 %3637  ;;  %v4702_v62 = vsel %vm1862_vm7, %v4670_v63, %v4400_v15  ;;  %v3370_v63 = vld [vmem:[#allocation2 + $0x188] sm:$0xff] }
 0x8f4   : > { %4035 = vrot.lane.b32.xlu0 %v3430_v37, %s6111_s19  ;;  %5895 = vmatmul.mubr.msk.f32.gmra.mrb[20].mxu1 %vm1904_vm8, %v4702_v62 }
 0x8f5   : > { %4161 = vrot.lane.b32.xlu1 %v3367_v60, %s6112_s30 }
 0x8f6   : > { %v4020_v61 = vpop.permute.xlu0 %4019 }
 0x8f7   : > { %v4146_v5 = vpop.permute.xlu1 %4145  ;;  %v4608_v17 = vsel %vm1763_vm4, %v4576_v4, %v4020_v61 }
 0x8f8   : > { %3655 = vrot.lane.b32.xlu0 %v3430_v37, %s6107_s11  ;;  %v4639_v41 = vsel %vm1796_vm5, %v4607_v34, %v4146_v5 }
 0x8f9   : > { %3781 = vrot.lane.b32.xlu1 %v3367_v60, %s6109_s13  ;;  %v9295_v60 = vld [vmem:[#allocation10_spill] sm:$0xff] }
 0x8fa   : > { %v8654_v30 = vpop.permute.xlu0 %3639  ;;  %v4481_v5 = vsel %vm1631_vm0, %v8350_v50, %v9295_v60 }
 0x8fb   : > { %v8652_v27 = vpop.permute.xlu1 %3765  ;;  %v4513_v61 = vsel %vm1664_vm1, %v4481_v5, %v8644_v54 }
 0x8fc   : > { %4163 = vrot.lane.b32.xlu0 %v3368_v22, %s6112_s30 }
 0x8fd   : > { %4289 = vrot.lane.b32.xlu1 %v3399_v12, %s6113_s18 }
 0x8fe   : > { %v4148_v42 = vpop.permute.xlu0 %4147 }
 0x8ff   : > { %v4274_v38 = vpop.permute.xlu1 %4273  ;;  %v4640_v57 = vsel %vm1796_vm5, %v4608_v17, %v4148_v42 }
 0x900   : > { %3783 = vrot.lane.b32.xlu0 %v3368_v22, %s6109_s13  ;;  %v4671_v56 = vsel %vm1829_vm6, %v4639_v41, %v4274_v38  ;;  %v9296_v41 = vld [vmem:[#allocation9_spill] sm:$0xff] }
 0x901   : > { %3909 = vrot.lane.b32.xlu1 %v3399_v12, %s6110_s14  ;;  %v4545_v12 = vsel %vm1697_vm2, %v4513_v61, %v8652_v27 }
 0x902   : > { %v8669_v39 = vpop.permute.xlu0 %3767 }
 0x903   : > { %v8667_v18 = vpop.permute.xlu1 %3893  ;;  %v8674_v33 = vpop.f32.mrb[6].mxu1 }
 0x904   : > { %4291 = vrot.lane.b32.xlu0 %v3400_v36, %s6113_s18  ;;  %5255 = vst.msk [vmem:[%s8609_s25 + $0x18] sm:$0xff] %vm1631_vm0, %v8674_v33  ;;  %v8682_v6 = vpop.f32.mrb[7].mxu1  ;;  %v5052_v49 = vsel %vm1631_vm0, %v8674_v33, 0.0  ;;  %v4577_v42 = vsel %vm1730_vm3, %v4545_v12, %v8667_v18 }
 0x905   : > { %4417 = vrot.lane.b32.xlu1 %v3431_v29, %s6114_s22  ;;  %v5050_v35 = vsel %vm1631_vm0, %v8682_v6, 0.0  ;;  %5254 = vst.msk [vmem:[%s8609_s25 + $0x10] sm:$0xff] %vm1631_vm0, %v8682_v6 }
 0x906   : > { %v4276_v2 = vpop.permute.xlu0 %4275  ;;  %v5051_v1 = vadd.f32 %v5050_v35, %v5049_v16 }
 0x907   : > { %v4402_v45 = vpop.permute.xlu1 %4401  ;;  %v4672_v32 = vsel %vm1829_vm6, %v4640_v57, %v4276_v2 }
 0x908   : > { %v4703_v10 = vsel %vm1862_vm7, %v4671_v56, %v4402_v45  ;;  %3911 = vrot.lane.b32.xlu0 %v3400_v36, %s6110_s14  ;;  %v5053_v25 = vadd.f32 %v5052_v49, %v5051_v1  ;;  %v4482_v56 = vsel %vm1631_vm0, %v8364_v52, %v9296_v41 }
 0x909   : > { %4037 = vrot.lane.b32.xlu1 %v3431_v29, %s6111_s19  ;;  %5897 = vmatprep.mubr.msk.f32.mxu1 %vm1904_vm8, %v4703_v10  ;;  %v4514_v45 = vsel %vm1664_vm1, %v4482_v56, %v8654_v30  ;;  %v3436_v30 = vld [vmem:[#allocation2 + $0x1a2] sm:$0xff] }
 0x90a   : > { %v3896_v21 = vpop.permute.xlu0 %3895  ;;  %v4546_v1 = vsel %vm1697_vm2, %v4514_v45, %v8669_v39 }
 0x90b   : > { %v4022_v53 = vpop.permute.xlu1 %4021  ;;  %v4578_v52 = vsel %vm1730_vm3, %v4546_v1, %v3896_v21 }
 0x90c   : > { %4419 = vrot.lane.b32.xlu0 %v3432_v8, %s6114_s22  ;;  %v4609_v50 = vsel %vm1763_vm4, %v4577_v42, %v4022_v53 }
 0x90d   : > { %3657 = vrot.lane.b32.xlu1 %v3431_v29, %s6107_s11 }
 0x90e   : > { %v4404_v43 = vpop.permute.xlu0 %4403 }
 0x90f   : > { %v8710_v26 = vpop.permute.xlu1 %3641  ;;  %v4704_v9 = vsel %vm1862_vm7, %v4672_v32, %v4404_v43 }
 0x910   : > { %4039 = vrot.lane.b32.xlu0 %v3432_v8, %s6111_s19  ;;  %5898 = vmatmul.mubr.msk.f32.gmra.mrb[22].mxu1 %vm1904_vm8, %v4704_v9  ;;  %v9297_v9 = vld [vmem:[#allocation12_spill] sm:$0xff] }
 0x911   : > { %4165 = vrot.lane.b32.xlu1 %v3369_v13, %s6112_s30 }
 0x912   : > { %v4024_v16 = vpop.permute.xlu0 %4023 }
 0x913   : > { %v4150_v19 = vpop.permute.xlu1 %4149  ;;  %v4610_v49 = vsel %vm1763_vm4, %v4578_v52, %v4024_v16  ;;  %v9299_v52 = vld [vmem:[#allocation14_spill] sm:$0xff] }
 0x914   : > { %3659 = vrot.lane.b32.xlu0 %v3432_v8, %s6107_s11  ;;  %v4641_v54 = vsel %vm1796_vm5, %v4609_v50, %v4150_v19  ;;  %s5378_s11 = sshll.u32 %s9312_s28, 1 }
 0x915   : > { %3785 = vrot.lane.b32.xlu1 %v3369_v13, %s6109_s13  ;;  %v4483_v13 = vsel %vm1631_vm0, %v8406_v24, %v9297_v9 }
 0x916   : > { %v8720_v59 = vpop.permute.xlu0 %3643  ;;  %v4515_v19 = vsel %vm1664_vm1, %v4483_v13, %v8710_v26  ;;  %v9300_v13 = vld [vmem:[#allocation13_spill] sm:$0xff] }
 0x917   : > { %v8718_v37 = vpop.permute.xlu1 %3769 }
 0x918   : > { %4167 = vrot.lane.b32.xlu0 %v3370_v63, %s6112_s30  ;;  %v4547_v16 = vsel %vm1697_vm2, %v4515_v19, %v8718_v37  ;;  %v4486_v19 = vsel %vm1631_vm0, %v8476_v51, %v9300_v13 }
 0x919   : > { %4293 = vrot.lane.b32.xlu1 %v3401_v40, %s6113_s18 }
 0x91a   : > { %v4152_v62 = vpop.permute.xlu0 %4151 }
 0x91b   : > { %v4278_v15 = vpop.permute.xlu1 %4277  ;;  %v4642_v14 = vsel %vm1796_vm5, %v4610_v49, %v4152_v62 }
 0x91c   : > { %3787 = vrot.lane.b32.xlu0 %v3370_v63, %s6109_s13  ;;  %v4673_v48 = vsel %vm1829_vm6, %v4641_v54, %v4278_v15 }
 0x91d   : > { %3913 = vrot.lane.b32.xlu1 %v3401_v40, %s6110_s14 }
 0x91e   : > { %v8733_v38 = vpop.permute.xlu0 %3771 }
 0x91f   : > { %v3898_v22 = vpop.permute.xlu1 %3897  ;;  %v8738_v58 = vpop.f32.mrb[8].mxu1 }
 0x920   : > { %4295 = vrot.lane.b32.xlu0 %v3402_v46, %s6113_s18  ;;  %5257 = vst.msk [vmem:[%s8609_s25 + $0x28] sm:$0xff] %vm1631_vm0, %v8738_v58  ;;  %v8746_v27 = vpop.f32.mrb[9].mxu1  ;;  %v5056_v35 = vsel %vm1631_vm0, %v8738_v58, 0.0  ;;  %v4579_v15 = vsel %vm1730_vm3, %v4547_v16, %v3898_v22 }
 0x921   : > { %4421 = vrot.lane.b32.xlu1 %v3433_v3, %s6114_s22  ;;  %v5054_v18 = vsel %vm1631_vm0, %v8746_v27, 0.0  ;;  %5256 = vst.msk [vmem:[%s8609_s25 + $0x20] sm:$0xff] %vm1631_vm0, %v8746_v27 }
 0x922   : > { %v4280_v29 = vpop.permute.xlu0 %4279  ;;  %v5055_v36 = vadd.f32 %v5054_v18, %v5053_v25  ;;  %v3435_v25 = vld [vmem:[#allocation2 + $0x19a] sm:$0xff] }
 0x923   : > { %v4406_v7 = vpop.permute.xlu1 %4405  ;;  %v4674_v55 = vsel %vm1829_vm6, %v4642_v14, %v4280_v29 }
 0x924   : > { %v4705_v34 = vsel %vm1862_vm7, %v4673_v48, %v4406_v7  ;;  %3915 = vrot.lane.b32.xlu0 %v3402_v46, %s6110_s14  ;;  %v5057_v2 = vadd.f32 %v5056_v35, %v5055_v36 }
 0x925   : > { %4041 = vrot.lane.b32.xlu1 %v3433_v3, %s6111_s19  ;;  %5900 = vmatprep.mubr.msk.f32.mxu1 %vm1904_vm8, %v4705_v34  ;;  %v9298_v3 = vld [vmem:[#allocation11_spill] sm:$0xff] }
 0x926   : > { %v3900_v31 = vpop.permute.xlu0 %3899  ;;  %v4484_v46 = vsel %vm1631_vm0, %v8420_v11, %v9298_v3 }
 0x927   : > { %v4026_v10 = vpop.permute.xlu1 %4025  ;;  %v4516_v54 = vsel %vm1664_vm1, %v4484_v46, %v8720_v59 }
 0x928   : > { %4423 = vrot.lane.b32.xlu0 %v3339_v47, %s6114_s22  ;;  %v4611_v62 = vsel %vm1763_vm4, %v4579_v15, %v4026_v10  ;;  %v4548_v18 = vsel %vm1697_vm2, %v4516_v54, %v8733_v38 }
 0x929   : > { %4043 = vrot.lane.b32.xlu1 %v3339_v47, %s6111_s19  ;;  %v4580_v36 = vsel %vm1730_vm3, %v4548_v18, %v3900_v31  ;;  %v4485_v47 = vsel %vm1631_vm0, %v8462_v20, %v9299_v52  ;;  %v9301_v18 = vld [vmem:[#allocation20_spill] sm:$0xff]  ;;  %s9065_s19 = scalar_lea.vmem %s9196_s8, %s5378_s11 }
 0x92a   : > { %v4408_v4 = vpop.permute.xlu0 %4407 }
 0x92b   : > { %v3646_v53 = vpop.permute.xlu1 %3645  ;;  %v4706_v39 = vsel %vm1862_vm7, %v4674_v55, %v4408_v4 }
 0x92c   : > { %4425 = vrot.lane.b32.xlu0 %v3435_v25, %s6114_s22  ;;  %5901 = vmatmul.mubr.msk.f32.gmra.mrb[24].mxu1 %vm1904_vm8, %v4706_v39  ;;  %v4517_v49 = vsel %vm1664_vm1, %v4485_v47, %v3646_v53  ;;  %v9302_v47 = vld [vmem:[#allocation15_spill] sm:$0xff] }
 0x92d   : > { %4427 = vrot.lane.b32.xlu1 %v3436_v30, %s6114_s22 }
 0x92e   : > { %v4028_v8 = vpop.permute.xlu0 %4027 }
 0x92f   : > { %v4154_v21 = vpop.permute.xlu1 %4153  ;;  %v4612_v34 = vsel %vm1763_vm4, %v4580_v36, %v4028_v8 }
 0x930   : > { %v4643_v5 = vsel %vm1796_vm5, %v4611_v62, %v4154_v21 }
 0x932   : > { %v8777_v57 = vpop.permute.xlu0 %3647 }
 0x933   : > { %v3774_v17 = vpop.permute.xlu1 %3773 }
 0x934   : > { %v4549_v14 = vsel %vm1697_vm2, %v4517_v49, %v3774_v17  ;;  %v4488_v49 = vsel %vm1631_vm0, %v8532_v44, %v9302_v47 }
 0x936   : > { %v4156_v43 = vpop.permute.xlu0 %4155 }
 0x937   : > { %v4282_v32 = vpop.permute.xlu1 %4281  ;;  %v4644_v11 = vsel %vm1796_vm5, %v4612_v34, %v4156_v43 }
 0x938   : > { %v4675_v26 = vsel %vm1829_vm6, %v4643_v5, %v4282_v32 }
 0x93a   : > { %v3776_v63 = vpop.permute.xlu0 %3775 }
 0x93b   : > { %v3902_v40 = vpop.permute.xlu1 %3901  ;;  %v8788_v60 = vpop.f32.mrb[10].mxu1 }
 0x93c   : > { %5259 = vst.msk [vmem:[%s8609_s25 + $0x38] sm:$0xff] %vm1631_vm0, %v8788_v60  ;;  %v8794_v24 = vpop.f32.mrb[11].mxu1  ;;  %v5060_v50 = vsel %vm1631_vm0, %v8788_v60, 0.0  ;;  %v4581_v55 = vsel %vm1730_vm3, %v4549_v14, %v3902_v40  ;;  %v4518_v40 = vsel %vm1664_vm1, %v4486_v19, %v8777_v57 }
 0x93d   : > { %v5058_v37 = vsel %vm1631_vm0, %v8794_v24, 0.0  ;;  %5258 = vst.msk [vmem:[%s8609_s25 + $0x30] sm:$0xff] %vm1631_vm0, %v8794_v24  ;;  %v4550_v62 = vsel %vm1697_vm2, %v4518_v40, %v3776_v63 }
 0x93e   : > { %v4284_v12 = vpop.permute.xlu0 %4283  ;;  %v5059_v22 = vadd.f32 %v5058_v37, %v5057_v2 }
 0x93f   : > { %v4410_v61 = vpop.permute.xlu1 %4409  ;;  %v4676_v41 = vsel %vm1829_vm6, %v4644_v11, %v4284_v12 }
 0x940   : > { %v4707_v42 = vsel %vm1862_vm7, %v4675_v26, %v4410_v61  ;;  %v5061_v48 = vadd.f32 %v5060_v50, %v5059_v22 }
 0x941   : > { %5903 = vmatprep.mubr.msk.f32.mxu1 %vm1904_vm8, %v4707_v42 }
 0x942   : > { %v3904_v29 = vpop.permute.xlu0 %3903 }
 0x943   : > { %v4030_v7 = vpop.permute.xlu1 %4029  ;;  %v4582_v37 = vsel %vm1730_vm3, %v4550_v62, %v3904_v29  ;;  %v3176_v62 = vld [vmem:[#allocation2 + $0x150] sm:$0xff] }
 0x944   : > { %v4613_v4 = vsel %vm1763_vm4, %v4581_v55, %v4030_v7  ;;  %v4487_v7 = vsel %vm1631_vm0, %v8518_v0, %v9301_v18 }
 0x946   : > { %v4412_v35 = vpop.permute.xlu0 %4411 }
 0x947   : > { %v3650_v56 = vpop.permute.xlu1 %3649  ;;  %v4708_v45 = vsel %vm1862_vm7, %v4676_v41, %v4412_v35 }
 0x948   : > { %5904 = vmatmul.mubr.msk.f32.gmra.mrb[26].mxu1 %vm1904_vm8, %v4708_v45  ;;  %v4519_v29 = vsel %vm1664_vm1, %v4487_v7, %v3650_v56  ;;  %v3177_v7 = vld [vmem:[#allocation2 + $0x158] sm:$0xff] }
 0x94a   : > { %v4032_v2 = vpop.permute.xlu0 %4031 }
 0x94b   : > { %v4158_v59 = vpop.permute.xlu1 %4157  ;;  %v4614_v61 = vsel %vm1763_vm4, %v4582_v37, %v4032_v2 }
 0x94c   : > { %v4645_v21 = vsel %vm1796_vm5, %v4613_v4, %v4158_v59 }
 0x94e   : > { %v8819_v1 = vpop.permute.xlu0 %3651 }
 0x94f   : > { %v3778_v38 = vpop.permute.xlu1 %3777 }
 0x950   : > { %v4551_v36 = vsel %vm1697_vm2, %v4519_v29, %v3778_v38  ;;  %v3178_v29 = vld [vmem:[#allocation2 + $0x168] sm:$0xff] }
 0x952   : > { %v4160_v31 = vpop.permute.xlu0 %4159 }
 0x953   : > { %v4286_v10 = vpop.permute.xlu1 %4285  ;;  %v4646_v12 = vsel %vm1796_vm5, %v4614_v61, %v4160_v31 }
 0x954   : > { %v4677_v20 = vsel %vm1829_vm6, %v4645_v21, %v4286_v10 }
 0x956   : > { %v3780_v25 = vpop.permute.xlu0 %3779 }
 0x957   : > { %v3906_v30 = vpop.permute.xlu1 %3905  ;;  %v8828_v39 = vpop.f32.mrb[12].mxu1 }
 0x958   : > { %5261 = vst.msk [vmem:[%s8609_s25 + $0x48] sm:$0xff] %vm1631_vm0, %v8828_v39  ;;  %v8834_v8 = vpop.f32.mrb[13].mxu1  ;;  %v5064_v16 = vsel %vm1631_vm0, %v8828_v39, 0.0  ;;  %v4583_v41 = vsel %vm1730_vm3, %v4551_v36, %v3906_v30  ;;  %v4520_v30 = vsel %vm1664_vm1, %v4488_v49, %v8819_v1 }
 0x959   : > { %v5062_v53 = vsel %vm1631_vm0, %v8834_v8, 0.0  ;;  %5260 = vst.msk [vmem:[%s8609_s25 + $0x40] sm:$0xff] %vm1631_vm0, %v8834_v8  ;;  %v4552_v4 = vsel %vm1697_vm2, %v4520_v30, %v3780_v25 }
 0x95a   : > { %v4288_v32 = vpop.permute.xlu0 %4287  ;;  %v5063_v43 = vadd.f32 %v5062_v53, %v5061_v48 }
 0x95b   : > { %v4414_v17 = vpop.permute.xlu1 %4413  ;;  %v4678_v51 = vsel %vm1829_vm6, %v4646_v12, %v4288_v32 }
 0x95c   : > { %v4709_v9 = vsel %vm1862_vm7, %v4677_v20, %v4414_v17  ;;  %v5065_v15 = vadd.f32 %v5064_v16, %v5063_v43 }
 0x95d   : > { %5906 = vmatprep.mubr.msk.f32.mxu1 %vm1904_vm8, %v4709_v9 }
 0x95e   : > { %v3908_v26 = vpop.permute.xlu0 %3907 }
 0x95f   : > { %v4034_v5 = vpop.permute.xlu1 %4033  ;;  %v4584_v53 = vsel %vm1730_vm3, %v4552_v4, %v3908_v26 }
 0x960   : > { %v4615_v35 = vsel %vm1763_vm4, %v4583_v41, %v4034_v5  ;;  %v9303_v5 = vld [vmem:[#allocation17_spill] sm:$0xff]  ;;  %v9304_v41 = vld [vmem:[#allocation16_spill] sm:$0xff] }
 0x961   : > { %v4489_v26 = vsel %vm1631_vm0, %v3176_v62, %v9303_v5  ;;  %v9309_v62 = vld [vmem:[#allocation5_spill] sm:$0xff] }
 0x962   : > { %v4416_v42 = vpop.permute.xlu0 %4415 }
 0x963   : > { %v3654_v22 = vpop.permute.xlu1 %3653  ;;  %v4710_v3 = vsel %vm1862_vm7, %v4678_v51, %v4416_v42 }
 0x964   : > { %5907 = vmatmul.mubr.msk.f32.gmra.mrb[28].mxu1 %vm1904_vm8, %v4710_v3  ;;  %v4521_v37 = vsel %vm1664_vm1, %v4489_v26, %v3654_v22 }
 0x966   : > { %v4036_v46 = vpop.permute.xlu0 %4035 }
 0x967   : > { %v4162_v57 = vpop.permute.xlu1 %4161  ;;  %v4616_v17 = vsel %vm1763_vm4, %v4584_v53, %v4036_v46 }
 0x968   : > { %v4647_v59 = vsel %vm1796_vm5, %v4615_v35, %v4162_v57  ;;  %v4490_v35 = vsel %vm1631_vm0, %v3177_v7, %v9304_v41 }
 0x96a   : > { %v8858_v50 = vpop.permute.xlu0 %3655 }
 0x96b   : > { %v3782_v63 = vpop.permute.xlu1 %3781 }
 0x96c   : > { %v4553_v61 = vsel %vm1697_vm2, %v4521_v37, %v3782_v63  ;;  %v9310_v37 = vld [vmem:[#allocation6_spill] sm:$0xff] }
 0x96e   : > { %v4164_v48 = vpop.permute.xlu0 %4163 }
 0x96f   : > { %v4290_v54 = vpop.permute.xlu1 %4289  ;;  %v4648_v32 = vsel %vm1796_vm5, %v4616_v17, %v4164_v48 }
 0x970   : > { %v4679_v0 = vsel %vm1829_vm6, %v4647_v59, %v4290_v54  ;;  %v9305_v59 = vld [vmem:[#allocation19_spill] sm:$0xff] }
 0x972   : > { %v8865_v11 = vpop.permute.xlu0 %3783 }
 0x973   : > { %v3910_v34 = vpop.permute.xlu1 %3909  ;;  %v8869_v45 = vpop.f32.mrb[14].mxu1 }
 0x974   : > { %5263 = vst.msk [vmem:[%s8609_s25 + $0x58] sm:$0xff] %vm1631_vm0, %v8869_v45  ;;  %v8875_v2 = vpop.f32.mrb[15].mxu1  ;;  %v5068_v14 = vsel %vm1631_vm0, %v8869_v45, 0.0  ;;  %v4585_v42 = vsel %vm1730_vm3, %v4553_v61, %v3910_v34 }
 0x975   : > { %v5066_v56 = vsel %vm1631_vm0, %v8875_v2, 0.0  ;;  %5262 = vst.msk [vmem:[%s8609_s25 + $0x50] sm:$0xff] %vm1631_vm0, %v8875_v2 }
 0x976   : > { %v4292_v10 = vpop.permute.xlu0 %4291  ;;  %v5067_v31 = vadd.f32 %v5066_v56, %v5065_v15 }
 0x977   : > { %v4418_v38 = vpop.permute.xlu1 %4417  ;;  %v4680_v44 = vsel %vm1829_vm6, %v4648_v32, %v4292_v10 }
 0x978   : > { %v4711_v52 = vsel %vm1862_vm7, %v4679_v0, %v4418_v38  ;;  %v5069_v55 = vadd.f32 %v5068_v14, %v5067_v31  ;;  %v4491_v0 = vsel %vm1631_vm0, %v3178_v29, %v9305_v59  ;;  %v4522_v38 = vsel %vm1664_vm1, %v4490_v35, %v8858_v50 }
 0x979   : > { %5909 = vmatprep.mubr.msk.f32.mxu1 %vm1904_vm8, %v4711_v52  ;;  %v3179_v52 = vld [vmem:[#allocation2 + $0x170] sm:$0xff]  ;;  %v4554_v47 = vsel %vm1697_vm2, %v4522_v38, %v8865_v11 }
 0x97a   : > { %v3912_v20 = vpop.permute.xlu0 %3911 }
 0x97b   : > { %v4038_v21 = vpop.permute.xlu1 %4037 }
 0x97c   : > { %v4617_v3 = vsel %vm1763_vm4, %v4585_v42, %v4038_v21  ;;  %v4586_v21 = vsel %vm1730_vm3, %v4554_v47, %v3912_v20  ;;  %v9307_v20 = vld [vmem:[#allocation4_spill] sm:$0xff] }
 0x97e   : > { %v4420_v9 = vpop.permute.xlu0 %4419 }
 0x97f   : > { %v3658_v43 = vpop.permute.xlu1 %3657  ;;  %v4712_v13 = vsel %vm1862_vm7, %v4680_v44, %v4420_v9 }
 0x980   : > { %5910 = vmatmul.mubr.msk.f32.gmra.mrb[30].mxu1 %vm1904_vm8, %v4712_v13  ;;  %v4523_v10 = vsel %vm1664_vm1, %v4491_v0, %v3658_v43 }
 0x982   : > { %v4040_v19 = vpop.permute.xlu0 %4039 }
 0x983   : > { %v4166_v1 = vpop.permute.xlu1 %4165  ;;  %v4618_v50 = vsel %vm1763_vm4, %v4586_v21, %v4040_v19 }
 0x984   : > { %v4649_v46 = vsel %vm1796_vm5, %v4617_v3, %v4166_v1 }
 0x986   : > { %v3660_v16 = vpop.permute.xlu0 %3659 }
 0x987   : > { %v3786_v25 = vpop.permute.xlu1 %3785 }
 0x988   : > { %v4555_v49 = vsel %vm1697_vm2, %v4523_v10, %v3786_v25 }
 0x98a   : > { %v4168_v15 = vpop.permute.xlu0 %4167 }
 0x98b   : > { %v4294_v40 = vpop.permute.xlu1 %4293  ;;  %v4650_v44 = vsel %vm1796_vm5, %v4618_v50, %v4168_v15 }
 0x98c   : > { %v4681_v48 = vsel %vm1829_vm6, %v4649_v46, %v4294_v40  ;;  %v9308_v40 = vld [vmem:[#allocation3_spill] sm:$0xff] }
 0x98e   : > { %v3788_v51 = vpop.permute.xlu0 %3787 }
 0x98f   : > { %v3914_v12 = vpop.permute.xlu1 %3913  ;;  %v8905_v57 = vpop.f32.mrb[16].mxu1 }
 0x990   : > { %5265 = vst.msk [vmem:[%s8609_s25 + $0x68] sm:$0xff] %vm1631_vm0, %v8905_v57  ;;  %v8911_v54 = vpop.f32.mrb[17].mxu1  ;;  %v5072_v56 = vsel %vm1631_vm0, %v8905_v57, 0.0  ;;  %v4587_v53 = vsel %vm1730_vm3, %v4555_v49, %v3914_v12 }
 0x991   : > { %v5070_v22 = vsel %vm1631_vm0, %v8911_v54, 0.0  ;;  %5264 = vst.msk [vmem:[%s8609_s25 + $0x60] sm:$0xff] %vm1631_vm0, %v8911_v54 }
 0x992   : > { %v4296_v18 = vpop.permute.xlu0 %4295  ;;  %v5071_v36 = vadd.f32 %v5070_v22, %v5069_v55  ;;  %v9306_v55 = vld [vmem:[#allocation18_spill] sm:$0xff] }
 0x993   : > { %v4422_v63 = vpop.permute.xlu1 %4421  ;;  %v4492_v4 = vsel %vm1631_vm0, %v3179_v52, %v9306_v55  ;;  %v4682_v43 = vsel %vm1829_vm6, %v4650_v44, %v4296_v18 }
 0x994   : > { %v4713_v34 = vsel %vm1862_vm7, %v4681_v48, %v4422_v63  ;;  %v5073_v31 = vadd.f32 %v5072_v56, %v5071_v36  ;;  %v4524_v17 = vsel %vm1664_vm1, %v4492_v4, %v3660_v16 }
 0x995   : > { %5912 = vmatprep.mubr.msk.f32.mxu1 %vm1904_vm8, %v4713_v34  ;;  %v4556_v11 = vsel %vm1697_vm2, %v4524_v17, %v3788_v51 }
 0x996   : > { %v3916_v30 = vpop.permute.xlu0 %3915 }
 0x997   : > { %v4042_v14 = vpop.permute.xlu1 %4041  ;;  %v4588_v9 = vsel %vm1730_vm3, %v4556_v11, %v3916_v30 }
 0x998   : > { %v4619_v32 = vsel %vm1763_vm4, %v4587_v53, %v4042_v14 }
 0x999   : > { %v4651_v25 = vsel %vm1796_vm5, %v4619_v32, %v9307_v20 }
 0x99a   : > { %v4424_v1 = vpop.permute.xlu0 %4423  ;;  %v4683_v61 = vsel %vm1829_vm6, %v4651_v25, %v9310_v37 }
 0x99b   : > { %v4044_v13 = vpop.permute.xlu1 %4043  ;;  %v4714_v16 = vsel %vm1862_vm7, %v4682_v43, %v4424_v1 }
 0x99c   : > { %v4620_v19 = vsel %vm1763_vm4, %v4588_v9, %v4044_v13  ;;  %5913 = vmatmul.mubr.msk.f32.gmra.mrb[32].mxu1 %vm1904_vm8, %v4714_v16 }
 0x99d   : > { %v4652_v15 = vsel %vm1796_vm5, %v4620_v19, %v9308_v40 }
 0x99e   : > { %v4684_v5 = vsel %vm1829_vm6, %v4652_v15, %v9309_v62  ;;  %v4426_v12 = vpop.permute.xlu0 %4425 }
 0x99f   : > { %v4428_v26 = vpop.permute.xlu1 %4427  ;;  %v4715_v42 = vsel %vm1862_vm7, %v4683_v61, %v4426_v12 }
 0x9a0   : > { %v4716_v51 = vsel %vm1862_vm7, %v4684_v5, %v4428_v26  ;;  %5915 = vmatprep.mubr.msk.f32.mxu1 %vm1904_vm8, %v4715_v42 }
 0x9a1   : > { %5916 = vmatmul.mubr.msk.f32.gmra.mrb[34].mxu1 %vm1904_vm8, %v4716_v51 }
 0x9ab   : > { %v8959_v3 = vpop.f32.mrb[18].mxu1 }
 0x9ac   : > { %5267 = vst.msk [vmem:[%s8609_s25 + $0x78] sm:$0xff] %vm1631_vm0, %v8959_v3  ;;  %v8964_v46 = vpop.f32.mrb[19].mxu1  ;;  %v5076_v63 = vsel %vm1631_vm0, %v8959_v3, 0.0 }
 0x9ad   : > { %v5074_v48 = vsel %vm1631_vm0, %v8964_v46, 0.0  ;;  %5266 = vst.msk [vmem:[%s8609_s25 + $0x70] sm:$0xff] %vm1631_vm0, %v8964_v46 }
 0x9ae   : > { %v5075_v22 = vadd.f32 %v5074_v48, %v5073_v31 }
 0x9b0   : > { %v5077_v18 = vadd.f32 %v5076_v63, %v5075_v22 }
 0x9c7   : > { %v8973_v7 = vpop.f32.mrb[20].mxu1 }
 0x9c8   : > { %5269 = vst.msk [vmem:[%s8609_s25 + $0x88] sm:$0xff] %vm1631_vm0, %v8973_v7  ;;  %v8978_v29 = vpop.f32.mrb[21].mxu1  ;;  %v5080_v41 = vsel %vm1631_vm0, %v8973_v7, 0.0 }
 0x9c9   : > { %v5078_v36 = vsel %vm1631_vm0, %v8978_v29, 0.0  ;;  %5268 = vst.msk [vmem:[%s8609_s25 + $0x80] sm:$0xff] %vm1631_vm0, %v8978_v29 }
 0x9ca   : > { %v5079_v34 = vadd.f32 %v5078_v36, %v5077_v18 }
 0x9cc   : > { %v5081_v35 = vadd.f32 %v5080_v41, %v5079_v34 }
 0x9e3   : > { %v8987_v59 = vpop.f32.mrb[22].mxu1 }
 0x9e4   : > { %5271 = vst.msk [vmem:[%s8609_s25 + $0x98] sm:$0xff] %vm1631_vm0, %v8987_v59  ;;  %v8992_v0 = vpop.f32.mrb[23].mxu1  ;;  %v5084_v10 = vsel %vm1631_vm0, %v8987_v59, 0.0 }
 0x9e5   : > { %v5082_v56 = vsel %vm1631_vm0, %v8992_v0, 0.0  ;;  %5270 = vst.msk [vmem:[%s8609_s25 + $0x90] sm:$0xff] %vm1631_vm0, %v8992_v0 }
 0x9e6   : > { %v5083_v38 = vadd.f32 %v5082_v56, %v5081_v35 }
 0x9e8   : > { %v5085_v31 = vadd.f32 %v5084_v10, %v5083_v38 }
 0x9ff   : > { %v9001_v52 = vpop.f32.mrb[24].mxu1 }
 0xa00   : > { %5273 = vst.msk [vmem:[%s8609_s25 + $0xa8] sm:$0xff] %vm1631_vm0, %v9001_v52  ;;  %v9006_v47 = vpop.f32.mrb[25].mxu1  ;;  %v5088_v30 = vsel %vm1631_vm0, %v9001_v52, 0.0 }
 0xa01   : > { %v5086_v49 = vsel %vm1631_vm0, %v9006_v47, 0.0  ;;  %5272 = vst.msk [vmem:[%s8609_s25 + $0xa0] sm:$0xff] %vm1631_vm0, %v9006_v47 }
 0xa02   : > { %v5087_v14 = vadd.f32 %v5086_v49, %v5085_v31 }
 0xa04   : > { %v5089_v55 = vadd.f32 %v5088_v30, %v5087_v14 }
 0xa1b   : > { %v9015_v4 = vpop.f32.mrb[26].mxu1 }
 0xa1c   : > { %5275 = vst.msk [vmem:[%s8609_s25 + $0xb8] sm:$0xff] %vm1631_vm0, %v9015_v4  ;;  %v9020_v21 = vpop.f32.mrb[27].mxu1  ;;  %v5092_v17 = vsel %vm1631_vm0, %v9015_v4, 0.0 }
 0xa1d   : > { %v5090_v53 = vsel %vm1631_vm0, %v9020_v21, 0.0  ;;  %5274 = vst.msk [vmem:[%s8609_s25 + $0xb0] sm:$0xff] %vm1631_vm0, %v9020_v21 }
 0xa1e   : > { %v5091_v50 = vadd.f32 %v5090_v53, %v5089_v55 }
 0xa20   : > { %v5093_v32 = vadd.f32 %v5092_v17, %v5091_v50 }
 0xa37   : > { %v9029_v44 = vpop.f32.mrb[28].mxu1 }
 0xa38   : > { %5277 = vst.msk [vmem:[%s8609_s25 + $0xc8] sm:$0xff] %vm1631_vm0, %v9029_v44  ;;  %v9034_v11 = vpop.f32.mrb[29].mxu1  ;;  %v5096_v13 = vsel %vm1631_vm0, %v9029_v44, 0.0 }
 0xa39   : > { %v5094_v43 = vsel %vm1631_vm0, %v9034_v11, 0.0  ;;  %5276 = vst.msk [vmem:[%s8609_s25 + $0xc0] sm:$0xff] %vm1631_vm0, %v9034_v11 }
 0xa3a   : > { %v5095_v9 = vadd.f32 %v5094_v43, %v5093_v32 }
 0xa3c   : > { %v5097_v1 = vadd.f32 %v5096_v13, %v5095_v9 }
 0xa53   : > { %v5911_v20 = vpop.f32.mrb[30].mxu1 }
 0xa54   : > { %5279 = vst.msk [vmem:[%s8609_s25 + $0xd8] sm:$0xff] %vm1631_vm0, %v5911_v20  ;;  %v5018_v25 = vpop.f32.mrb[31].mxu1  ;;  %v5100_v40 = vsel %vm1631_vm0, %v5911_v20, 0.0 }
 0xa55   : > { %v5098_v19 = vsel %vm1631_vm0, %v5018_v25, 0.0  ;;  %5278 = vst.msk [vmem:[%s8609_s25 + $0xd0] sm:$0xff] %vm1631_vm0, %v5018_v25 }
 0xa56   : > { %v5099_v16 = vadd.f32 %v5098_v19, %v5097_v1 }
 0xa58   : > { %v5101_v15 = vadd.f32 %v5100_v40, %v5099_v16 }
 0xa6f   : > { %v5914_v62 = vpop.f32.mrb[32].mxu1 }
 0xa70   : > { %5281 = vst.msk [vmem:[%s8609_s25 + $0xe8] sm:$0xff] %vm1631_vm0, %v5914_v62  ;;  %v5028_v5 = vpop.f32.mrb[33].mxu1  ;;  %v5104_v61 = vsel %vm1631_vm0, %v5914_v62, 0.0 }
 0xa71   : > { %v5102_v26 = vsel %vm1631_vm0, %v5028_v5, 0.0  ;;  %5280 = vst.msk [vmem:[%s8609_s25 + $0xe0] sm:$0xff] %vm1631_vm0, %v5028_v5 }
 0xa72   : > { %v5103_v37 = vadd.f32 %v5102_v26, %v5101_v15 }
 0xa74   : > { %v5917_v12 = vpop.f32.mrb[34].mxu1  ;;  %v5105_v51 = vadd.f32 %v5104_v61, %v5103_v37 }
 0xa75   : > { %5283 = vst.msk [vmem:[%s8609_s25 + $0xf8] sm:$0xff] %vm1631_vm0, %v5917_v12  ;;  %v5038_v42 = vpop.f32.mrb[35].mxu1  ;;  %v5108_v63 = vsel %vm1631_vm0, %v5917_v12, 0.0 }
 0xa76   : > { %v5106_v48 = vsel %vm1631_vm0, %v5038_v42, 0.0  ;;  %5282 = vst.msk [vmem:[%s8609_s25 + $0xf0] sm:$0xff] %vm1631_vm0, %v5038_v42 }
 0xa77   : > { %v5107_v22 = vadd.f32 %v5106_v48, %v5105_v51 }
 0xa79   : > { %v5109_v18 = vadd.f32 %v5108_v63, %v5107_v22 }
 0xa7b   : > { %v5110_v36 = vrot.slane %v5109_v18, 4 }
 0xa7d   : > { %v5111_v34 = vadd.f32 %v5110_v36, %v5109_v18 }
 0xa7f   : > { %v5112_v41 = vrot.slane %v5111_v34, 2 }
 0xa81   : > { %v5113_v35 = vadd.f32 %v5112_v41, %v5111_v34 }
 0xa83   : > { %v5114_v56 = vrot.slane %v5113_v35, 1 }
 0xa85   : > { %v5115_v38 = vadd.f32 %v5114_v56, %v5113_v35 }
 0xa87   : > { %v5116_v10 = vmul.f32 0.00390625, %v5115_v38 }
 0xa89   : > { %v5117_v31 = vsub.f32 %v8626_v28, %v5116_v10  ;;  %v5118_v49 = vsub.f32 %v8615_v23, %v5116_v10  ;;  %v5119_v14 = vsub.f32 %v8682_v6, %v5116_v10  ;;  %v5120_v30 = vsub.f32 %v8674_v33, %v5116_v10  ;;  %5250 = vst.msk [vmem:[%s9065_s19] sm:$0x1] %vm3078_vm11, %v5116_v10 }
 0xa8a   : > { %v5121_v55 = vsub.f32 %v8746_v27, %v5116_v10  ;;  %v5122_v53 = vsub.f32 %v8738_v58, %v5116_v10  ;;  %v5123_v50 = vsub.f32 %v8794_v24, %v5116_v10  ;;  %v5124_v17 = vsub.f32 %v8788_v60, %v5116_v10 }
 0xa8b   : > { %v5125_v32 = vsub.f32 %v8834_v8, %v5116_v10  ;;  %v5126_v28 = vsub.f32 %v8828_v39, %v5116_v10  ;;  %v5127_v23 = vsub.f32 %v8875_v2, %v5116_v10  ;;  %v5128_v6 = vsub.f32 %v8869_v45, %v5116_v10 }
 0xa8c   : > { %v5129_v33 = vsub.f32 %v8911_v54, %v5116_v10  ;;  %v5130_v43 = vsub.f32 %v8905_v57, %v5116_v10  ;;  %v5131_v27 = vsub.f32 %v8964_v46, %v5116_v10  ;;  %v5132_v58 = vsub.f32 %v8959_v3, %v5116_v10 }
 0xa8d   : > { %v5133_v24 = vsub.f32 %v8978_v29, %v5116_v10  ;;  %v5134_v60 = vsub.f32 %v8973_v7, %v5116_v10  ;;  %v9088_v8 = vsub.f32 %v8992_v0, %v5116_v10  ;;  %v9091_v39 = vsub.f32 %v8987_v59, %v5116_v10 }
 0xa8e   : > { %v9094_v45 = vsub.f32 %v9006_v47, %v5116_v10  ;;  %v9097_v2 = vsub.f32 %v9001_v52, %v5116_v10  ;;  %v9100_v57 = vsub.f32 %v9020_v21, %v5116_v10  ;;  %v9103_v54 = vsub.f32 %v9015_v4, %v5116_v10 }
 0xa8f   : > { %v9106_v3 = vsub.f32 %v9034_v11, %v5116_v10  ;;  %v9109_v46 = vsub.f32 %v9029_v44, %v5116_v10  ;;  %v9111_v7 = vsub.f32 %v5018_v25, %v5116_v10  ;;  %v9113_v29 = vsub.f32 %v5911_v20, %v5116_v10 }
 0xa90   : > { %v9115_v59 = vsub.f32 %v5028_v5, %v5116_v10  ;;  %v9117_v0 = vsub.f32 %v5914_v62, %v5116_v10  ;;  %v9119_v52 = vsub.f32 %v5038_v42, %v5116_v10  ;;  %v9121_v47 = vsub.f32 %v5917_v12, %v5116_v10 }
 0xa91   : > { %v5149_v4 = vmul.f32 %v5117_v31, %v5117_v31  ;;  %v5150_v21 = vmul.f32 %v5118_v49, %v5118_v49  ;;  %v5151_v9 = vmul.f32 %v5119_v14, %v5119_v14  ;;  %v5152_v11 = vmul.f32 %v5120_v30, %v5120_v30 }
 0xa92   : > { %v5153_v25 = vmul.f32 %v5121_v55, %v5121_v55  ;;  %v5154_v16 = vmul.f32 %v5122_v53, %v5122_v53  ;;  %v5155_v62 = vmul.f32 %v5123_v50, %v5123_v50  ;;  %v5156_v37 = vmul.f32 %v5124_v17, %v5124_v17 }
 0xa93   : > { %v5181_v13 = vsel %vm1631_vm0, %v5149_v4, 0.0  ;;  %v5182_v44 = vsel %vm1631_vm0, %v5150_v21, 0.0  ;;  %v5184_v20 = vsel %vm1631_vm0, %v5151_v9, 0.0  ;;  %v5186_v40 = vsel %vm1631_vm0, %v5152_v11, 0.0 }
 0xa94   : > { %v5183_v1 = vadd.f32 %v5182_v44, %v5181_v13  ;;  %v5188_v5 = vsel %vm1631_vm0, %v5153_v25, 0.0  ;;  %v5190_v61 = vsel %vm1631_vm0, %v5154_v16, 0.0  ;;  %v5157_v51 = vmul.f32 %v5125_v32, %v5125_v32 }
 0xa95   : > { %v5192_v42 = vsel %vm1631_vm0, %v5155_v62, 0.0  ;;  %v5158_v22 = vmul.f32 %v5126_v28, %v5126_v28  ;;  %v5194_v63 = vsel %vm1631_vm0, %v5156_v37, 0.0  ;;  %v5159_v36 = vmul.f32 %v5127_v23, %v5127_v23 }
 0xa96   : > { %v5185_v19 = vadd.f32 %v5184_v20, %v5183_v1  ;;  %v5196_v34 = vsel %vm1631_vm0, %v5157_v51, 0.0  ;;  %v5160_v35 = vmul.f32 %v5128_v6, %v5128_v6  ;;  %v5161_v10 = vmul.f32 %v5129_v33, %v5129_v33 }
 0xa97   : > { %v5198_v56 = vsel %vm1631_vm0, %v5158_v22, 0.0  ;;  %v5200_v31 = vsel %vm1631_vm0, %v5159_v36, 0.0  ;;  %v5162_v14 = vmul.f32 %v5130_v43, %v5130_v43  ;;  %v5163_v53 = vmul.f32 %v5131_v27, %v5131_v27 }
 0xa98   : > { %v5187_v15 = vadd.f32 %v5186_v40, %v5185_v19  ;;  %v5202_v30 = vsel %vm1631_vm0, %v5160_v35, 0.0  ;;  %v5204_v50 = vsel %vm1631_vm0, %v5161_v10, 0.0  ;;  %v5164_v32 = vmul.f32 %v5132_v58, %v5132_v58 }
 0xa99   : > { %v5206_v28 = vsel %vm1631_vm0, %v5162_v14, 0.0  ;;  %v5165_v6 = vmul.f32 %v5133_v24, %v5133_v24  ;;  %v5208_v4 = vsel %vm1631_vm0, %v5163_v53, 0.0  ;;  %v5166_v33 = vmul.f32 %v5134_v60, %v5134_v60 }
 0xa9a   : > { %v5189_v26 = vadd.f32 %v5188_v5, %v5187_v15  ;;  %v5210_v9 = vsel %vm1631_vm0, %v5164_v32, 0.0  ;;  %v5167_v43 = vmul.f32 %v9088_v8, %v9088_v8  ;;  %v5168_v58 = vmul.f32 %v9091_v39, %v9091_v39 }
 0xa9b   : > { %v5212_v27 = vsel %vm1631_vm0, %v5165_v6, 0.0  ;;  %v5214_v44 = vsel %vm1631_vm0, %v5166_v33, 0.0  ;;  %v5169_v24 = vmul.f32 %v9094_v45, %v9094_v45  ;;  %v5170_v20 = vmul.f32 %v9097_v2, %v9097_v2 }
 0xa9c   : > { %v5191_v12 = vadd.f32 %v5190_v61, %v5189_v26  ;;  %v5216_v60 = vsel %vm1631_vm0, %v5167_v43, 0.0  ;;  %v5218_v8 = vsel %vm1631_vm0, %v5168_v58, 0.0  ;;  %v5171_v16 = vmul.f32 %v9100_v57, %v9100_v57 }
 0xa9d   : > { %v5220_v39 = vsel %vm1631_vm0, %v5169_v24, 0.0  ;;  %v5172_v15 = vmul.f32 %v9103_v54, %v9103_v54  ;;  %v5222_v45 = vsel %vm1631_vm0, %v5170_v20, 0.0  ;;  %v5173_v5 = vmul.f32 %v9106_v3, %v9106_v3 }
 0xa9e   : > { %v5193_v48 = vadd.f32 %v5192_v42, %v5191_v12  ;;  %v5224_v2 = vsel %vm1631_vm0, %v5171_v16, 0.0  ;;  %v5174_v37 = vmul.f32 %v9109_v46, %v9109_v46  ;;  %v5175_v12 = vmul.f32 %v9111_v7, %v9111_v7 }
 0xa9f   : > { %v5226_v57 = vsel %vm1631_vm0, %v5172_v15, 0.0  ;;  %v5228_v54 = vsel %vm1631_vm0, %v5173_v5, 0.0  ;;  %v5176_v42 = vmul.f32 %v9113_v29, %v9113_v29  ;;  %v5177_v22 = vmul.f32 %v9115_v59, %v9115_v59 }
 0xaa0   : > { %v5195_v18 = vadd.f32 %v5194_v63, %v5193_v48  ;;  %v5230_v3 = vsel %vm1631_vm0, %v5174_v37, 0.0  ;;  %v5232_v46 = vsel %vm1631_vm0, %v5175_v12, 0.0  ;;  %v5180_v35 = vmul.f32 %v9121_v47, %v9121_v47 }
 0xaa1   : > { %v5234_v7 = vsel %vm1631_vm0, %v5176_v42, 0.0  ;;  %v5236_v29 = vsel %vm1631_vm0, %v5177_v22, 0.0 }
 0xaa2   : > { %v5197_v41 = vadd.f32 %v5196_v34, %v5195_v18  ;;  %v5178_v18 = vmul.f32 %v9117_v0, %v9117_v0  ;;  %v5179_v34 = vmul.f32 %v9119_v52, %v9119_v52  ;;  %v5242_v0 = vsel %vm1631_vm0, %v5180_v35, 0.0 }
 0xaa4   : > { %v5199_v38 = vadd.f32 %v5198_v56, %v5197_v41  ;;  %v5238_v59 = vsel %vm1631_vm0, %v5178_v18, 0.0 }
 0xaa6   : > { %v5201_v49 = vadd.f32 %v5200_v31, %v5199_v38  ;;  %v5240_v38 = vsel %vm1631_vm0, %v5179_v34, 0.0 }
 0xaa8   : > { %v5203_v55 = vadd.f32 %v5202_v30, %v5201_v49 }
 0xaaa   : > { %v5205_v17 = vadd.f32 %v5204_v50, %v5203_v55 }
 0xaac   : > { %v5207_v23 = vadd.f32 %v5206_v28, %v5205_v17 }
 0xaae   : > { %v5209_v21 = vadd.f32 %v5208_v4, %v5207_v23 }
 0xab0   : > { %v5211_v11 = vadd.f32 %v5210_v9, %v5209_v21 }
 0xab2   : > { %v5213_v13 = vadd.f32 %v5212_v27, %v5211_v11 }
 0xab4   : > { %v5215_v1 = vadd.f32 %v5214_v44, %v5213_v13 }
 0xab6   : > { %v5217_v25 = vadd.f32 %v5216_v60, %v5215_v1 }
 0xab8   : > { %v5219_v19 = vadd.f32 %v5218_v8, %v5217_v25 }
 0xaba   : > { %v5221_v40 = vadd.f32 %v5220_v39, %v5219_v19 }
 0xabc   : > { %v5223_v62 = vadd.f32 %v5222_v45, %v5221_v40 }
 0xabe   : > { %v5225_v26 = vadd.f32 %v5224_v2, %v5223_v62 }
 0xac0   : > { %v5227_v61 = vadd.f32 %v5226_v57, %v5225_v26 }
 0xac2   : > { %v5229_v51 = vadd.f32 %v5228_v54, %v5227_v61 }
 0xac4   : > { %v5231_v48 = vadd.f32 %v5230_v3, %v5229_v51 }
 0xac6   : > { %v5233_v63 = vadd.f32 %v5232_v46, %v5231_v48 }
 0xac8   : > { %v5235_v36 = vadd.f32 %v5234_v7, %v5233_v63 }
 0xaca   : > { %v5237_v41 = vadd.f32 %v5236_v29, %v5235_v36 }
 0xacc   : > { %v5239_v56 = vadd.f32 %v5238_v59, %v5237_v41 }
 0xace   : > { %v5241_v10 = vadd.f32 %v5240_v38, %v5239_v56 }
 0xad0   : > { %v5243_v31 = vadd.f32 %v5242_v0, %v5241_v10 }
 0xad2   : > { %v5244_v49 = vrot.slane %v5243_v31, 4 }
 0xad4   : > { %v5245_v14 = vadd.f32 %v5244_v49, %v5243_v31 }
 0xad6   : > { %v5246_v30 = vrot.slane %v5245_v14, 2 }
 0xad8   : > { %v5247_v52 = vadd.f32 %v5246_v30, %v5245_v14 }
 0xada   : > { %v5248_v55 = vrot.slane %v5247_v52, 1 }
 0xadc   : > { %v5249_v53 = vadd.f32 %v5248_v55, %v5247_v52 }
 0xade   : > { %5251 = vst.msk [vmem:[%s9065_s19 + $0x1] sm:$0x1] %vm3078_vm11, %v5249_v53 }
 0xadf PF: > { %s19_s27 = sadd.s32 1, %s6105_s27  }
 0xae0   : > { %p16_p4 = scmp.ge.s32.totalorder %s19_s27, 4  }
 0xae2   :  { %18 = sbr.rel (!%p16_p4) target bundleno = 1 (0x1), region = 95 }

</bundles_post_ra>
